<compile_context>
chip_gen: v7x
topology: tpu7x:2x2x1
jax: 0.10.0
libtpu: 0.0.40
codegen_flags: <defaults>
</compile_context>

<pallas_src>
import functools
import math

import jax
import jax.numpy as jnp
from jax.experimental import pallas as pl
from jax.experimental.pallas import tpu as pltpu

# ---------------- model config (small but conv-stack-compatible) ----------------
INPUT_SHAPE = (1, 36, 36)   # C, H, W  (36 is the smallest spatial that survives 8/4, 4/2, 3/1 convs)
OUT_SIZE = 6
INNER_LINEAR_DIM = 64
HIDDEN_DIM = 32
LSTM_LAYERS = 1             # single layer implemented
BATCH = 2
TRAJ_LEN = 8

# conv geometry for 36x36 inputs: 36 -(8/4)-> 8 -(4/2)-> 3 -(3/1)-> 1
_K1, _S1, _H1 = 8, 4, 8
_K2, _S2, _H2 = 4, 2, 3

_VMEM_SPEC = pl.BlockSpec(memory_space=pltpu.MemorySpace.VMEM)
_VMEM_LIMIT = 16 * 1024 * 1024


# ---------------- the single fused Pallas kernel ----------------
def _drqn_kernel(p1_ref, w1_ref, b1_ref, w2_ref, b2_ref, w3_ref, b3_ref,
                 fcw_ref, fcb_ref, wih_ref, bl_ref, whh_ref, l2w_ref, l2b_ref,
                 o_ref, hs_ref, *, n_frames, batch, traj_len, hidden_dim):
    """conv1 + conv2 + conv3 + fc + unrolled LSTM + lin2, everything VMEM/vreg resident."""
    N = n_frames
    B = batch
    H = hidden_dim

    # ---- conv1: ONE GEMM with x-expanded weights ----
    # p1: (H1*N, K1*S) rows (y, n); w1: (K1*S, H1*C1) cols (x, c)
    a1 = jnp.dot(p1_ref[...], w1_ref[...], preferred_element_type=jnp.float32) + b1_ref[...]
    a1 = jnp.maximum(a1, 0.0).astype(jnp.bfloat16)                  # (128, 256) rows (y,n), cols (x,c)

    # ---- conv2: 12 slab GEMMs on contiguous 16-row slabs of a1 ----
    # w2_ref[ki]: (H1*C1, H2*C2) block-diagonal over ox2
    n_oc2 = w2_ref.shape[-1]                                        # H2*C2 = 192
    a2_blocks = []
    for oy2 in range(_H2):
        acc = jnp.zeros((N, n_oc2), jnp.float32)
        for ki in range(_K2):
            r0 = (_S2 * oy2 + ki) * N
            acc = acc + jnp.dot(a1[r0:r0 + N, :], w2_ref[ki],
                                preferred_element_type=jnp.float32)
        a2_blocks.append(jnp.maximum(acc + b2_ref[...], 0.0).astype(jnp.bfloat16))  # (N, 192)

    # ---- conv3 (3x3 kernel over the 3x3 map == full spatial): 3 accumulated K=192 GEMMs ----
    c3 = w3_ref.shape[-1]
    f3 = jnp.zeros((N, c3), jnp.float32)
    for oy2 in range(_H2):
        f3 = f3 + jnp.dot(a2_blocks[oy2], w3_ref[oy2], preferred_element_type=jnp.float32)
    f3 = jnp.maximum(f3 + b3_ref[...], 0.0).astype(jnp.bfloat16)    # (N, 64)

    # ---- fc (Linear + ReLU) and hoisted LSTM input projection ----
    xfc = jnp.maximum(jnp.dot(f3, fcw_ref[...], preferred_element_type=jnp.float32)
                      + fcb_ref[...], 0.0).astype(jnp.bfloat16)     # (N, inner)
    gx = (jnp.dot(xfc, wih_ref[...], preferred_element_type=jnp.float32)
          + bl_ref[...])                                            # (N, 4H) f32, rows (t, b)

    # ---- LSTM recurrence, fully unrolled; h/c carried in vregs, bf16 recurrent matmul ----
    whh = whh_ref[...]                                              # (H, 4H) bf16
    h = jnp.zeros((B, H), jnp.float32)
    c = jnp.zeros((B, H), jnp.float32)
    for t in range(traj_len):
        g = gx[t * B:(t + 1) * B, :] + jnp.dot(h.astype(jnp.bfloat16), whh,
                                               preferred_element_type=jnp.float32)
        i_g = jax.nn.sigmoid(g[:, 0:H])
        f_g = jax.nn.sigmoid(g[:, H:2 * H])
        g_g = jnp.tanh(g[:, 2 * H:3 * H])
        o_g = jax.nn.sigmoid(g[:, 3 * H:4 * H])
        c = f_g * c + i_g * g_g
        h = o_g * jnp.tanh(c)
        hs_ref[t * B:(t + 1) * B, :] = h                            # tiny VMEM scratch store

    # ---- lin2 hoisted out of the loop: one GEMM + one output store ----
    q = (jnp.dot(jnp.maximum(hs_ref[...], 0.0), l2w_ref[...],
                 preferred_element_type=jnp.float32) + l2b_ref[...])
    o_ref[...] = q


# ---------------- XLA-side glue: row-wide conv1 patches from the raw input ----------------
def _conv1_row_patches(x):
    """(B, T, 1, S, S) -> (H1*N, K1*S) bf16; row (y, n) holds input rows 4y..4y+7 full width.
    Frames ordered n = t*B + b so the LSTM time axis is the leading row group downstream."""
    B, T, S = x.shape[0], x.shape[1], x.shape[-1]
    xf = x.reshape(B, T, S, S).transpose(1, 0, 2, 3).reshape(B * T, S, S).astype(jnp.bfloat16)
    rows = jnp.stack([xf[:, _S1 * y:_S1 * y + _K1, :] for y in range(_H1)], axis=0)  # (H1, N, K1, S)
    return rows.reshape(_H1 * B * T, _K1 * S)


# ---------------- one-time parameter prep (layouts + dtypes baked in) ----------------
def prepare_params(p):
    bf = jnp.bfloat16
    c1_w, c2_w, c3_w = p["c1_w"], p["c2_w"], p["c3_w"]
    C1, C2, C3 = c1_w.shape[0], c2_w.shape[0], c3_w.shape[0]
    S_in = INPUT_SHAPE[-1]

    # conv1 expanded over the 8 output columns: (ki*S + xin, x*C1 + c), zero outside window.
    w1_t = c1_w[:, 0].transpose(1, 2, 0)                              # (ki, kj, c)
    w1exp = jnp.zeros((_K1, S_in, _H1, C1), jnp.float32)
    for x in range(_H1):
        w1exp = w1exp.at[:, _S1 * x:_S1 * x + _K1, x, :].set(w1_t)

    # conv2 block-diagonal over ox2: per ki, (x*C1 + c, ox2*C2 + c2), zero outside window.
    w2_t = c2_w.transpose(2, 3, 1, 0)                                 # (ki, kj, c, c2)
    w2big = jnp.zeros((_K2, _H1, C1, _H2, C2), jnp.float32)
    for ox2 in range(_H2):
        w2big = w2big.at[:, _S2 * ox2:_S2 * ox2 + _K2, :, ox2, :].set(w2_t)

    # conv3: per oy2, (ox2*C2 + c2, c3)
    w3big = c3_w.transpose(2, 3, 1, 0).reshape(_H2, _H2 * C2, C3)

    return {
        "w1exp": w1exp.reshape(_K1 * S_in, _H1 * C1).astype(bf),      # (288, 256)
        "b1bc": jnp.tile(p["c1_b"], _H1).reshape(1, -1).astype(jnp.float32),
        "w2big": w2big.reshape(_K2, _H1 * C1, _H2 * C2).astype(bf),   # (4, 256, 192)
        "b2bc": jnp.tile(p["c2_b"], _H2).reshape(1, -1).astype(jnp.float32),
        "w3big": w3big.astype(bf),                                    # (3, 192, 64)
        "b3": p["c3_b"].reshape(1, -1).astype(jnp.float32),
        "fcw": p["fc_w"].T.astype(bf),
        "fcb": p["fc_b"].reshape(1, -1).astype(jnp.float32),
        "wih_t": p["wih"].T.astype(bf),                               # (inner, 4H)
        "b_lstm": (p["bih"] + p["bhh"]).reshape(1, -1).astype(jnp.float32),
        "whh_t": p["whh"].T.astype(bf),                               # (H, 4H), bf16 recurrence
        "l2w": p["lin2_w"].T.astype(jnp.float32),
        "l2b": p["lin2_b"].reshape(1, -1).astype(jnp.float32),
    }


# ---------------- full forward (single pallas_call) ----------------
def drqn_forward_pallas(x, pp):
    B, T = x.shape[0], x.shape[1]
    N = B * T

    p1w = _conv1_row_patches(x)                                       # (128, 288) bf16

    q2d = pl.pallas_call(
        functools.partial(_drqn_kernel, n_frames=N, batch=B, traj_len=T,
                          hidden_dim=HIDDEN_DIM),
        out_shape=jax.ShapeDtypeStruct((N, OUT_SIZE), jnp.float32),
        in_specs=[_VMEM_SPEC] * 14,
        out_specs=_VMEM_SPEC,
        scratch_shapes=[pltpu.VMEM((N, HIDDEN_DIM), jnp.float32)],     # per-step h collection
        compiler_params=pltpu.CompilerParams(vmem_limit_bytes=_VMEM_LIMIT),
    )(p1w, pp["w1exp"], pp["b1bc"], pp["w2big"], pp["b2bc"], pp["w3big"], pp["b3"],
      pp["fcw"], pp["fcb"], pp["wih_t"], pp["b_lstm"], pp["whh_t"], pp["l2w"], pp["l2b"])

    # rows are (t, b)-ordered; final layout is (B, T, OUT)
    return q2d.reshape(T, B, OUT_SIZE).transpose(1, 0, 2)


# ---------------- pure-JAX reference (same math, f32, no Pallas) ----------------
def _im2col(x, k, stride):
    N, C, Hh, Ww = x.shape
    Ho = (Hh - k) // stride + 1
    Wo = (Ww - k) // stride + 1
    cols = []
    for i in range(k):
        for j in range(k):
            cols.append(x[:, :, i:i + stride * Ho:stride, j:j + stride * Wo:stride])
    patches = jnp.stack(cols, axis=0).reshape(k, k, N, C, Ho, Wo)
    patches = patches.transpose(2, 4, 5, 3, 0, 1).reshape(N * Ho * Wo, C * k * k)
    return patches, Ho, Wo


def _linear_ref(x, w, b, *, in_relu=False, out_relu=False):
    if in_relu:
        x = jnp.maximum(x, 0.0)
    y = x @ w + b.reshape(1, -1)
    return jnp.maximum(y, 0.0) if out_relu else y


def _conv_ref(x, w, b, stride):
    N = x.shape[0]
    Cout, _, k, _ = w.shape
    patches, Ho, Wo = _im2col(x, k, stride)
    y = _linear_ref(patches, w.reshape(Cout, -1).T, b, out_relu=True)
    return y.reshape(N, Ho, Wo, Cout).transpose(0, 3, 1, 2)


def _lstm_ref(x_tm, wih_t, whh_t, b, H):
    T, B, _ = x_tm.shape
    h = jnp.zeros((B, H), jnp.float32)
    c = jnp.zeros((B, H), jnp.float32)
    outs = []
    for t in range(T):
        g = x_tm[t] @ wih_t + h @ whh_t + b
        i_g = jax.nn.sigmoid(g[:, :H])
        f_g = jax.nn.sigmoid(g[:, H:2 * H])
        g_g = jnp.tanh(g[:, 2 * H:3 * H])
        o_g = jax.nn.sigmoid(g[:, 3 * H:4 * H])
        c = f_g * c + i_g * g_g
        h = o_g * jnp.tanh(c)
        outs.append(h)
    return jnp.stack(outs, 0)


def drqn_forward_ref(x, p):
    B, T = x.shape[0], x.shape[1]
    S = x.shape[-1]
    x = x.reshape(B * T, 1, S, S)
    x = _conv_ref(x, p["c1_w"], p["c1_b"], 4)
    x = _conv_ref(x, p["c2_w"], p["c2_b"], 2)
    x = _conv_ref(x, p["c3_w"], p["c3_b"], 1)
    x = x.reshape(B * T, -1)
    x = _linear_ref(x, p["fc_w"].T, p["fc_b"], out_relu=True)
    x_tm = x.reshape(B, T, -1).transpose(1, 0, 2)
    h_tm = _lstm_ref(x_tm, p["wih"].T, p["whh"].T,
                     (p["bih"] + p["bhh"]).reshape(1, -1), HIDDEN_DIM)
    h = h_tm.transpose(1, 0, 2).reshape(B * T, HIDDEN_DIM)
    q = _linear_ref(h, p["lin2_w"].T, p["lin2_b"], in_relu=True)
    return q.reshape(B, T, OUT_SIZE)


# ---------------- deterministic parameter init (torch-like shapes) ----------------
def init_params(key):
    def u(key, shape, fan_in):
        bound = 1.0 / math.sqrt(fan_in)
        return jax.random.uniform(key, shape, jnp.float32, -bound, bound)

    ks = jax.random.split(key, 16)
    feat = 64  # feature_size() for (1, 36, 36): conv stack -> (64, 1, 1)
    H4 = 4 * HIDDEN_DIM
    return {
        "c1_w": u(ks[0], (32, 1, 8, 8), 1 * 8 * 8),   "c1_b": u(ks[1], (32,), 1 * 8 * 8),
        "c2_w": u(ks[2], (64, 32, 4, 4), 32 * 4 * 4), "c2_b": u(ks[3], (64,), 32 * 4 * 4),
        "c3_w": u(ks[4], (64, 64, 3, 3), 64 * 3 * 3), "c3_b": u(ks[5], (64,), 64 * 3 * 3),
        "fc_w": u(ks[6], (INNER_LINEAR_DIM, feat), feat), "fc_b": u(ks[7], (INNER_LINEAR_DIM,), feat),
        "wih": u(ks[8], (H4, INNER_LINEAR_DIM), HIDDEN_DIM),
        "whh": u(ks[9], (H4, HIDDEN_DIM), HIDDEN_DIM),
        "bih": u(ks[10], (H4,), HIDDEN_DIM),
        "bhh": u(ks[11], (H4,), HIDDEN_DIM),
        "lin2_w": u(ks[12], (OUT_SIZE, HIDDEN_DIM), HIDDEN_DIM),
        "lin2_b": u(ks[13], (OUT_SIZE,), HIDDEN_DIM),
    }


if __name__ == "__main__":
    key = jax.random.PRNGKey(0)
    pkey, xkey = jax.random.split(key)
    params = init_params(pkey)
    prepped = prepare_params(params)   # layout / dtype prep happens once, outside the forward

    # input: (batch, traj_len, C=1, H, W) — the 5-D batched forward path
    x = jax.random.normal(xkey, (BATCH, TRAJ_LEN, *INPUT_SHAPE), jnp.float32)

    q_pallas = jax.block_until_ready(jax.jit(drqn_forward_pallas)(x, prepped))
    q_ref = jax.block_until_ready(jax.jit(drqn_forward_ref)(x, params))

    assert q_pallas.shape == (BATCH, TRAJ_LEN, OUT_SIZE)
    assert bool(jnp.all(jnp.isfinite(q_pallas)))
    assert jnp.allclose(q_pallas, q_ref, rtol=2e-2, atol=2e-2)
    print("KERNEL_OK")
</pallas_src>

<mosaic_0001>
module attributes {stable_mosaic.version = 11 : i64} {
  func.func @_drqn_kernel(%arg0: memref<128x288xbf16, #tpu.memory_space<vmem>>, %arg1: memref<288x256xbf16, #tpu.memory_space<vmem>>, %arg2: memref<1x256xf32, #tpu.memory_space<vmem>>, %arg3: memref<4x256x192xbf16, #tpu.memory_space<vmem>>, %arg4: memref<1x192xf32, #tpu.memory_space<vmem>>, %arg5: memref<3x192x64xbf16, #tpu.memory_space<vmem>>, %arg6: memref<1x64xf32, #tpu.memory_space<vmem>>, %arg7: memref<64x64xbf16, #tpu.memory_space<vmem>>, %arg8: memref<1x64xf32, #tpu.memory_space<vmem>>, %arg9: memref<64x128xbf16, #tpu.memory_space<vmem>>, %arg10: memref<1x128xf32, #tpu.memory_space<vmem>>, %arg11: memref<32x128xbf16, #tpu.memory_space<vmem>>, %arg12: memref<32x6xf32, #tpu.memory_space<vmem>>, %arg13: memref<1x6xf32, #tpu.memory_space<vmem>>, %arg14: memref<16x6xf32, #tpu.memory_space<vmem>>, %arg15: memref<16x32xf32, #tpu.memory_space<vmem>>) attributes {dimension_semantics = [], scalar_prefetch = 0 : i64, scratch_operands = 1 : i64, tpu.core_type = #tpu.core_type<tc>} {
    %c0 = arith.constant 0 : index
    %c0_0 = arith.constant 0 : index
    %0 = vector.load %arg0[%c0, %c0_0] : memref<128x288xbf16, #tpu.memory_space<vmem>>, vector<128x288xbf16>
    %c0_1 = arith.constant 0 : index
    %c0_2 = arith.constant 0 : index
    %1 = vector.load %arg1[%c0_1, %c0_2] : memref<288x256xbf16, #tpu.memory_space<vmem>>, vector<288x256xbf16>
    %cst = arith.constant dense<0.000000e+00> : vector<128x256xf32>
    %2 = tpu.matmul %0, %1, %cst {dimension_numbers = #tpu.dot_dimension_numbers<[1], [0], [0], [1], [0, 0, 1, 1], [], []>} : vector<128x288xbf16>, vector<288x256xbf16>, vector<128x256xf32> -> vector<128x256xf32>
    %c0_3 = arith.constant 0 : index
    %c0_4 = arith.constant 0 : index
    %3 = vector.load %arg2[%c0_3, %c0_4] : memref<1x256xf32, #tpu.memory_space<vmem>>, vector<1x256xf32>
    %4 = vector.broadcast %3 : vector<1x256xf32> to vector<128x256xf32>
    %5 = arith.addf %2, %4 : vector<128x256xf32>
    %cst_5 = arith.constant 0.000000e+00 : f32
    %6 = vector.broadcast %cst_5 : f32 to vector<128x256xf32>
    %7 = arith.maximumf %5, %6 : vector<128x256xf32>
    %8 = arith.truncf %7 : vector<128x256xf32> to vector<128x256xbf16>
    %cst_6 = arith.constant 0.000000e+00 : f32
    %9 = vector.broadcast %cst_6 : f32 to vector<16x192xf32>
    %10 = vector.extract_strided_slice %8 {offsets = [0, 0], sizes = [16, 256], strides = [1, 1]} : vector<128x256xbf16> to vector<16x256xbf16>
    %c0_7 = arith.constant 0 : index
    %c0_8 = arith.constant 0 : index
    %c0_9 = arith.constant 0 : index
    %11 = vector.load %arg3[%c0_7, %c0_8, %c0_9] : memref<4x256x192xbf16, #tpu.memory_space<vmem>>, vector<1x256x192xbf16>
    %12 = vector.shape_cast %11 : vector<1x256x192xbf16> to vector<256x192xbf16>
    %cst_10 = arith.constant dense<0.000000e+00> : vector<16x192xf32>
    %13 = tpu.matmul %10, %12, %cst_10 {dimension_numbers = #tpu.dot_dimension_numbers<[1], [0], [0], [1], [0, 0, 1, 1], [], []>} : vector<16x256xbf16>, vector<256x192xbf16>, vector<16x192xf32> -> vector<16x192xf32>
    %14 = arith.addf %9, %13 : vector<16x192xf32>
    %15 = vector.extract_strided_slice %8 {offsets = [16, 0], sizes = [16, 256], strides = [1, 1]} : vector<128x256xbf16> to vector<16x256xbf16>
    %c1 = arith.constant 1 : index
    %c0_11 = arith.constant 0 : index
    %c0_12 = arith.constant 0 : index
    %16 = vector.load %arg3[%c1, %c0_11, %c0_12] : memref<4x256x192xbf16, #tpu.memory_space<vmem>>, vector<1x256x192xbf16>
    %17 = vector.shape_cast %16 : vector<1x256x192xbf16> to vector<256x192xbf16>
    %cst_13 = arith.constant dense<0.000000e+00> : vector<16x192xf32>
    %18 = tpu.matmul %15, %17, %cst_13 {dimension_numbers = #tpu.dot_dimension_numbers<[1], [0], [0], [1], [0, 0, 1, 1], [], []>} : vector<16x256xbf16>, vector<256x192xbf16>, vector<16x192xf32> -> vector<16x192xf32>
    %19 = arith.addf %14, %18 : vector<16x192xf32>
    %20 = vector.extract_strided_slice %8 {offsets = [32, 0], sizes = [16, 256], strides = [1, 1]} : vector<128x256xbf16> to vector<16x256xbf16>
    %c2 = arith.constant 2 : index
    %c0_14 = arith.constant 0 : index
    %c0_15 = arith.constant 0 : index
    %21 = vector.load %arg3[%c2, %c0_14, %c0_15] : memref<4x256x192xbf16, #tpu.memory_space<vmem>>, vector<1x256x192xbf16>
    %22 = vector.shape_cast %21 : vector<1x256x192xbf16> to vector<256x192xbf16>
    %cst_16 = arith.constant dense<0.000000e+00> : vector<16x192xf32>
    %23 = tpu.matmul %20, %22, %cst_16 {dimension_numbers = #tpu.dot_dimension_numbers<[1], [0], [0], [1], [0, 0, 1, 1], [], []>} : vector<16x256xbf16>, vector<256x192xbf16>, vector<16x192xf32> -> vector<16x192xf32>
    %24 = arith.addf %19, %23 : vector<16x192xf32>
    %25 = vector.extract_strided_slice %8 {offsets = [48, 0], sizes = [16, 256], strides = [1, 1]} : vector<128x256xbf16> to vector<16x256xbf16>
    %c3 = arith.constant 3 : index
    %c0_17 = arith.constant 0 : index
    %c0_18 = arith.constant 0 : index
    %26 = vector.load %arg3[%c3, %c0_17, %c0_18] : memref<4x256x192xbf16, #tpu.memory_space<vmem>>, vector<1x256x192xbf16>
    %27 = vector.shape_cast %26 : vector<1x256x192xbf16> to vector<256x192xbf16>
    %cst_19 = arith.constant dense<0.000000e+00> : vector<16x192xf32>
    %28 = tpu.matmul %25, %27, %cst_19 {dimension_numbers = #tpu.dot_dimension_numbers<[1], [0], [0], [1], [0, 0, 1, 1], [], []>} : vector<16x256xbf16>, vector<256x192xbf16>, vector<16x192xf32> -> vector<16x192xf32>
    %29 = arith.addf %24, %28 : vector<16x192xf32>
    %c0_20 = arith.constant 0 : index
    %c0_21 = arith.constant 0 : index
    %30 = vector.load %arg4[%c0_20, %c0_21] : memref<1x192xf32, #tpu.memory_space<vmem>>, vector<1x192xf32>
    %31 = vector.broadcast %30 : vector<1x192xf32> to vector<16x192xf32>
    %32 = arith.addf %29, %31 : vector<16x192xf32>
    %cst_22 = arith.constant 0.000000e+00 : f32
    %33 = vector.broadcast %cst_22 : f32 to vector<16x192xf32>
    %34 = arith.maximumf %32, %33 : vector<16x192xf32>
    %35 = arith.truncf %34 : vector<16x192xf32> to vector<16x192xbf16>
    %cst_23 = arith.constant 0.000000e+00 : f32
    %36 = vector.broadcast %cst_23 : f32 to vector<16x192xf32>
    %37 = vector.extract_strided_slice %8 {offsets = [32, 0], sizes = [16, 256], strides = [1, 1]} : vector<128x256xbf16> to vector<16x256xbf16>
    %c0_24 = arith.constant 0 : index
    %c0_25 = arith.constant 0 : index
    %c0_26 = arith.constant 0 : index
    %38 = vector.load %arg3[%c0_24, %c0_25, %c0_26] : memref<4x256x192xbf16, #tpu.memory_space<vmem>>, vector<1x256x192xbf16>
    %39 = vector.shape_cast %38 : vector<1x256x192xbf16> to vector<256x192xbf16>
    %cst_27 = arith.constant dense<0.000000e+00> : vector<16x192xf32>
    %40 = tpu.matmul %37, %39, %cst_27 {dimension_numbers = #tpu.dot_dimension_numbers<[1], [0], [0], [1], [0, 0, 1, 1], [], []>} : vector<16x256xbf16>, vector<256x192xbf16>, vector<16x192xf32> -> vector<16x192xf32>
    %41 = arith.addf %36, %40 : vector<16x192xf32>
    %42 = vector.extract_strided_slice %8 {offsets = [48, 0], sizes = [16, 256], strides = [1, 1]} : vector<128x256xbf16> to vector<16x256xbf16>
    %c1_28 = arith.constant 1 : index
    %c0_29 = arith.constant 0 : index
    %c0_30 = arith.constant 0 : index
    %43 = vector.load %arg3[%c1_28, %c0_29, %c0_30] : memref<4x256x192xbf16, #tpu.memory_space<vmem>>, vector<1x256x192xbf16>
    %44 = vector.shape_cast %43 : vector<1x256x192xbf16> to vector<256x192xbf16>
    %cst_31 = arith.constant dense<0.000000e+00> : vector<16x192xf32>
    %45 = tpu.matmul %42, %44, %cst_31 {dimension_numbers = #tpu.dot_dimension_numbers<[1], [0], [0], [1], [0, 0, 1, 1], [], []>} : vector<16x256xbf16>, vector<256x192xbf16>, vector<16x192xf32> -> vector<16x192xf32>
    %46 = arith.addf %41, %45 : vector<16x192xf32>
    %47 = vector.extract_strided_slice %8 {offsets = [64, 0], sizes = [16, 256], strides = [1, 1]} : vector<128x256xbf16> to vector<16x256xbf16>
    %c2_32 = arith.constant 2 : index
    %c0_33 = arith.constant 0 : index
    %c0_34 = arith.constant 0 : index
    %48 = vector.load %arg3[%c2_32, %c0_33, %c0_34] : memref<4x256x192xbf16, #tpu.memory_space<vmem>>, vector<1x256x192xbf16>
    %49 = vector.shape_cast %48 : vector<1x256x192xbf16> to vector<256x192xbf16>
    %cst_35 = arith.constant dense<0.000000e+00> : vector<16x192xf32>
    %50 = tpu.matmul %47, %49, %cst_35 {dimension_numbers = #tpu.dot_dimension_numbers<[1], [0], [0], [1], [0, 0, 1, 1], [], []>} : vector<16x256xbf16>, vector<256x192xbf16>, vector<16x192xf32> -> vector<16x192xf32>
    %51 = arith.addf %46, %50 : vector<16x192xf32>
    %52 = vector.extract_strided_slice %8 {offsets = [80, 0], sizes = [16, 256], strides = [1, 1]} : vector<128x256xbf16> to vector<16x256xbf16>
    %c3_36 = arith.constant 3 : index
    %c0_37 = arith.constant 0 : index
    %c0_38 = arith.constant 0 : index
    %53 = vector.load %arg3[%c3_36, %c0_37, %c0_38] : memref<4x256x192xbf16, #tpu.memory_space<vmem>>, vector<1x256x192xbf16>
    %54 = vector.shape_cast %53 : vector<1x256x192xbf16> to vector<256x192xbf16>
    %cst_39 = arith.constant dense<0.000000e+00> : vector<16x192xf32>
    %55 = tpu.matmul %52, %54, %cst_39 {dimension_numbers = #tpu.dot_dimension_numbers<[1], [0], [0], [1], [0, 0, 1, 1], [], []>} : vector<16x256xbf16>, vector<256x192xbf16>, vector<16x192xf32> -> vector<16x192xf32>
    %56 = arith.addf %51, %55 : vector<16x192xf32>
    %c0_40 = arith.constant 0 : index
    %c0_41 = arith.constant 0 : index
    %57 = vector.load %arg4[%c0_40, %c0_41] : memref<1x192xf32, #tpu.memory_space<vmem>>, vector<1x192xf32>
    %58 = vector.broadcast %57 : vector<1x192xf32> to vector<16x192xf32>
    %59 = arith.addf %56, %58 : vector<16x192xf32>
    %cst_42 = arith.constant 0.000000e+00 : f32
    %60 = vector.broadcast %cst_42 : f32 to vector<16x192xf32>
    %61 = arith.maximumf %59, %60 : vector<16x192xf32>
    %62 = arith.truncf %61 : vector<16x192xf32> to vector<16x192xbf16>
    %cst_43 = arith.constant 0.000000e+00 : f32
    %63 = vector.broadcast %cst_43 : f32 to vector<16x192xf32>
    %64 = vector.extract_strided_slice %8 {offsets = [64, 0], sizes = [16, 256], strides = [1, 1]} : vector<128x256xbf16> to vector<16x256xbf16>
    %c0_44 = arith.constant 0 : index
    %c0_45 = arith.constant 0 : index
    %c0_46 = arith.constant 0 : index
    %65 = vector.load %arg3[%c0_44, %c0_45, %c0_46] : memref<4x256x192xbf16, #tpu.memory_space<vmem>>, vector<1x256x192xbf16>
    %66 = vector.shape_cast %65 : vector<1x256x192xbf16> to vector<256x192xbf16>
    %cst_47 = arith.constant dense<0.000000e+00> : vector<16x192xf32>
    %67 = tpu.matmul %64, %66, %cst_47 {dimension_numbers = #tpu.dot_dimension_numbers<[1], [0], [0], [1], [0, 0, 1, 1], [], []>} : vector<16x256xbf16>, vector<256x192xbf16>, vector<16x192xf32> -> vector<16x192xf32>
    %68 = arith.addf %63, %67 : vector<16x192xf32>
    %69 = vector.extract_strided_slice %8 {offsets = [80, 0], sizes = [16, 256], strides = [1, 1]} : vector<128x256xbf16> to vector<16x256xbf16>
    %c1_48 = arith.constant 1 : index
    %c0_49 = arith.constant 0 : index
    %c0_50 = arith.constant 0 : index
    %70 = vector.load %arg3[%c1_48, %c0_49, %c0_50] : memref<4x256x192xbf16, #tpu.memory_space<vmem>>, vector<1x256x192xbf16>
    %71 = vector.shape_cast %70 : vector<1x256x192xbf16> to vector<256x192xbf16>
    %cst_51 = arith.constant dense<0.000000e+00> : vector<16x192xf32>
    %72 = tpu.matmul %69, %71, %cst_51 {dimension_numbers = #tpu.dot_dimension_numbers<[1], [0], [0], [1], [0, 0, 1, 1], [], []>} : vector<16x256xbf16>, vector<256x192xbf16>, vector<16x192xf32> -> vector<16x192xf32>
    %73 = arith.addf %68, %72 : vector<16x192xf32>
    %74 = vector.extract_strided_slice %8 {offsets = [96, 0], sizes = [16, 256], strides = [1, 1]} : vector<128x256xbf16> to vector<16x256xbf16>
    %c2_52 = arith.constant 2 : index
    %c0_53 = arith.constant 0 : index
    %c0_54 = arith.constant 0 : index
    %75 = vector.load %arg3[%c2_52, %c0_53, %c0_54] : memref<4x256x192xbf16, #tpu.memory_space<vmem>>, vector<1x256x192xbf16>
    %76 = vector.shape_cast %75 : vector<1x256x192xbf16> to vector<256x192xbf16>
    %cst_55 = arith.constant dense<0.000000e+00> : vector<16x192xf32>
    %77 = tpu.matmul %74, %76, %cst_55 {dimension_numbers = #tpu.dot_dimension_numbers<[1], [0], [0], [1], [0, 0, 1, 1], [], []>} : vector<16x256xbf16>, vector<256x192xbf16>, vector<16x192xf32> -> vector<16x192xf32>
    %78 = arith.addf %73, %77 : vector<16x192xf32>
    %79 = vector.extract_strided_slice %8 {offsets = [112, 0], sizes = [16, 256], strides = [1, 1]} : vector<128x256xbf16> to vector<16x256xbf16>
    %c3_56 = arith.constant 3 : index
    %c0_57 = arith.constant 0 : index
    %c0_58 = arith.constant 0 : index
    %80 = vector.load %arg3[%c3_56, %c0_57, %c0_58] : memref<4x256x192xbf16, #tpu.memory_space<vmem>>, vector<1x256x192xbf16>
    %81 = vector.shape_cast %80 : vector<1x256x192xbf16> to vector<256x192xbf16>
    %cst_59 = arith.constant dense<0.000000e+00> : vector<16x192xf32>
    %82 = tpu.matmul %79, %81, %cst_59 {dimension_numbers = #tpu.dot_dimension_numbers<[1], [0], [0], [1], [0, 0, 1, 1], [], []>} : vector<16x256xbf16>, vector<256x192xbf16>, vector<16x192xf32> -> vector<16x192xf32>
    %83 = arith.addf %78, %82 : vector<16x192xf32>
    %c0_60 = arith.constant 0 : index
    %c0_61 = arith.constant 0 : index
    %84 = vector.load %arg4[%c0_60, %c0_61] : memref<1x192xf32, #tpu.memory_space<vmem>>, vector<1x192xf32>
    %85 = vector.broadcast %84 : vector<1x192xf32> to vector<16x192xf32>
    %86 = arith.addf %83, %85 : vector<16x192xf32>
    %cst_62 = arith.constant 0.000000e+00 : f32
    %87 = vector.broadcast %cst_62 : f32 to vector<16x192xf32>
    %88 = arith.maximumf %86, %87 : vector<16x192xf32>
    %89 = arith.truncf %88 : vector<16x192xf32> to vector<16x192xbf16>
    %cst_63 = arith.constant 0.000000e+00 : f32
    %90 = vector.broadcast %cst_63 : f32 to vector<16x64xf32>
    %c0_64 = arith.constant 0 : index
    %c0_65 = arith.constant 0 : index
    %c0_66 = arith.constant 0 : index
    %91 = vector.load %arg5[%c0_64, %c0_65, %c0_66] : memref<3x192x64xbf16, #tpu.memory_space<vmem>>, vector<1x192x64xbf16>
    %92 = vector.shape_cast %91 : vector<1x192x64xbf16> to vector<192x64xbf16>
    %cst_67 = arith.constant dense<0.000000e+00> : vector<16x64xf32>
    %93 = tpu.matmul %35, %92, %cst_67 {dimension_numbers = #tpu.dot_dimension_numbers<[1], [0], [0], [1], [0, 0, 1, 1], [], []>} : vector<16x192xbf16>, vector<192x64xbf16>, vector<16x64xf32> -> vector<16x64xf32>
    %94 = arith.addf %90, %93 : vector<16x64xf32>
    %c1_68 = arith.constant 1 : index
    %c0_69 = arith.constant 0 : index
    %c0_70 = arith.constant 0 : index
    %95 = vector.load %arg5[%c1_68, %c0_69, %c0_70] : memref<3x192x64xbf16, #tpu.memory_space<vmem>>, vector<1x192x64xbf16>
    %96 = vector.shape_cast %95 : vector<1x192x64xbf16> to vector<192x64xbf16>
    %cst_71 = arith.constant dense<0.000000e+00> : vector<16x64xf32>
    %97 = tpu.matmul %62, %96, %cst_71 {dimension_numbers = #tpu.dot_dimension_numbers<[1], [0], [0], [1], [0, 0, 1, 1], [], []>} : vector<16x192xbf16>, vector<192x64xbf16>, vector<16x64xf32> -> vector<16x64xf32>
    %98 = arith.addf %94, %97 : vector<16x64xf32>
    %c2_72 = arith.constant 2 : index
    %c0_73 = arith.constant 0 : index
    %c0_74 = arith.constant 0 : index
    %99 = vector.load %arg5[%c2_72, %c0_73, %c0_74] : memref<3x192x64xbf16, #tpu.memory_space<vmem>>, vector<1x192x64xbf16>
    %100 = vector.shape_cast %99 : vector<1x192x64xbf16> to vector<192x64xbf16>
    %cst_75 = arith.constant dense<0.000000e+00> : vector<16x64xf32>
    %101 = tpu.matmul %89, %100, %cst_75 {dimension_numbers = #tpu.dot_dimension_numbers<[1], [0], [0], [1], [0, 0, 1, 1], [], []>} : vector<16x192xbf16>, vector<192x64xbf16>, vector<16x64xf32> -> vector<16x64xf32>
    %102 = arith.addf %98, %101 : vector<16x64xf32>
    %c0_76 = arith.constant 0 : index
    %c0_77 = arith.constant 0 : index
    %103 = vector.load %arg6[%c0_76, %c0_77] : memref<1x64xf32, #tpu.memory_space<vmem>>, vector<1x64xf32>
    %104 = vector.broadcast %103 : vector<1x64xf32> to vector<16x64xf32>
    %105 = arith.addf %102, %104 : vector<16x64xf32>
    %cst_78 = arith.constant 0.000000e+00 : f32
    %106 = vector.broadcast %cst_78 : f32 to vector<16x64xf32>
    %107 = arith.maximumf %105, %106 : vector<16x64xf32>
    %108 = arith.truncf %107 : vector<16x64xf32> to vector<16x64xbf16>
    %c0_79 = arith.constant 0 : index
    %c0_80 = arith.constant 0 : index
    %109 = vector.load %arg7[%c0_79, %c0_80] : memref<64x64xbf16, #tpu.memory_space<vmem>>, vector<64x64xbf16>
    %cst_81 = arith.constant dense<0.000000e+00> : vector<16x64xf32>
    %110 = tpu.matmul %108, %109, %cst_81 {dimension_numbers = #tpu.dot_dimension_numbers<[1], [0], [0], [1], [0, 0, 1, 1], [], []>} : vector<16x64xbf16>, vector<64x64xbf16>, vector<16x64xf32> -> vector<16x64xf32>
    %c0_82 = arith.constant 0 : index
    %c0_83 = arith.constant 0 : index
    %111 = vector.load %arg8[%c0_82, %c0_83] : memref<1x64xf32, #tpu.memory_space<vmem>>, vector<1x64xf32>
    %112 = vector.broadcast %111 : vector<1x64xf32> to vector<16x64xf32>
    %113 = arith.addf %110, %112 : vector<16x64xf32>
    %cst_84 = arith.constant 0.000000e+00 : f32
    %114 = vector.broadcast %cst_84 : f32 to vector<16x64xf32>
    %115 = arith.maximumf %113, %114 : vector<16x64xf32>
    %116 = arith.truncf %115 : vector<16x64xf32> to vector<16x64xbf16>
    %c0_85 = arith.constant 0 : index
    %c0_86 = arith.constant 0 : index
    %117 = vector.load %arg9[%c0_85, %c0_86] : memref<64x128xbf16, #tpu.memory_space<vmem>>, vector<64x128xbf16>
    %cst_87 = arith.constant dense<0.000000e+00> : vector<16x128xf32>
    %118 = tpu.matmul %116, %117, %cst_87 {dimension_numbers = #tpu.dot_dimension_numbers<[1], [0], [0], [1], [0, 0, 1, 1], [], []>} : vector<16x64xbf16>, vector<64x128xbf16>, vector<16x128xf32> -> vector<16x128xf32>
    %c0_88 = arith.constant 0 : index
    %c0_89 = arith.constant 0 : index
    %119 = vector.load %arg10[%c0_88, %c0_89] : memref<1x128xf32, #tpu.memory_space<vmem>>, vector<1x128xf32>
    %120 = vector.broadcast %119 : vector<1x128xf32> to vector<16x128xf32>
    %121 = arith.addf %118, %120 : vector<16x128xf32>
    %c0_90 = arith.constant 0 : index
    %c0_91 = arith.constant 0 : index
    %122 = vector.load %arg11[%c0_90, %c0_91] : memref<32x128xbf16, #tpu.memory_space<vmem>>, vector<32x128xbf16>
    %cst_92 = arith.constant 0.000000e+00 : f32
    %123 = vector.broadcast %cst_92 : f32 to vector<2x32xf32>
    %cst_93 = arith.constant 0.000000e+00 : f32
    %124 = vector.broadcast %cst_93 : f32 to vector<2x32xf32>
    %125 = vector.extract_strided_slice %121 {offsets = [0, 0], sizes = [2, 128], strides = [1, 1]} : vector<16x128xf32> to vector<2x128xf32>
    %126 = arith.truncf %123 : vector<2x32xf32> to vector<2x32xbf16>
    %cst_94 = arith.constant dense<0.000000e+00> : vector<2x128xf32>
    %127 = tpu.matmul %126, %122, %cst_94 {dimension_numbers = #tpu.dot_dimension_numbers<[1], [0], [0], [1], [0, 0, 1, 1], [], []>} : vector<2x32xbf16>, vector<32x128xbf16>, vector<2x128xf32> -> vector<2x128xf32>
    %128 = arith.addf %125, %127 : vector<2x128xf32>
    %129 = vector.extract_strided_slice %128 {offsets = [0, 0], sizes = [2, 32], strides = [1, 1]} : vector<2x128xf32> to vector<2x32xf32>
    %130 = arith.negf %129 : vector<2x32xf32>
    %131 = math.exp %130 : vector<2x32xf32>
    %cst_95 = arith.constant 1.000000e+00 : f32
    %132 = vector.broadcast %cst_95 : f32 to vector<2x32xf32>
    %133 = arith.addf %132, %131 : vector<2x32xf32>
    %134 = arith.divf %132, %133 : vector<2x32xf32>
    %135 = vector.extract_strided_slice %128 {offsets = [0, 32], sizes = [2, 32], strides = [1, 1]} : vector<2x128xf32> to vector<2x32xf32>
    %136 = arith.negf %135 : vector<2x32xf32>
    %137 = math.exp %136 : vector<2x32xf32>
    %cst_96 = arith.constant 1.000000e+00 : f32
    %138 = vector.broadcast %cst_96 : f32 to vector<2x32xf32>
    %139 = arith.addf %138, %137 : vector<2x32xf32>
    %140 = arith.divf %138, %139 : vector<2x32xf32>
    %141 = vector.extract_strided_slice %128 {offsets = [0, 64], sizes = [2, 32], strides = [1, 1]} : vector<2x128xf32> to vector<2x32xf32>
    %142 = math.tanh %141 : vector<2x32xf32>
    %143 = vector.extract_strided_slice %128 {offsets = [0, 96], sizes = [2, 32], strides = [1, 1]} : vector<2x128xf32> to vector<2x32xf32>
    %144 = arith.negf %143 : vector<2x32xf32>
    %145 = math.exp %144 : vector<2x32xf32>
    %cst_97 = arith.constant 1.000000e+00 : f32
    %146 = vector.broadcast %cst_97 : f32 to vector<2x32xf32>
    %147 = arith.addf %146, %145 : vector<2x32xf32>
    %148 = arith.divf %146, %147 : vector<2x32xf32>
    %149 = arith.mulf %140, %124 : vector<2x32xf32>
    %150 = arith.mulf %134, %142 : vector<2x32xf32>
    %151 = arith.addf %149, %150 : vector<2x32xf32>
    %152 = math.tanh %151 : vector<2x32xf32>
    %153 = arith.mulf %148, %152 : vector<2x32xf32>
    %c0_98 = arith.constant 0 : index
    %c0_99 = arith.constant 0 : index
    %154 = vector.load %arg15[%c0_98, %c0_99] : memref<16x32xf32, #tpu.memory_space<vmem>>, vector<2x32xf32>
    tpu.vector_store %arg15[%c0_98, %c0_99], %153 {strides = array<i32>} : memref<16x32xf32, #tpu.memory_space<vmem>>, vector<2x32xf32>,
    %155 = vector.extract_strided_slice %121 {offsets = [2, 0], sizes = [2, 128], strides = [1, 1]} : vector<16x128xf32> to vector<2x128xf32>
    %156 = arith.truncf %153 : vector<2x32xf32> to vector<2x32xbf16>
    %cst_100 = arith.constant dense<0.000000e+00> : vector<2x128xf32>
    %157 = tpu.matmul %156, %122, %cst_100 {dimension_numbers = #tpu.dot_dimension_numbers<[1], [0], [0], [1], [0, 0, 1, 1], [], []>} : vector<2x32xbf16>, vector<32x128xbf16>, vector<2x128xf32> -> vector<2x128xf32>
    %158 = arith.addf %155, %157 : vector<2x128xf32>
    %159 = vector.extract_strided_slice %158 {offsets = [0, 0], sizes = [2, 32], strides = [1, 1]} : vector<2x128xf32> to vector<2x32xf32>
    %160 = arith.negf %159 : vector<2x32xf32>
    %161 = math.exp %160 : vector<2x32xf32>
    %cst_101 = arith.constant 1.000000e+00 : f32
    %162 = vector.broadcast %cst_101 : f32 to vector<2x32xf32>
    %163 = arith.addf %162, %161 : vector<2x32xf32>
    %164 = arith.divf %162, %163 : vector<2x32xf32>
    %165 = vector.extract_strided_slice %158 {offsets = [0, 32], sizes = [2, 32], strides = [1, 1]} : vector<2x128xf32> to vector<2x32xf32>
    %166 = arith.negf %165 : vector<2x32xf32>
    %167 = math.exp %166 : vector<2x32xf32>
    %cst_102 = arith.constant 1.000000e+00 : f32
    %168 = vector.broadcast %cst_102 : f32 to vector<2x32xf32>
    %169 = arith.addf %168, %167 : vector<2x32xf32>
    %170 = arith.divf %168, %169 : vector<2x32xf32>
    %171 = vector.extract_strided_slice %158 {offsets = [0, 64], sizes = [2, 32], strides = [1, 1]} : vector<2x128xf32> to vector<2x32xf32>
    %172 = math.tanh %171 : vector<2x32xf32>
    %173 = vector.extract_strided_slice %158 {offsets = [0, 96], sizes = [2, 32], strides = [1, 1]} : vector<2x128xf32> to vector<2x32xf32>
    %174 = arith.negf %173 : vector<2x32xf32>
    %175 = math.exp %174 : vector<2x32xf32>
    %cst_103 = arith.constant 1.000000e+00 : f32
    %176 = vector.broadcast %cst_103 : f32 to vector<2x32xf32>
    %177 = arith.addf %176, %175 : vector<2x32xf32>
    %178 = arith.divf %176, %177 : vector<2x32xf32>
    %179 = arith.mulf %170, %151 : vector<2x32xf32>
    %180 = arith.mulf %164, %172 : vector<2x32xf32>
    %181 = arith.addf %179, %180 : vector<2x32xf32>
    %182 = math.tanh %181 : vector<2x32xf32>
    %183 = arith.mulf %178, %182 : vector<2x32xf32>
    %c2_104 = arith.constant 2 : index
    %c0_105 = arith.constant 0 : index
    %184 = vector.load %arg15[%c2_104, %c0_105] : memref<16x32xf32, #tpu.memory_space<vmem>>, vector<2x32xf32>
    tpu.vector_store %arg15[%c2_104, %c0_105], %183 {strides = array<i32>} : memref<16x32xf32, #tpu.memory_space<vmem>>, vector<2x32xf32>,
    %185 = vector.extract_strided_slice %121 {offsets = [4, 0], sizes = [2, 128], strides = [1, 1]} : vector<16x128xf32> to vector<2x128xf32>
    %186 = arith.truncf %183 : vector<2x32xf32> to vector<2x32xbf16>
    %cst_106 = arith.constant dense<0.000000e+00> : vector<2x128xf32>
    %187 = tpu.matmul %186, %122, %cst_106 {dimension_numbers = #tpu.dot_dimension_numbers<[1], [0], [0], [1], [0, 0, 1, 1], [], []>} : vector<2x32xbf16>, vector<32x128xbf16>, vector<2x128xf32> -> vector<2x128xf32>
    %188 = arith.addf %185, %187 : vector<2x128xf32>
    %189 = vector.extract_strided_slice %188 {offsets = [0, 0], sizes = [2, 32], strides = [1, 1]} : vector<2x128xf32> to vector<2x32xf32>
    %190 = arith.negf %189 : vector<2x32xf32>
    %191 = math.exp %190 : vector<2x32xf32>
    %cst_107 = arith.constant 1.000000e+00 : f32
    %192 = vector.broadcast %cst_107 : f32 to vector<2x32xf32>
    %193 = arith.addf %192, %191 : vector<2x32xf32>
    %194 = arith.divf %192, %193 : vector<2x32xf32>
    %195 = vector.extract_strided_slice %188 {offsets = [0, 32], sizes = [2, 32], strides = [1, 1]} : vector<2x128xf32> to vector<2x32xf32>
    %196 = arith.negf %195 : vector<2x32xf32>
    %197 = math.exp %196 : vector<2x32xf32>
    %cst_108 = arith.constant 1.000000e+00 : f32
    %198 = vector.broadcast %cst_108 : f32 to vector<2x32xf32>
    %199 = arith.addf %198, %197 : vector<2x32xf32>
    %200 = arith.divf %198, %199 : vector<2x32xf32>
    %201 = vector.extract_strided_slice %188 {offsets = [0, 64], sizes = [2, 32], strides = [1, 1]} : vector<2x128xf32> to vector<2x32xf32>
    %202 = math.tanh %201 : vector<2x32xf32>
    %203 = vector.extract_strided_slice %188 {offsets = [0, 96], sizes = [2, 32], strides = [1, 1]} : vector<2x128xf32> to vector<2x32xf32>
    %204 = arith.negf %203 : vector<2x32xf32>
    %205 = math.exp %204 : vector<2x32xf32>
    %cst_109 = arith.constant 1.000000e+00 : f32
    %206 = vector.broadcast %cst_109 : f32 to vector<2x32xf32>
    %207 = arith.addf %206, %205 : vector<2x32xf32>
    %208 = arith.divf %206, %207 : vector<2x32xf32>
    %209 = arith.mulf %200, %181 : vector<2x32xf32>
    %210 = arith.mulf %194, %202 : vector<2x32xf32>
    %211 = arith.addf %209, %210 : vector<2x32xf32>
    %212 = math.tanh %211 : vector<2x32xf32>
    %213 = arith.mulf %208, %212 : vector<2x32xf32>
    %c4 = arith.constant 4 : index
    %c0_110 = arith.constant 0 : index
    %214 = vector.load %arg15[%c4, %c0_110] : memref<16x32xf32, #tpu.memory_space<vmem>>, vector<2x32xf32>
    tpu.vector_store %arg15[%c4, %c0_110], %213 {strides = array<i32>} : memref<16x32xf32, #tpu.memory_space<vmem>>, vector<2x32xf32>,
    %215 = vector.extract_strided_slice %121 {offsets = [6, 0], sizes = [2, 128], strides = [1, 1]} : vector<16x128xf32> to vector<2x128xf32>
    %216 = arith.truncf %213 : vector<2x32xf32> to vector<2x32xbf16>
    %cst_111 = arith.constant dense<0.000000e+00> : vector<2x128xf32>
    %217 = tpu.matmul %216, %122, %cst_111 {dimension_numbers = #tpu.dot_dimension_numbers<[1], [0], [0], [1], [0, 0, 1, 1], [], []>} : vector<2x32xbf16>, vector<32x128xbf16>, vector<2x128xf32> -> vector<2x128xf32>
    %218 = arith.addf %215, %217 : vector<2x128xf32>
    %219 = vector.extract_strided_slice %218 {offsets = [0, 0], sizes = [2, 32], strides = [1, 1]} : vector<2x128xf32> to vector<2x32xf32>
    %220 = arith.negf %219 : vector<2x32xf32>
    %221 = math.exp %220 : vector<2x32xf32>
    %cst_112 = arith.constant 1.000000e+00 : f32
    %222 = vector.broadcast %cst_112 : f32 to vector<2x32xf32>
    %223 = arith.addf %222, %221 : vector<2x32xf32>
    %224 = arith.divf %222, %223 : vector<2x32xf32>
    %225 = vector.extract_strided_slice %218 {offsets = [0, 32], sizes = [2, 32], strides = [1, 1]} : vector<2x128xf32> to vector<2x32xf32>
    %226 = arith.negf %225 : vector<2x32xf32>
    %227 = math.exp %226 : vector<2x32xf32>
    %cst_113 = arith.constant 1.000000e+00 : f32
    %228 = vector.broadcast %cst_113 : f32 to vector<2x32xf32>
    %229 = arith.addf %228, %227 : vector<2x32xf32>
    %230 = arith.divf %228, %229 : vector<2x32xf32>
    %231 = vector.extract_strided_slice %218 {offsets = [0, 64], sizes = [2, 32], strides = [1, 1]} : vector<2x128xf32> to vector<2x32xf32>
    %232 = math.tanh %231 : vector<2x32xf32>
    %233 = vector.extract_strided_slice %218 {offsets = [0, 96], sizes = [2, 32], strides = [1, 1]} : vector<2x128xf32> to vector<2x32xf32>
    %234 = arith.negf %233 : vector<2x32xf32>
    %235 = math.exp %234 : vector<2x32xf32>
    %cst_114 = arith.constant 1.000000e+00 : f32
    %236 = vector.broadcast %cst_114 : f32 to vector<2x32xf32>
    %237 = arith.addf %236, %235 : vector<2x32xf32>
    %238 = arith.divf %236, %237 : vector<2x32xf32>
    %239 = arith.mulf %230, %211 : vector<2x32xf32>
    %240 = arith.mulf %224, %232 : vector<2x32xf32>
    %241 = arith.addf %239, %240 : vector<2x32xf32>
    %242 = math.tanh %241 : vector<2x32xf32>
    %243 = arith.mulf %238, %242 : vector<2x32xf32>
    %c6 = arith.constant 6 : index
    %c0_115 = arith.constant 0 : index
    %244 = vector.load %arg15[%c6, %c0_115] : memref<16x32xf32, #tpu.memory_space<vmem>>, vector<2x32xf32>
    tpu.vector_store %arg15[%c6, %c0_115], %243 {strides = array<i32>} : memref<16x32xf32, #tpu.memory_space<vmem>>, vector<2x32xf32>,
    %245 = vector.extract_strided_slice %121 {offsets = [8, 0], sizes = [2, 128], strides = [1, 1]} : vector<16x128xf32> to vector<2x128xf32>
    %246 = arith.truncf %243 : vector<2x32xf32> to vector<2x32xbf16>
    %cst_116 = arith.constant dense<0.000000e+00> : vector<2x128xf32>
    %247 = tpu.matmul %246, %122, %cst_116 {dimension_numbers = #tpu.dot_dimension_numbers<[1], [0], [0], [1], [0, 0, 1, 1], [], []>} : vector<2x32xbf16>, vector<32x128xbf16>, vector<2x128xf32> -> vector<2x128xf32>
    %248 = arith.addf %245, %247 : vector<2x128xf32>
    %249 = vector.extract_strided_slice %248 {offsets = [0, 0], sizes = [2, 32], strides = [1, 1]} : vector<2x128xf32> to vector<2x32xf32>
    %250 = arith.negf %249 : vector<2x32xf32>
    %251 = math.exp %250 : vector<2x32xf32>
    %cst_117 = arith.constant 1.000000e+00 : f32
    %252 = vector.broadcast %cst_117 : f32 to vector<2x32xf32>
    %253 = arith.addf %252, %251 : vector<2x32xf32>
    %254 = arith.divf %252, %253 : vector<2x32xf32>
    %255 = vector.extract_strided_slice %248 {offsets = [0, 32], sizes = [2, 32], strides = [1, 1]} : vector<2x128xf32> to vector<2x32xf32>
    %256 = arith.negf %255 : vector<2x32xf32>
    %257 = math.exp %256 : vector<2x32xf32>
    %cst_118 = arith.constant 1.000000e+00 : f32
    %258 = vector.broadcast %cst_118 : f32 to vector<2x32xf32>
    %259 = arith.addf %258, %257 : vector<2x32xf32>
    %260 = arith.divf %258, %259 : vector<2x32xf32>
    %261 = vector.extract_strided_slice %248 {offsets = [0, 64], sizes = [2, 32], strides = [1, 1]} : vector<2x128xf32> to vector<2x32xf32>
    %262 = math.tanh %261 : vector<2x32xf32>
    %263 = vector.extract_strided_slice %248 {offsets = [0, 96], sizes = [2, 32], strides = [1, 1]} : vector<2x128xf32> to vector<2x32xf32>
    %264 = arith.negf %263 : vector<2x32xf32>
    %265 = math.exp %264 : vector<2x32xf32>
    %cst_119 = arith.constant 1.000000e+00 : f32
    %266 = vector.broadcast %cst_119 : f32 to vector<2x32xf32>
    %267 = arith.addf %266, %265 : vector<2x32xf32>
    %268 = arith.divf %266, %267 : vector<2x32xf32>
    %269 = arith.mulf %260, %241 : vector<2x32xf32>
    %270 = arith.mulf %254, %262 : vector<2x32xf32>
    %271 = arith.addf %269, %270 : vector<2x32xf32>
    %272 = math.tanh %271 : vector<2x32xf32>
    %273 = arith.mulf %268, %272 : vector<2x32xf32>
    %c8 = arith.constant 8 : index
    %c0_120 = arith.constant 0 : index
    %274 = vector.load %arg15[%c8, %c0_120] : memref<16x32xf32, #tpu.memory_space<vmem>>, vector<2x32xf32>
    tpu.vector_store %arg15[%c8, %c0_120], %273 {strides = array<i32>} : memref<16x32xf32, #tpu.memory_space<vmem>>, vector<2x32xf32>,
    %275 = vector.extract_strided_slice %121 {offsets = [10, 0], sizes = [2, 128], strides = [1, 1]} : vector<16x128xf32> to vector<2x128xf32>
    %276 = arith.truncf %273 : vector<2x32xf32> to vector<2x32xbf16>
    %cst_121 = arith.constant dense<0.000000e+00> : vector<2x128xf32>
    %277 = tpu.matmul %276, %122, %cst_121 {dimension_numbers = #tpu.dot_dimension_numbers<[1], [0], [0], [1], [0, 0, 1, 1], [], []>} : vector<2x32xbf16>, vector<32x128xbf16>, vector<2x128xf32> -> vector<2x128xf32>
    %278 = arith.addf %275, %277 : vector<2x128xf32>
    %279 = vector.extract_strided_slice %278 {offsets = [0, 0], sizes = [2, 32], strides = [1, 1]} : vector<2x128xf32> to vector<2x32xf32>
    %280 = arith.negf %279 : vector<2x32xf32>
    %281 = math.exp %280 : vector<2x32xf32>
    %cst_122 = arith.constant 1.000000e+00 : f32
    %282 = vector.broadcast %cst_122 : f32 to vector<2x32xf32>
    %283 = arith.addf %282, %281 : vector<2x32xf32>
    %284 = arith.divf %282, %283 : vector<2x32xf32>
    %285 = vector.extract_strided_slice %278 {offsets = [0, 32], sizes = [2, 32], strides = [1, 1]} : vector<2x128xf32> to vector<2x32xf32>
    %286 = arith.negf %285 : vector<2x32xf32>
    %287 = math.exp %286 : vector<2x32xf32>
    %cst_123 = arith.constant 1.000000e+00 : f32
    %288 = vector.broadcast %cst_123 : f32 to vector<2x32xf32>
    %289 = arith.addf %288, %287 : vector<2x32xf32>
    %290 = arith.divf %288, %289 : vector<2x32xf32>
    %291 = vector.extract_strided_slice %278 {offsets = [0, 64], sizes = [2, 32], strides = [1, 1]} : vector<2x128xf32> to vector<2x32xf32>
    %292 = math.tanh %291 : vector<2x32xf32>
    %293 = vector.extract_strided_slice %278 {offsets = [0, 96], sizes = [2, 32], strides = [1, 1]} : vector<2x128xf32> to vector<2x32xf32>
    %294 = arith.negf %293 : vector<2x32xf32>
    %295 = math.exp %294 : vector<2x32xf32>
    %cst_124 = arith.constant 1.000000e+00 : f32
    %296 = vector.broadcast %cst_124 : f32 to vector<2x32xf32>
    %297 = arith.addf %296, %295 : vector<2x32xf32>
    %298 = arith.divf %296, %297 : vector<2x32xf32>
    %299 = arith.mulf %290, %271 : vector<2x32xf32>
    %300 = arith.mulf %284, %292 : vector<2x32xf32>
    %301 = arith.addf %299, %300 : vector<2x32xf32>
    %302 = math.tanh %301 : vector<2x32xf32>
    %303 = arith.mulf %298, %302 : vector<2x32xf32>
    %c10 = arith.constant 10 : index
    %c0_125 = arith.constant 0 : index
    %304 = vector.load %arg15[%c10, %c0_125] : memref<16x32xf32, #tpu.memory_space<vmem>>, vector<2x32xf32>
    tpu.vector_store %arg15[%c10, %c0_125], %303 {strides = array<i32>} : memref<16x32xf32, #tpu.memory_space<vmem>>, vector<2x32xf32>,
    %305 = vector.extract_strided_slice %121 {offsets = [12, 0], sizes = [2, 128], strides = [1, 1]} : vector<16x128xf32> to vector<2x128xf32>
    %306 = arith.truncf %303 : vector<2x32xf32> to vector<2x32xbf16>
    %cst_126 = arith.constant dense<0.000000e+00> : vector<2x128xf32>
    %307 = tpu.matmul %306, %122, %cst_126 {dimension_numbers = #tpu.dot_dimension_numbers<[1], [0], [0], [1], [0, 0, 1, 1], [], []>} : vector<2x32xbf16>, vector<32x128xbf16>, vector<2x128xf32> -> vector<2x128xf32>
    %308 = arith.addf %305, %307 : vector<2x128xf32>
    %309 = vector.extract_strided_slice %308 {offsets = [0, 0], sizes = [2, 32], strides = [1, 1]} : vector<2x128xf32> to vector<2x32xf32>
    %310 = arith.negf %309 : vector<2x32xf32>
    %311 = math.exp %310 : vector<2x32xf32>
    %cst_127 = arith.constant 1.000000e+00 : f32
    %312 = vector.broadcast %cst_127 : f32 to vector<2x32xf32>
    %313 = arith.addf %312, %311 : vector<2x32xf32>
    %314 = arith.divf %312, %313 : vector<2x32xf32>
    %315 = vector.extract_strided_slice %308 {offsets = [0, 32], sizes = [2, 32], strides = [1, 1]} : vector<2x128xf32> to vector<2x32xf32>
    %316 = arith.negf %315 : vector<2x32xf32>
    %317 = math.exp %316 : vector<2x32xf32>
    %cst_128 = arith.constant 1.000000e+00 : f32
    %318 = vector.broadcast %cst_128 : f32 to vector<2x32xf32>
    %319 = arith.addf %318, %317 : vector<2x32xf32>
    %320 = arith.divf %318, %319 : vector<2x32xf32>
    %321 = vector.extract_strided_slice %308 {offsets = [0, 64], sizes = [2, 32], strides = [1, 1]} : vector<2x128xf32> to vector<2x32xf32>
    %322 = math.tanh %321 : vector<2x32xf32>
    %323 = vector.extract_strided_slice %308 {offsets = [0, 96], sizes = [2, 32], strides = [1, 1]} : vector<2x128xf32> to vector<2x32xf32>
    %324 = arith.negf %323 : vector<2x32xf32>
    %325 = math.exp %324 : vector<2x32xf32>
    %cst_129 = arith.constant 1.000000e+00 : f32
    %326 = vector.broadcast %cst_129 : f32 to vector<2x32xf32>
    %327 = arith.addf %326, %325 : vector<2x32xf32>
    %328 = arith.divf %326, %327 : vector<2x32xf32>
    %329 = arith.mulf %320, %301 : vector<2x32xf32>
    %330 = arith.mulf %314, %322 : vector<2x32xf32>
    %331 = arith.addf %329, %330 : vector<2x32xf32>
    %332 = math.tanh %331 : vector<2x32xf32>
    %333 = arith.mulf %328, %332 : vector<2x32xf32>
    %c12 = arith.constant 12 : index
    %c0_130 = arith.constant 0 : index
    %334 = vector.load %arg15[%c12, %c0_130] : memref<16x32xf32, #tpu.memory_space<vmem>>, vector<2x32xf32>
    tpu.vector_store %arg15[%c12, %c0_130], %333 {strides = array<i32>} : memref<16x32xf32, #tpu.memory_space<vmem>>, vector<2x32xf32>,
    %335 = vector.extract_strided_slice %121 {offsets = [14, 0], sizes = [2, 128], strides = [1, 1]} : vector<16x128xf32> to vector<2x128xf32>
    %336 = arith.truncf %333 : vector<2x32xf32> to vector<2x32xbf16>
    %cst_131 = arith.constant dense<0.000000e+00> : vector<2x128xf32>
    %337 = tpu.matmul %336, %122, %cst_131 {dimension_numbers = #tpu.dot_dimension_numbers<[1], [0], [0], [1], [0, 0, 1, 1], [], []>} : vector<2x32xbf16>, vector<32x128xbf16>, vector<2x128xf32> -> vector<2x128xf32>
    %338 = arith.addf %335, %337 : vector<2x128xf32>
    %339 = vector.extract_strided_slice %338 {offsets = [0, 0], sizes = [2, 32], strides = [1, 1]} : vector<2x128xf32> to vector<2x32xf32>
    %340 = arith.negf %339 : vector<2x32xf32>
    %341 = math.exp %340 : vector<2x32xf32>
    %cst_132 = arith.constant 1.000000e+00 : f32
    %342 = vector.broadcast %cst_132 : f32 to vector<2x32xf32>
    %343 = arith.addf %342, %341 : vector<2x32xf32>
    %344 = arith.divf %342, %343 : vector<2x32xf32>
    %345 = vector.extract_strided_slice %338 {offsets = [0, 32], sizes = [2, 32], strides = [1, 1]} : vector<2x128xf32> to vector<2x32xf32>
    %346 = arith.negf %345 : vector<2x32xf32>
    %347 = math.exp %346 : vector<2x32xf32>
    %cst_133 = arith.constant 1.000000e+00 : f32
    %348 = vector.broadcast %cst_133 : f32 to vector<2x32xf32>
    %349 = arith.addf %348, %347 : vector<2x32xf32>
    %350 = arith.divf %348, %349 : vector<2x32xf32>
    %351 = vector.extract_strided_slice %338 {offsets = [0, 64], sizes = [2, 32], strides = [1, 1]} : vector<2x128xf32> to vector<2x32xf32>
    %352 = math.tanh %351 : vector<2x32xf32>
    %353 = vector.extract_strided_slice %338 {offsets = [0, 96], sizes = [2, 32], strides = [1, 1]} : vector<2x128xf32> to vector<2x32xf32>
    %354 = arith.negf %353 : vector<2x32xf32>
    %355 = math.exp %354 : vector<2x32xf32>
    %cst_134 = arith.constant 1.000000e+00 : f32
    %356 = vector.broadcast %cst_134 : f32 to vector<2x32xf32>
    %357 = arith.addf %356, %355 : vector<2x32xf32>
    %358 = arith.divf %356, %357 : vector<2x32xf32>
    %359 = arith.mulf %350, %331 : vector<2x32xf32>
    %360 = arith.mulf %344, %352 : vector<2x32xf32>
    %361 = arith.addf %359, %360 : vector<2x32xf32>
    %362 = math.tanh %361 : vector<2x32xf32>
    %363 = arith.mulf %358, %362 : vector<2x32xf32>
    %c14 = arith.constant 14 : index
    %c0_135 = arith.constant 0 : index
    %364 = vector.load %arg15[%c14, %c0_135] : memref<16x32xf32, #tpu.memory_space<vmem>>, vector<2x32xf32>
    tpu.vector_store %arg15[%c14, %c0_135], %363 {strides = array<i32>} : memref<16x32xf32, #tpu.memory_space<vmem>>, vector<2x32xf32>,
    %c0_136 = arith.constant 0 : index
    %c0_137 = arith.constant 0 : index
    %365 = vector.load %arg15[%c0_136, %c0_137] : memref<16x32xf32, #tpu.memory_space<vmem>>, vector<16x32xf32>
    %cst_138 = arith.constant 0.000000e+00 : f32
    %366 = vector.broadcast %cst_138 : f32 to vector<16x32xf32>
    %367 = arith.maximumf %365, %366 : vector<16x32xf32>
    %c0_139 = arith.constant 0 : index
    %c0_140 = arith.constant 0 : index
    %368 = vector.load %arg12[%c0_139, %c0_140] : memref<32x6xf32, #tpu.memory_space<vmem>>, vector<32x6xf32>
    %cst_141 = arith.constant dense<0.000000e+00> : vector<16x6xf32>
    %369 = tpu.matmul %367, %368, %cst_141 {dimension_numbers = #tpu.dot_dimension_numbers<[1], [0], [0], [1], [0, 0, 1, 1], [], []>} : vector<16x32xf32>, vector<32x6xf32>, vector<16x6xf32> -> vector<16x6xf32>
    %c0_142 = arith.constant 0 : index
    %c0_143 = arith.constant 0 : index
    %370 = vector.load %arg13[%c0_142, %c0_143] : memref<1x6xf32, #tpu.memory_space<vmem>>, vector<1x6xf32>
    %371 = vector.broadcast %370 : vector<1x6xf32> to vector<16x6xf32>
    %372 = arith.addf %369, %371 : vector<16x6xf32>
    %c0_144 = arith.constant 0 : index
    %c0_145 = arith.constant 0 : index
    %373 = vector.load %arg14[%c0_144, %c0_145] : memref<16x6xf32, #tpu.memory_space<vmem>>, vector<16x6xf32>
    tpu.vector_store %arg14[%c0_144, %c0_145], %372 {strides = array<i32>} : memref<16x6xf32, #tpu.memory_space<vmem>>, vector<16x6xf32>,
    return
  }
}

</mosaic_0001>

<bundles_post_ra>
// kernel: drqn_forward_pallas.1
= control target key start
LH: loop header
LB: loop body
LE: loop exit
PB: predicated region body
PF: predicated region fallthrough
CT: control target
= control target key end

     0   :  { %vm428_vm0 = vcmask 261120   ;;  %vm2201_vm1 = vcmask 523264   ;;  %vm4543_vm2 = vmmov 0   ;;  %vm2774_vm3 = vcmask 254976   ;;  %s6349_s1 = inlined_call_operand.vmem [shape: bf16[288,256], index: 1, kind: input, shape index: {}]   ;;  %s6350_s0 = inlined_call_operand.vmem [shape: bf16[128,288], index: 0, kind: input, shape index: {}]   ;;  %s6351_s3 = inlined_call_operand.vmem [shape: bf16[4,256,192], index: 3, kind: input, shape index: {}]   ;;  %s6352_s2 = inlined_call_operand.vmem [shape: f32[1,256], index: 2, kind: input, shape index: {}]   ;;  %s6353_s5 = inlined_call_operand.vmem [shape: bf16[3,192,64], index: 5, kind: input, shape index: {}]   ;;  %s6354_s4 = inlined_call_operand.vmem [shape: f32[1,192], index: 4, kind: input, shape index: {}]   ;;  %s6355_s7 = inlined_call_operand.vmem [shape: bf16[64,64], index: 7, kind: input, shape index: {}]   ;;  %s6356_s9 = inlined_call_operand.vmem [shape: bf16[64,128], index: 9, kind: input, shape index: {}]   ;;  %s6357_s6 = inlined_call_operand.vmem [shape: f32[1,64], index: 6, kind: input, shape index: {}]   ;;  %s6358_s11 = inlined_call_operand.vmem [shape: bf16[32,128], index: 11, kind: input, shape index: {}]   ;;  %s6359_s8 = inlined_call_operand.vmem [shape: f32[1,64], index: 8, kind: input, shape index: {}]   ;;  %s6360_s10 = inlined_call_operand.vmem [shape: f32[1,128], index: 10, kind: input, shape index: {}]   ;;  %s6361_s12 = inlined_call_operand.vmem [shape: f32[32,6], index: 12, kind: input, shape index: {}]   ;;  %s6362_s13 = inlined_call_operand.vmem [shape: f32[1,6], index: 13, kind: input, shape index: {}]   ;;  %s6363_s14 = inlined_call_operand.vmem [shape: f32[16,6], index: 14, kind: output, shape index: {}]  }
   0x1   :  { %v4129_v0 = vld [vmem:[%s6349_s1 + $0x4] ss:$8 sps:$4 sm:$0xff]   ;;  %v4131_v1 = vld [vmem:[%s6349_s1] ss:$8 sps:$4 sm:$0xff]   ;;  %v4132_v2 = vld [vmem:[%s6349_s1 + $0x14] ss:$8 sps:$4 sm:$0xff]  }
   0x2   :  { %453 = vmatprep.subr.bf16.mxu0 %v4129_v0  ;;  %v4134_v3 = vld [vmem:[%s6349_s1 + $0x10] ss:$8 sps:$4 sm:$0xff]   ;;  %v4135_v4 = vld [vmem:[%s6349_s1 + $0x24] ss:$8 sps:$4 sm:$0xff]   ;;  %v4137_v5 = vld [vmem:[%s6349_s1 + $0x20] ss:$8 sps:$4 sm:$0xff]  }
   0x3   :  { %454 = vmatpush1.bf16.msra.mxu0 %v4131_v1  ;;  %v4138_v6 = vld [vmem:[%s6349_s1 + $0x34] ss:$8 sps:$4 sm:$0xff]   ;;  %v4140_v7 = vld [vmem:[%s6349_s1 + $0x30] ss:$8 sps:$4 sm:$0xff]   ;;  %v4141_v8 = vld [vmem:[%s6349_s1 + $0x44] ss:$8 sps:$4 sm:$0xff]  }
   0x4   :  { %455 = vmatprep.subr.bf16.mxu0 %v4132_v2  ;;  %v4143_v9 = vld [vmem:[%s6349_s1 + $0x40] ss:$8 sps:$4 sm:$0xff]   ;;  %v4144_v10 = vld [vmem:[%s6349_s1 + $0x54] ss:$8 sps:$4 sm:$0xff]   ;;  %v4146_v11 = vld [vmem:[%s6349_s1 + $0x50] ss:$8 sps:$4 sm:$0xff]  }
   0x5   :  { %v4147_v12 = vld [vmem:[%s6349_s1 + $0x64] ss:$8 sps:$4 sm:$0xff]   ;;  %v4149_v14 = vld [vmem:[%s6349_s1 + $0x60] ss:$8 sps:$4 sm:$0xff]   ;;  %v4150_v15 = vld [vmem:[%s6349_s1 + $0x74] ss:$8 sps:$4 sm:$0xff]  }
   0x6   :  { %v4179_v13 = vld [vmem:[%s6350_s0 + $0x4] ss:$12 sps:$4 sm:$0xff]   ;;  %v4155_v18 = vld [vmem:[%s6349_s1 + $0x80] ss:$8 sps:$4 sm:$0xff]   ;;  %v4156_v19 = vld [vmem:[%s6349_s1 + $0x94] ss:$8 sps:$4 sm:$0xff]  }
   0x7   :  { %456 = vmatpush1.bf16.msra.mxu0 %v4134_v3  ;;  %485 = vmatprep.mubr.bf16.mxu0 %v4179_v13  ;;  %v4152_v16 = vld [vmem:[%s6349_s1 + $0x70] ss:$8 sps:$4 sm:$0xff]   ;;  %v4153_v17 = vld [vmem:[%s6349_s1 + $0x84] ss:$8 sps:$4 sm:$0xff]   ;;  %v4161_v22 = vld [vmem:[%s6349_s1 + $0xa0] ss:$8 sps:$4 sm:$0xff]  }
   0x8   :  { %457 = vmatprep.subr.bf16.mxu0 %v4135_v4  ;;  %v4158_v20 = vld [vmem:[%s6349_s1 + $0x90] ss:$8 sps:$4 sm:$0xff]   ;;  %v4159_v21 = vld [vmem:[%s6349_s1 + $0xa4] ss:$8 sps:$4 sm:$0xff]   ;;  %v4162_v23 = vld [vmem:[%s6349_s1 + $0xb4] ss:$8 sps:$4 sm:$0xff]  }
   0x9   :  { %v4164_v24 = vld [vmem:[%s6349_s1 + $0xb0] ss:$8 sps:$4 sm:$0xff]   ;;  %v4165_v25 = vld [vmem:[%s6349_s1 + $0xc4] ss:$8 sps:$4 sm:$0xff]   ;;  %v4167_v26 = vld [vmem:[%s6349_s1 + $0xc0] ss:$8 sps:$4 sm:$0xff]  }
   0xa   :  { %v4168_v27 = vld [vmem:[%s6349_s1 + $0xd4] ss:$8 sps:$4 sm:$0xff]   ;;  %v4170_v28 = vld [vmem:[%s6349_s1 + $0xd0] ss:$8 sps:$4 sm:$0xff]   ;;  %v4171_v29 = vld [vmem:[%s6349_s1 + $0xe4] ss:$8 sps:$4 sm:$0xff]  }
   0xb   :  { %458 = vmatpush1.bf16.msra.mxu0 %v4137_v5  ;;  %v4173_v30 = vld [vmem:[%s6349_s1 + $0xe0] ss:$8 sps:$4 sm:$0xff]   ;;  %v4174_v31 = vld [vmem:[%s6349_s1 + $0xf4] ss:$8 sps:$4 sm:$0xff]   ;;  %v4176_v32 = vld [vmem:[%s6349_s1 + $0xf0] ss:$8 sps:$4 sm:$0xff]  }
   0xc   :  { %459 = vmatprep.subr.bf16.mxu0 %v4138_v6  ;;  %v4182_v33 = vld [vmem:[%s6349_s1 + $0x104] ss:$8 sps:$4 sm:$0xff]   ;;  %v4732_v36 = vld [vmem:[%s6351_s3 + $0x100] ss:$8 sps:$4 sm:$0xff]   ;;  %v4740_v38 = vld [vmem:[%s6351_s3 + $0x114] ss:$8 sps:$4 sm:$0xff]  }
   0xd   :  { %v4215_v34 = vld [vmem:[%s6351_s3 + $0x104] ss:$8 sps:$4 sm:$0xff]   ;;  %v4180_v37 = vld [vmem:[%s6349_s1 + $0x100] ss:$8 sps:$4 sm:$0xff]   ;;  %v4749_v40 = vld [vmem:[%s6351_s3 + $0x110] ss:$8 sps:$4 sm:$0xff]  }
   0xe   :  { %v4177_v35 = vld [vmem:[%s6350_s0] ss:$12 sps:$4 sm:$0xff]   ;;  %952 = vmatprep.subr.bf16.mxu1 %v4215_v34  ;;  %v4183_v39 = vld [vmem:[%s6350_s0 + $0x1c] ss:$12 sps:$4 sm:$0xff]   ;;  %v4195_v43 = vld [vmem:[%s6349_s1 + $0x110] ss:$8 sps:$4 sm:$0xff]  }
   0xf   :  { %460 = vmatpush1.bf16.msra.mxu0 %v4140_v7  ;;  %953 = vmatpush1.bf16.msra.mxu1 %v4732_v36  ;;  %v4197_v41 = vld [vmem:[%s6349_s1 + $0x114] ss:$8 sps:$4 sm:$0xff]   ;;  %v4758_v42 = vld [vmem:[%s6351_s3 + $0x124] ss:$8 sps:$4 sm:$0xff]   ;;  %v4767_v44 = vld [vmem:[%s6351_s3 + $0x120] ss:$8 sps:$4 sm:$0xff]  }
  0x10   :  { %461 = vmatprep.subr.bf16.mxu0 %v4141_v8  ;;  %954 = vmatprep.subr.bf16.mxu1 %v4740_v38  ;;  %v4772_v45 = vld [vmem:[%s6351_s3 + $0x134] ss:$8 sps:$4 sm:$0xff]   ;;  %v4185_v46 = vld [vmem:[%s6350_s0 + $0x18] ss:$12 sps:$4 sm:$0xff]   ;;  %v4797_v50 = vld [vmem:[%s6351_s3 + $0x140] ss:$8 sps:$4 sm:$0xff]  }
  0x11   :  { %v4186_v47 = vld [vmem:[%s6350_s0 + $0x34] ss:$12 sps:$4 sm:$0xff]   ;;  %v4785_v48 = vld [vmem:[%s6351_s3 + $0x130] ss:$8 sps:$4 sm:$0xff]   ;;  %v4791_v49 = vld [vmem:[%s6351_s3 + $0x144] ss:$8 sps:$4 sm:$0xff]  }
  0x12   :  { %v4803_v51 = vld [vmem:[%s6351_s3 + $0x154] ss:$8 sps:$4 sm:$0xff]   ;;  %v4811_v53 = vld [vmem:[%s6351_s3 + $0x150] ss:$8 sps:$4 sm:$0xff]   ;;  %v4819_v55 = vld [vmem:[%s6351_s3 + $0x164] ss:$8 sps:$4 sm:$0xff]  }
  0x13   :  { %462 = vmatpush1.bf16.msra.mxu0 %v4143_v9  ;;  %955 = vmatpush1.bf16.msra.mxu1 %v4749_v40  ;;  %v4188_v52 = vld [vmem:[%s6350_s0 + $0x30] ss:$12 sps:$4 sm:$0xff]   ;;  %v4189_v54 = vld [vmem:[%s6350_s0 + $0x4c] ss:$12 sps:$4 sm:$0xff]   ;;  %v4826_v56 = vld [vmem:[%s6351_s3 + $0x160] ss:$8 sps:$4 sm:$0xff]  }
  0x14   :  { %463 = vmatprep.subr.bf16.mxu0 %v4144_v10  ;;  %956 = vmatprep.subr.bf16.mxu1 %v4758_v42  ;;  %v4831_v57 = vld [vmem:[%s6351_s3 + $0x174] ss:$8 sps:$4 sm:$0xff]   ;;  %v4841_v59 = vld [vmem:[%s6351_s3 + $0x170] ss:$8 sps:$4 sm:$0xff]   ;;  %v4849_v61 = vld [vmem:[%s6351_s3 + $0x184] ss:$8 sps:$4 sm:$0xff]  }
  0x15   :  { %v4191_v58 = vld [vmem:[%s6350_s0 + $0x48] ss:$12 sps:$4 sm:$0xff]   ;;  %v4192_v60 = vld [vmem:[%s6350_s0 + $0x64] ss:$12 sps:$4 sm:$0xff]   ;;  %v4194_v0 = vld [vmem:[%s6350_s0 + $0x60] ss:$12 sps:$4 sm:$0xff]  }
  0x16   :  { %v4856_v62 = vld [vmem:[%s6351_s3 + $0x180] ss:$8 sps:$4 sm:$0xff]   ;;  %v4861_v63 = vld [vmem:[%s6351_s3 + $0x194] ss:$8 sps:$4 sm:$0xff]   ;;  %v4244_v1 = vld [vmem:[%s6351_s3 + $0x190] ss:$8 sps:$4 sm:$0xff]  }
  0x17   :  { %464 = vmatpush1.bf16.msra.mxu0 %v4146_v11  ;;  %957 = vmatpush1.bf16.msra.mxu1 %v4767_v44  ;;  %v4198_v2 = vld [vmem:[%s6350_s0 + $0x7c] ss:$12 sps:$4 sm:$0xff]   ;;  %v4245_v3 = vld [vmem:[%s6351_s3 + $0x1a4] ss:$8 sps:$4 sm:$0xff]   ;;  %v4250_v7 = vld [vmem:[%s6351_s3 + $0x1b0] ss:$8 sps:$4 sm:$0xff]  }
  0x18   :  { %465 = vmatprep.subr.bf16.mxu0 %v4147_v12  ;;  %958 = vmatprep.subr.bf16.mxu1 %v4772_v45  ;;  %v4247_v4 = vld [vmem:[%s6351_s3 + $0x1a0] ss:$8 sps:$4 sm:$0xff]   ;;  %v4248_v5 = vld [vmem:[%s6351_s3 + $0x1b4] ss:$8 sps:$4 sm:$0xff]   ;;  %v4200_v6 = vld [vmem:[%s6350_s0 + $0x78] ss:$12 sps:$4 sm:$0xff]  }
  0x19   :  { %v4201_v8 = vld [vmem:[%s6350_s0 + $0x94] ss:$12 sps:$4 sm:$0xff]   ;;  %v4203_v9 = vld [vmem:[%s6350_s0 + $0x90] ss:$12 sps:$4 sm:$0xff]   ;;  %v4204_v10 = vld [vmem:[%s6350_s0 + $0xac] ss:$12 sps:$4 sm:$0xff]  }
  0x1a   :  { %v4206_v11 = vld [vmem:[%s6350_s0 + $0xa8] ss:$12 sps:$4 sm:$0xff]   ;;  %v6366_v12 = vmov 0   ;;  %vm2943_vm4 = vcmask 259076   ;;  %vm2858_vm5 = vcmask 257026   ;;  %vm3028_vm6 = vcmask 261126  }
  0x1b   :  { %466 = vmatpush1.bf16.msra.mxu0 %v4149_v14  ;;  %959 = vmatpush1.bf16.msra.mxu1 %v4785_v48  ;;  %v4207_v13 = vld [vmem:[%s6350_s0 + $0x8] ss:$12 sps:$4 sm:$0xff]   ;;  %v4208_v14 = vld [vmem:[%s6350_s0 + $0x20] ss:$12 sps:$4 sm:$0xff]   ;;  %vm3458_vm7 = vcmask 48128  }
  0x1c   :  { %467 = vmatprep.subr.bf16.mxu0 %v4150_v15  ;;  %960 = vmatprep.subr.bf16.mxu1 %v4791_v49  ;;  %v4209_v15 = vld [vmem:[%s6350_s0 + $0x38] ss:$12 sps:$4 sm:$0xff]  }
  0x1f   :  { %468 = vmatpush1.bf16.msra.mxu0 %v4152_v16  ;;  %961 = vmatpush1.bf16.msra.mxu1 %v4797_v50  ;;  %v4210_v16 = vld [vmem:[%s6350_s0 + $0x50] ss:$12 sps:$4 sm:$0xff]  }
  0x20   :  { %469 = vmatprep.subr.bf16.mxu0 %v4153_v17  ;;  %962 = vmatprep.subr.bf16.mxu1 %v4803_v51  ;;  %v4211_v17 = vld [vmem:[%s6350_s0 + $0x68] ss:$12 sps:$4 sm:$0xff]  }
  0x23   :  { %470 = vmatpush1.bf16.msra.mxu0 %v4155_v18  ;;  %963 = vmatpush1.bf16.msra.mxu1 %v4811_v53  ;;  %v4212_v18 = vld [vmem:[%s6350_s0 + $0x80] ss:$12 sps:$4 sm:$0xff]  }
  0x24   :  { %471 = vmatprep.subr.bf16.mxu0 %v4156_v19  ;;  %964 = vmatprep.subr.bf16.mxu1 %v4819_v55  ;;  %v4213_v19 = vld [vmem:[%s6350_s0 + $0x98] ss:$12 sps:$4 sm:$0xff]  }
  0x27   :  { %472 = vmatpush1.bf16.msra.mxu0 %v4158_v20  ;;  %965 = vmatpush1.bf16.msra.mxu1 %v4826_v56  ;;  %v4214_v20 = vld [vmem:[%s6350_s0 + $0xb0] ss:$12 sps:$4 sm:$0xff]  }
  0x28   :  { %473 = vmatprep.subr.bf16.mxu0 %v4159_v21  ;;  %966 = vmatprep.subr.bf16.mxu1 %v4831_v57  ;;  %v4964_v21 = vld [vmem:[%s6351_s3 + $0x1c4] ss:$8 sps:$4 sm:$0xff]  }
  0x2b   :  { %474 = vmatpush1.bf16.msra.mxu0 %v4161_v22  ;;  %967 = vmatpush1.bf16.msra.mxu1 %v4841_v59  ;;  %v4969_v22 = vld [vmem:[%s6351_s3 + $0x1c0] ss:$8 sps:$4 sm:$0xff]  }
  0x2c   :  { %475 = vmatprep.subr.bf16.mxu0 %v4162_v23  ;;  %968 = vmatprep.subr.bf16.mxu1 %v4849_v61  ;;  %v4978_v23 = vld [vmem:[%s6351_s3 + $0x1d4] ss:$8 sps:$4 sm:$0xff]  }
  0x2f   :  { %476 = vmatpush1.bf16.msra.mxu0 %v4164_v24  ;;  %969 = vmatpush1.bf16.msra.mxu1 %v4856_v62  ;;  %v4983_v24 = vld [vmem:[%s6351_s3 + $0x1d0] ss:$8 sps:$4 sm:$0xff]  }
  0x30   :  { %477 = vmatprep.subr.bf16.mxu0 %v4165_v25  ;;  %970 = vmatprep.subr.bf16.mxu1 %v4861_v63  ;;  %v4992_v25 = vld [vmem:[%s6351_s3 + $0x1e4] ss:$8 sps:$4 sm:$0xff]  }
  0x33   :  { %478 = vmatpush1.bf16.msra.mxu0 %v4167_v26  ;;  %971 = vmatpush1.bf16.msra.mxu1 %v4244_v1  ;;  %v4997_v26 = vld [vmem:[%s6351_s3 + $0x1e0] ss:$8 sps:$4 sm:$0xff]  }
  0x34   :  { %479 = vmatprep.subr.bf16.mxu0 %v4168_v27  ;;  %972 = vmatprep.subr.bf16.mxu1 %v4245_v3  ;;  %v5006_v27 = vld [vmem:[%s6351_s3 + $0x1f4] ss:$8 sps:$4 sm:$0xff]  }
  0x37   :  { %480 = vmatpush1.bf16.msra.mxu0 %v4170_v28  ;;  %973 = vmatpush1.bf16.msra.mxu1 %v4247_v4  ;;  %v5011_v28 = vld [vmem:[%s6351_s3 + $0x1f0] ss:$8 sps:$4 sm:$0xff]  }
  0x38   :  { %481 = vmatprep.subr.bf16.mxu0 %v4171_v29  ;;  %974 = vmatprep.subr.bf16.mxu1 %v4248_v5  ;;  %v5020_v29 = vld [vmem:[%s6351_s3 + $0x4] ss:$8 sps:$4 sm:$0xff]  }
  0x3b   :  { %482 = vmatpush1.bf16.msra.mxu0 %v4173_v30  ;;  %975 = vmatpush1.bf16.msra.mxu1 %v4250_v7  ;;  %v118_v30 = vlaneseq }
  0x3c   :  { %483 = vmatprep.subr.bf16.mxu0 %v4174_v31  ;;  %976 = vmatprep.subr.bf16.mxu1 %v4964_v21 }
  0x3d   :  { %v5024_v31 = vshrl.u32 %v118_v30, 7  ;;  %v5083_v30 = vld [vmem:[%s6351_s3 + $0x20] ss:$8 sps:$4 sm:$0xff]  }
  0x3f   :  { %484 = vmatpush1.bf16.msra.mxu0 %v4176_v32  ;;  %977 = vmatpush1.bf16.msra.mxu1 %v4969_v22  ;;  %6420 = vst [vmem:[#allocation3_spill] sm:$0xff] %v5024_v31  ;;  %v6365_v32 = vsub.s32 0, %v5024_v31 }
  0x40   :  { %566 = vmatprep.subr.bf16.mxu0 %v4182_v33  ;;  %978 = vmatprep.subr.bf16.mxu1 %v4978_v23  ;;  %v116_v33 = vld [vmem:[%s6352_s2] sm:$0x3]  ;;  %s4544_s2 = smov 64  }
  0x42   :  { %486 = vmatmul.mubr.bf16.vlgmr.msra.gmra.mrb[0].mxu0 %v4177_v35  ;;  %v5033_v35 = vrot.slane %v116_v33, %v6365_v32  ;;  %v5382_v32 = vld [vmem:[%s6351_s3 + $0x254] ss:$8 sps:$4 sm:$0xff]  }
  0x43   :  { %567 = vmatpush1.bf16.msra.mxu0 %v4180_v37  ;;  %495 = vmatprep.mubr.bf16.mxu0 %v4183_v39  ;;  %6431 = vst [vmem:[#allocation14_spill] sm:$0xff] %v5382_v32 }
  0x44   :  { %568 = vmatprep.subr.bf16.mxu0 %v4197_v41  ;;  %979 = vmatpush1.bf16.msra.mxu1 %v4983_v24 }
  0x45   :  { %980 = vmatprep.subr.bf16.mxu1 %v4992_v25 }
  0x47   :  { %569 = vmatpush1.bf16.msra.mxu0 %v4195_v43 }
  0x48   :  { %1700 = vmatprep.subr.bf16.mxu0 %v4215_v34  ;;  %981 = vmatpush1.bf16.msra.mxu1 %v4997_v26  ;;  %v6364_v34 = vsub.s32 1, %v5024_v31  ;;  %v5404_v31 = vld [vmem:[%s6351_s3 + $0x260] ss:$8 sps:$4 sm:$0xff]  }
  0x49   :  { %982 = vmatprep.subr.bf16.mxu1 %v5006_v27  ;;  %6434 = vst [vmem:[#allocation17_spill] sm:$0xff] %v5404_v31 }
  0x4a   :  { %496 = vmatmul.mubr.bf16.gmra.mrb[4].mxu0 %v4185_v46 }
  0x4b   :  { %505 = vmatprep.mubr.bf16.mxu0 %v4186_v47 }
  0x4c   :  { %983 = vmatpush1.bf16.msra.mxu1 %v5011_v28 }
  0x4d   :  { %1155 = vmatprep.subr.bf16.mxu1 %v5020_v29 }
  0x52   :  { %506 = vmatmul.mubr.bf16.gmra.mrb[8].mxu0 %v4188_v52 }
  0x53   :  { %515 = vmatprep.mubr.bf16.mxu0 %v4189_v54 }
  0x5a   :  { %516 = vmatmul.mubr.bf16.gmra.mrb[12].mxu0 %v4191_v58 }
  0x5b   :  { %525 = vmatprep.mubr.bf16.mxu0 %v4192_v60 }
  0x62   :  { %526 = vmatmul.mubr.bf16.gmra.mrb[16].mxu0 %v4194_v0 }
  0x63   :  { %535 = vmatprep.mubr.bf16.mxu0 %v4198_v2  ;;  %v5052_v2 = vld [vmem:[%s6351_s3] ss:$8 sps:$4 sm:$0xff]  }
  0x6a   :  { %536 = vmatmul.mubr.bf16.gmra.mrb[20].mxu0 %v4200_v6 }
  0x6b   :  { %545 = vmatprep.mubr.bf16.mxu0 %v4201_v8 }
  0x72   :  { %546 = vmatmul.mubr.bf16.gmra.mrb[24].mxu0 %v4203_v9 }
  0x73   :  { %555 = vmatprep.mubr.bf16.mxu0 %v4204_v10 }
  0x7a   :  { %556 = vmatmul.mubr.bf16.gmra.mrb[28].mxu0 %v4206_v11  ;;  %v5067_v11 = vld [vmem:[%s6351_s3 + $0x10] ss:$8 sps:$4 sm:$0xff]  }
  0x7b   :  { %598 = vmatprep.mubr.bf16.mxu0 %v6366_v12 }
  0x82   :  { %3525 = vmatmul.mubr.msk.bf16.vlgmr.msra.gmra.mrb[0].mxu0 %vm428_vm0, %v4207_v13 }
  0x83   :  { %608 = vmatprep.mubr.bf16.mxu0 %v6366_v12  ;;  %1701 = vmatpush1.bf16.msra.mxu0 %v4732_v36  ;;  %v5037_v36 = vrot.slane %v116_v33, %v6364_v34  ;;  %v5374_v34 = vld [vmem:[%s6351_s3 + $0x240] ss:$8 sps:$4 sm:$0xff]  }
  0x84   :  { %1702 = vmatprep.subr.bf16.mxu0 %v4740_v38  ;;  %6430 = vst [vmem:[#allocation13_spill] sm:$0xff] %v5374_v34 }
  0x87   :  { %1703 = vmatpush1.bf16.msra.mxu0 %v4749_v40 }
  0x88   :  { %1704 = vmatprep.subr.bf16.mxu0 %v4758_v42 }
  0x8a   :  { %3526 = vmatmul.mubr.msk.bf16.gmra.mrb[4].mxu0 %vm428_vm0, %v4208_v14 }
  0x8b   :  { %618 = vmatprep.mubr.bf16.mxu0 %v6366_v12  ;;  %1705 = vmatpush1.bf16.msra.mxu0 %v4767_v44 }
  0x8c   :  { %1706 = vmatprep.subr.bf16.mxu0 %v4772_v45 }
  0x8f   :  { %1707 = vmatpush1.bf16.msra.mxu0 %v4785_v48 }
  0x90   :  { %1708 = vmatprep.subr.bf16.mxu0 %v4791_v49 }
  0x92   :  { %3527 = vmatmul.mubr.msk.bf16.gmra.mrb[8].mxu0 %vm428_vm0, %v4209_v15  ;;  %v5073_v15 = vld [vmem:[%s6351_s3 + $0x24] ss:$8 sps:$4 sm:$0xff]  }
  0x93   :  { %628 = vmatprep.mubr.bf16.mxu0 %v6366_v12  ;;  %1709 = vmatpush1.bf16.msra.mxu0 %v4797_v50 }
  0x94   :  { %1710 = vmatprep.subr.bf16.mxu0 %v4803_v51 }
  0x97   :  { %1711 = vmatpush1.bf16.msra.mxu0 %v4811_v53 }
  0x98   :  { %1712 = vmatprep.subr.bf16.mxu0 %v4819_v55 }
  0x9a   :  { %3528 = vmatmul.mubr.msk.bf16.gmra.mrb[12].mxu0 %vm428_vm0, %v4210_v16 }
  0x9b   :  { %638 = vmatprep.mubr.bf16.mxu0 %v6366_v12  ;;  %1713 = vmatpush1.bf16.msra.mxu0 %v4826_v56 }
  0x9c   :  { %1714 = vmatprep.subr.bf16.mxu0 %v4831_v57 }
  0x9f   :  { %1715 = vmatpush1.bf16.msra.mxu0 %v4841_v59 }
  0xa0   :  { %1716 = vmatprep.subr.bf16.mxu0 %v4849_v61 }
  0xa2   :  { %3529 = vmatmul.mubr.msk.bf16.gmra.mrb[16].mxu0 %vm428_vm0, %v4211_v17 }
  0xa3   :  { %648 = vmatprep.mubr.bf16.mxu0 %v6366_v12  ;;  %1717 = vmatpush1.bf16.msra.mxu0 %v4856_v62 }
  0xa4   :  { %1718 = vmatprep.subr.bf16.mxu0 %v4861_v63 }
  0xa7   :  { %1719 = vmatpush1.bf16.msra.mxu0 %v4244_v1 }
  0xa8   :  { %1720 = vmatprep.subr.bf16.mxu0 %v4245_v3 }
  0xaa   :  { %3530 = vmatmul.mubr.msk.bf16.gmra.mrb[20].mxu0 %vm428_vm0, %v4212_v18 }
  0xab   :  { %658 = vmatprep.mubr.bf16.mxu0 %v6366_v12  ;;  %1721 = vmatpush1.bf16.msra.mxu0 %v4247_v4 }
  0xac   :  { %1722 = vmatprep.subr.bf16.mxu0 %v4248_v5  ;;  %v5058_v5 = vld [vmem:[%s6351_s3 + $0x14] ss:$8 sps:$4 sm:$0xff]  }
  0xaf   :  { %1723 = vmatpush1.bf16.msra.mxu0 %v4250_v7 }
  0xb0   :  { %1724 = vmatprep.subr.bf16.mxu0 %v4964_v21 }
  0xb2   :  { %3531 = vmatmul.mubr.msk.bf16.gmra.mrb[24].mxu0 %vm428_vm0, %v4213_v19 }
  0xb3   :  { %668 = vmatprep.mubr.bf16.mxu0 %v6366_v12  ;;  %1725 = vmatpush1.bf16.msra.mxu0 %v4969_v22  ;;  %v5389_v12 = vld [vmem:[%s6351_s3 + $0x250] ss:$8 sps:$4 sm:$0xff]  }
  0xb4   :  { %1726 = vmatprep.subr.bf16.mxu0 %v4978_v23  ;;  %6432 = vst [vmem:[#allocation15_spill] sm:$0xff] %v5389_v12 }
  0xb7   :  { %1727 = vmatpush1.bf16.msra.mxu0 %v4983_v24 }
  0xb8   :  { %1728 = vmatprep.subr.bf16.mxu0 %v4992_v25 }
  0xba   :  { %3532 = vmatmul.mubr.msk.bf16.gmra.mrb[28].mxu0 %vm428_vm0, %v4214_v20 }
  0xbb   :  { %1729 = vmatpush1.bf16.msra.mxu0 %v4997_v26 }
  0xbc   :  { %1730 = vmatprep.subr.bf16.mxu0 %v5006_v27 }
  0xbf   :  { %1731 = vmatpush1.bf16.msra.mxu0 %v5011_v28 }
  0xc0   :  { %1743 = vmatprep.subr.bf16.mxu0 %v5020_v29 }
 0x155   :  { %v600_v37 = vpop.f32.mrb[0].mxu0 }
 0x156   :  { %v4024_v38 = vadd.f32 %v600_v37, %v5033_v35  ;;  %v602_v39 = vpop.f32.mrb[1].mxu0 }
 0x157   :  { %v4025_v40 = vadd.f32 %v602_v39, %v5037_v36  ;;  %v604_v41 = vpop.f32.mrb[2].mxu0 }
 0x158   :  { %v4026_v42 = vadd.f32 %v604_v41, %v5033_v35  ;;  %v606_v43 = vpop.f32.mrb[3].mxu0  ;;  %v679_v45 = vmax.f32 %v4024_v38, 0.0  ;;  %v5090_v38 = vld [vmem:[%s6351_s3 + $0x34] ss:$8 sps:$4 sm:$0xff]  }
 0x159   :  { %v4027_v44 = vadd.f32 %v606_v43, %v5037_v36  ;;  %v680_v47 = vmax.f32 %v4025_v40, 0.0 }
 0x15a   :  { %v681_v46 = vmax.f32 %v4026_v42, 0.0 }
 0x15b   :  { %v682_v48 = vmax.f32 %v4027_v44, 0.0  ;;  %v5099_v44 = vld [vmem:[%s6351_s3 + $0x30] ss:$8 sps:$4 sm:$0xff]  }
 0x15c   :  { %v5043_v49 = vpack.c.bf16 %v681_v46, %v679_v45 }
 0x15d   :  { %v712_v50 = vpack.c.bf16 %v682_v48, %v680_v47  ;;  %v610_v51 = vpop.f32.mrb[4].mxu0  ;;  %v5105_v47 = vld [vmem:[%s6351_s3 + $0x44] ss:$8 sps:$4 sm:$0xff]  }
 0x15e   :  { %v4028_v52 = vadd.f32 %v610_v51, %v5033_v35  ;;  %v612_v53 = vpop.f32.mrb[5].mxu0 }
 0x15f   :  { %v4029_v54 = vadd.f32 %v612_v53, %v5037_v36  ;;  %v614_v55 = vpop.f32.mrb[6].mxu0 }
 0x160   :  { %v4030_v56 = vadd.f32 %v614_v55, %v5033_v35  ;;  %v616_v57 = vpop.f32.mrb[7].mxu0  ;;  %v683_v59 = vmax.f32 %v4028_v52, 0.0 }
 0x161   :  { %v4031_v58 = vadd.f32 %v616_v57, %v5037_v36  ;;  %v684_v61 = vmax.f32 %v4029_v54, 0.0  ;;  %v5115_v54 = vld [vmem:[%s6351_s3 + $0x40] ss:$8 sps:$4 sm:$0xff]   ;;  %v5122_v57 = vld [vmem:[%s6351_s3 + $0x54] ss:$8 sps:$4 sm:$0xff]  }
 0x162   :  { %v685_v60 = vmax.f32 %v4030_v56, 0.0 }
 0x163   :  { %v686_v62 = vmax.f32 %v4031_v58, 0.0 }
 0x164   :  { %v713_v63 = vpack.c.bf16 %v685_v60, %v683_v59 }
 0x165   :  { %v620_v0 = vpop.f32.mrb[8].mxu0  ;;  %v714_v1 = vpack.c.bf16 %v686_v62, %v684_v61 }
 0x166   :  { %v4032_v3 = vadd.f32 %v620_v0, %v5033_v35  ;;  %v622_v4 = vpop.f32.mrb[9].mxu0 }
 0x167   :  { %v4033_v6 = vadd.f32 %v622_v4, %v5037_v36  ;;  %v624_v7 = vpop.f32.mrb[10].mxu0  ;;  %984 = vmatprep.mubr.bf16.mxu1 %v714_v1 }
 0x168   :  { %v4034_v8 = vadd.f32 %v624_v7, %v5033_v35  ;;  %v626_v9 = vpop.f32.mrb[11].mxu0  ;;  %985 = vmatmul.mubr.bf16.vlgmr.msra.gmra.mrb[0].mxu1 %v713_v63  ;;  %v687_v13 = vmax.f32 %v4032_v3, 0.0  ;;  %v5134_v63 = vld [vmem:[%s6351_s3 + $0x50] ss:$8 sps:$4 sm:$0xff]   ;;  %v5141_v3 = vld [vmem:[%s6351_s3 + $0x64] ss:$8 sps:$4 sm:$0xff]  }
 0x169   :  { %v4035_v10 = vadd.f32 %v626_v9, %v5037_v36  ;;  %1156 = vmatpush1.bf16.msra.mxu1 %v5052_v2  ;;  %1187 = vmatprep.mubr.bf16.mxu1 %v712_v50  ;;  %v688_v16 = vmax.f32 %v4033_v6, 0.0 }
 0x16a   :  { %v689_v14 = vmax.f32 %v4034_v8, 0.0  ;;  %1157 = vmatprep.subr.bf16.mxu1 %v5058_v5 }
 0x16b   :  { %v690_v17 = vmax.f32 %v4035_v10, 0.0  ;;  %v5153_v10 = vld [vmem:[%s6351_s3 + $0x60] ss:$8 sps:$4 sm:$0xff]  }
 0x16c   :  { %v5075_v18 = vpack.c.bf16 %v689_v14, %v687_v13 }
 0x16d   :  { %v5077_v19 = vpack.c.bf16 %v690_v17, %v688_v16  ;;  %1158 = vmatpush1.bf16.msra.mxu1 %v5067_v11  ;;  %v630_v20 = vpop.f32.mrb[12].mxu0  ;;  %v5161_v16 = vld [vmem:[%s6351_s3 + $0x74] ss:$8 sps:$4 sm:$0xff]  }
 0x16e   :  { %v4036_v33 = vadd.f32 %v630_v20, %v5033_v35  ;;  %v632_v37 = vpop.f32.mrb[13].mxu0  ;;  %1159 = vmatprep.subr.bf16.mxu1 %v5073_v15 }
 0x16f   :  { %v4037_v39 = vadd.f32 %v632_v37, %v5037_v36  ;;  %v634_v40 = vpop.f32.mrb[14].mxu0 }
 0x170   :  { %v4038_v41 = vadd.f32 %v634_v40, %v5033_v35  ;;  %v636_v42 = vpop.f32.mrb[15].mxu0  ;;  %v691_v45 = vmax.f32 %v4036_v33, 0.0  ;;  %v5171_v40 = vld [vmem:[%s6351_s3 + $0x70] ss:$8 sps:$4 sm:$0xff]  }
 0x171   :  { %v4039_v43 = vadd.f32 %v636_v42, %v5037_v36  ;;  %1160 = vmatpush1.bf16.msra.mxu1 %v5083_v30  ;;  %v692_v48 = vmax.f32 %v4037_v39, 0.0 }
 0x172   :  { %v693_v46 = vmax.f32 %v4038_v41, 0.0  ;;  %1161 = vmatprep.subr.bf16.mxu1 %v5090_v38 }
 0x173   :  { %v694_v50 = vmax.f32 %v4039_v43, 0.0  ;;  %v5178_v43 = vld [vmem:[%s6351_s3 + $0x84] ss:$8 sps:$4 sm:$0xff]  }
 0x174   :  { %v5107_v51 = vpack.c.bf16 %v693_v46, %v691_v45 }
 0x175   :  { %v5109_v52 = vpack.c.bf16 %v694_v50, %v692_v48  ;;  %1162 = vmatpush1.bf16.msra.mxu1 %v5099_v44  ;;  %v640_v53 = vpop.f32.mrb[16].mxu0 }
 0x176   :  { %v4040_v55 = vadd.f32 %v640_v53, %v5033_v35  ;;  %v642_v56 = vpop.f32.mrb[17].mxu0  ;;  %1163 = vmatprep.subr.bf16.mxu1 %v5105_v47 }
 0x177   :  { %v4041_v58 = vadd.f32 %v642_v56, %v5037_v36  ;;  %v644_v59 = vpop.f32.mrb[18].mxu0  ;;  %1732 = vmatprep.mubr.bf16.mxu0 %v5109_v52 }
 0x178   :  { %v4042_v60 = vadd.f32 %v644_v59, %v5033_v35  ;;  %v646_v61 = vpop.f32.mrb[19].mxu0  ;;  %1733 = vmatmul.mubr.bf16.vlgmr.msra.gmra.mrb[32].mxu0 %v5107_v51  ;;  %v695_v0 = vmax.f32 %v4040_v55, 0.0  ;;  %v5189_v55 = vld [vmem:[%s6351_s3 + $0x80] ss:$8 sps:$4 sm:$0xff]   ;;  %v5197_v59 = vld [vmem:[%s6351_s3 + $0x94] ss:$8 sps:$4 sm:$0xff]  }
 0x179   :  { %v4043_v62 = vadd.f32 %v646_v61, %v5037_v36  ;;  %1164 = vmatpush1.bf16.msra.mxu1 %v5115_v54  ;;  %1744 = vmatpush1.bf16.msra.mxu0 %v5052_v2  ;;  %v696_v4 = vmax.f32 %v4041_v58, 0.0 }
 0x17a   :  { %v697_v1 = vmax.f32 %v4042_v60, 0.0  ;;  %1775 = vmatprep.mubr.bf16.mxu0 %v5077_v19  ;;  %1165 = vmatprep.subr.bf16.mxu1 %v5122_v57 }
 0x17b   :  { %v698_v6 = vmax.f32 %v4043_v62, 0.0  ;;  %1745 = vmatprep.subr.bf16.mxu0 %v5058_v5 }
 0x17c   :  { %v5144_v7 = vpack.c.bf16 %v697_v1, %v695_v0 }
 0x17d   :  { %v5146_v8 = vpack.c.bf16 %v698_v6, %v696_v4  ;;  %1166 = vmatpush1.bf16.msra.mxu1 %v5134_v63  ;;  %1746 = vmatpush1.bf16.msra.mxu0 %v5067_v11  ;;  %v650_v9 = vpop.f32.mrb[20].mxu0  ;;  %v5207_v4 = vld [vmem:[%s6351_s3 + $0x90] ss:$8 sps:$4 sm:$0xff]  }
 0x17e   :  { %v4044_v13 = vadd.f32 %v650_v9, %v5033_v35  ;;  %v652_v14 = vpop.f32.mrb[21].mxu0  ;;  %1167 = vmatprep.subr.bf16.mxu1 %v5141_v3  ;;  %1747 = vmatprep.subr.bf16.mxu0 %v5073_v15 }
 0x17f   :  { %v4045_v17 = vadd.f32 %v652_v14, %v5037_v36  ;;  %v654_v20 = vpop.f32.mrb[22].mxu0 }
 0x180   :  { %v4046_v33 = vadd.f32 %v654_v20, %v5033_v35  ;;  %v656_v37 = vpop.f32.mrb[23].mxu0  ;;  %v699_v41 = vmax.f32 %v4044_v13, 0.0  ;;  %v5214_v13 = vld [vmem:[%s6351_s3 + $0xa4] ss:$8 sps:$4 sm:$0xff]  }
 0x181   :  { %v4047_v39 = vadd.f32 %v656_v37, %v5037_v36  ;;  %1168 = vmatpush1.bf16.msra.mxu1 %v5153_v10  ;;  %1748 = vmatpush1.bf16.msra.mxu0 %v5083_v30  ;;  %v700_v45 = vmax.f32 %v4045_v17, 0.0 }
 0x182   :  { %v701_v42 = vmax.f32 %v4046_v33, 0.0  ;;  %1169 = vmatprep.subr.bf16.mxu1 %v5161_v16  ;;  %1749 = vmatprep.subr.bf16.mxu0 %v5090_v38 }
 0x183   :  { %v702_v46 = vmax.f32 %v4047_v39, 0.0  ;;  %v5225_v39 = vld [vmem:[%s6351_s3 + $0xa0] ss:$8 sps:$4 sm:$0xff]  }
 0x184   :  { %v5180_v48 = vpack.c.bf16 %v701_v42, %v699_v41 }
 0x185   :  { %v5182_v50 = vpack.c.bf16 %v702_v46, %v700_v45  ;;  %1170 = vmatpush1.bf16.msra.mxu1 %v5171_v40  ;;  %1750 = vmatpush1.bf16.msra.mxu0 %v5099_v44  ;;  %v660_v53 = vpop.f32.mrb[24].mxu0  ;;  %v5233_v45 = vld [vmem:[%s6351_s3 + $0xb4] ss:$8 sps:$4 sm:$0xff]  }
 0x186   :  { %v4048_v56 = vadd.f32 %v660_v53, %v5033_v35  ;;  %v662_v58 = vpop.f32.mrb[25].mxu0  ;;  %1171 = vmatprep.subr.bf16.mxu1 %v5178_v43  ;;  %1751 = vmatprep.subr.bf16.mxu0 %v5105_v47 }
 0x187   :  { %v4049_v60 = vadd.f32 %v662_v58, %v5037_v36  ;;  %v664_v61 = vpop.f32.mrb[26].mxu0 }
 0x188   :  { %v4050_v62 = vadd.f32 %v664_v61, %v5033_v35  ;;  %v666_v0 = vpop.f32.mrb[27].mxu0  ;;  %v703_v6 = vmax.f32 %v4048_v56, 0.0  ;;  %v5243_v61 = vld [vmem:[%s6351_s3 + $0xb0] ss:$8 sps:$4 sm:$0xff]  }
 0x189   :  { %v4051_v1 = vadd.f32 %v666_v0, %v5037_v36  ;;  %1172 = vmatpush1.bf16.msra.mxu1 %v5189_v55  ;;  %1752 = vmatpush1.bf16.msra.mxu0 %v5115_v54  ;;  %v704_v14 = vmax.f32 %v4049_v60, 0.0 }
 0x18a   :  { %v705_v9 = vmax.f32 %v4050_v62, 0.0  ;;  %1173 = vmatprep.subr.bf16.mxu1 %v5197_v59  ;;  %1753 = vmatprep.subr.bf16.mxu0 %v5122_v57 }
 0x18b   :  { %v706_v17 = vmax.f32 %v4051_v1, 0.0 }
 0x18c   :  { %v5216_v20 = vpack.c.bf16 %v705_v9, %v703_v6 }
 0x18d   :  { %v5218_v33 = vpack.c.bf16 %v706_v17, %v704_v14  ;;  %1174 = vmatpush1.bf16.msra.mxu1 %v5207_v4  ;;  %1754 = vmatpush1.bf16.msra.mxu0 %v5134_v63  ;;  %v670_v37 = vpop.f32.mrb[28].mxu0  ;;  %v5261_v14 = vld [vmem:[%s6351_s3 + $0xc0] ss:$8 sps:$4 sm:$0xff]   ;;  %v5268_v17 = vld [vmem:[%s6351_s3 + $0xd4] ss:$8 sps:$4 sm:$0xff]  }
 0x18e   :  { %6421 = vst [vmem:[#allocation4_spill] sm:$0xff] %v5216_v20  ;;  %v4052_v41 = vadd.f32 %v670_v37, %v5033_v35  ;;  %v672_v42 = vpop.f32.mrb[29].mxu0  ;;  %1175 = vmatprep.subr.bf16.mxu1 %v5214_v13  ;;  %1755 = vmatprep.subr.bf16.mxu0 %v5141_v3  ;;  %v5275_v37 = vld [vmem:[%s6351_s3 + $0xd0] ss:$8 sps:$4 sm:$0xff]  }
 0x18f   :  { %v4053_v46 = vadd.f32 %v672_v42, %v5037_v36  ;;  %v674_v53 = vpop.f32.mrb[30].mxu0  ;;  %v5289_v42 = vld [vmem:[%s6351_s3 + $0xe0] ss:$8 sps:$4 sm:$0xff]   ;;  %v5418_v20 = vld [vmem:[%s6351_s3 + $0x270] ss:$8 sps:$4 sm:$0xff]  }
 0x190   :  { %v4054_v56 = vadd.f32 %v674_v53, %v5033_v35  ;;  %v676_v58 = vpop.f32.mrb[31].mxu0  ;;  %v707_v62 = vmax.f32 %v4052_v41, 0.0  ;;  %v5250_v35 = vld [vmem:[%s6351_s3 + $0xc4] ss:$8 sps:$4 sm:$0xff]   ;;  %v5303_v53 = vld [vmem:[%s6351_s3 + $0xf0] ss:$8 sps:$4 sm:$0xff]  }
 0x191   :  { %v4055_v60 = vadd.f32 %v676_v58, %v5037_v36  ;;  %1176 = vmatpush1.bf16.msra.mxu1 %v5225_v39  ;;  %1756 = vmatpush1.bf16.msra.mxu0 %v5153_v10  ;;  %v708_v36 = vmax.f32 %v4053_v46, 0.0  ;;  %v5282_v41 = vld [vmem:[%s6351_s3 + $0xe4] ss:$8 sps:$4 sm:$0xff]   ;;  %v5296_v46 = vld [vmem:[%s6351_s3 + $0xf4] ss:$8 sps:$4 sm:$0xff]   ;;  %6436 = vst [vmem:[#allocation19_spill] sm:$0xff] %v5418_v20 }
 0x192   :  { %v709_v0 = vmax.f32 %v4054_v56, 0.0  ;;  %1177 = vmatprep.subr.bf16.mxu1 %v5233_v45  ;;  %1757 = vmatprep.subr.bf16.mxu0 %v5161_v16  ;;  %v5310_v56 = vld [vmem:[%s6351_s3 + $0x204] ss:$8 sps:$4 sm:$0xff]   ;;  %v5317_v58 = vld [vmem:[%s6351_s3 + $0x200] ss:$8 sps:$4 sm:$0xff]  }
 0x193   :  { %v710_v1 = vmax.f32 %v4055_v60, 0.0  ;;  %v5324_v60 = vld [vmem:[%s6351_s3 + $0x214] ss:$8 sps:$4 sm:$0xff]  }
 0x194   :  { %v5252_v6 = vpack.c.bf16 %v709_v0, %v707_v62  ;;  %v5332_v62 = vld [vmem:[%s6351_s3 + $0x210] ss:$8 sps:$4 sm:$0xff]   ;;  %v5339_v0 = vld [vmem:[%s6351_s3 + $0x224] ss:$8 sps:$4 sm:$0xff]  }
 0x195   :  { %v5254_v9 = vpack.c.bf16 %v710_v1, %v708_v36  ;;  %1178 = vmatpush1.bf16.msra.mxu1 %v5243_v61  ;;  %1758 = vmatpush1.bf16.msra.mxu0 %v5171_v40  ;;  %6424 = vst [vmem:[#allocation7_spill] sm:$0xff] %v5332_v62  ;;  %6425 = vst [vmem:[#allocation8_spill] sm:$0xff] %v5339_v0  ;;  %v5360_v36 = vld [vmem:[%s6351_s3 + $0x230] ss:$8 sps:$4 sm:$0xff]   ;;  %v5367_v1 = vld [vmem:[%s6351_s3 + $0x244] ss:$8 sps:$4 sm:$0xff]  }
 0x196   :  { %6422 = vst [vmem:[#allocation5_spill] sm:$0xff] %v5252_v6  ;;  %1179 = vmatprep.subr.bf16.mxu1 %v5250_v35  ;;  %1759 = vmatprep.subr.bf16.mxu0 %v5178_v43  ;;  %6428 = vst [vmem:[#allocation11_spill] sm:$0xff] %v5360_v36  ;;  %v5396_v6 = vld [vmem:[%s6351_s3 + $0x264] ss:$8 sps:$4 sm:$0xff]  }
 0x197   :  { %6423 = vst [vmem:[#allocation6_spill] sm:$0xff] %v5254_v9  ;;  %6429 = vst [vmem:[#allocation12_spill] sm:$0xff] %v5367_v1  ;;  %v5411_v9 = vld [vmem:[%s6351_s3 + $0x274] ss:$8 sps:$4 sm:$0xff]  }
 0x198   :  { %6433 = vst [vmem:[#allocation16_spill] sm:$0xff] %v5396_v6  ;;  %6435 = vst [vmem:[#allocation18_spill] sm:$0xff] %v5411_v9 }
 0x199   :  { %1180 = vmatpush1.bf16.msra.mxu1 %v5261_v14  ;;  %1760 = vmatpush1.bf16.msra.mxu0 %v5189_v55 }
 0x19a   :  { %1181 = vmatprep.subr.bf16.mxu1 %v5268_v17  ;;  %1761 = vmatprep.subr.bf16.mxu0 %v5197_v59 }
 0x19d   :  { %1182 = vmatpush1.bf16.msra.mxu1 %v5275_v37  ;;  %1762 = vmatpush1.bf16.msra.mxu0 %v5207_v4 }
 0x19e   :  { %1183 = vmatprep.subr.bf16.mxu1 %v5282_v41  ;;  %1763 = vmatprep.subr.bf16.mxu0 %v5214_v13 }
 0x1a1   :  { %1184 = vmatpush1.bf16.msra.mxu1 %v5289_v42  ;;  %1764 = vmatpush1.bf16.msra.mxu0 %v5225_v39 }
 0x1a2   :  { %1185 = vmatprep.subr.bf16.mxu1 %v5296_v46  ;;  %1765 = vmatprep.subr.bf16.mxu0 %v5233_v45 }
 0x1a5   :  { %1186 = vmatpush1.bf16.msra.mxu1 %v5303_v53  ;;  %1766 = vmatpush1.bf16.msra.mxu0 %v5243_v61 }
 0x1a6   :  { %1391 = vmatprep.subr.bf16.mxu1 %v5310_v56  ;;  %1767 = vmatprep.subr.bf16.mxu0 %v5250_v35 }
 0x1a8   :  { %1188 = vmatmul.mubr.bf16.vlgmr.msra.gmra.mrb[0].mxu1 %v5043_v49  ;;  %v5346_v49 = vld [vmem:[%s6351_s3 + $0x220] ss:$8 sps:$4 sm:$0xff]  }
 0x1a9   :  { %1392 = vmatpush1.bf16.msra.mxu1 %v5317_v58  ;;  %1423 = vmatprep.mubr.bf16.mxu1 %v5077_v19  ;;  %6426 = vst [vmem:[#allocation9_spill] sm:$0xff] %v5346_v49  ;;  %v5353_v19 = vld [vmem:[%s6351_s3 + $0x234] ss:$8 sps:$4 sm:$0xff]  }
 0x1aa   :  { %1768 = vmatpush1.bf16.msra.mxu0 %v5261_v14  ;;  %1393 = vmatprep.subr.bf16.mxu1 %v5324_v60  ;;  %6427 = vst [vmem:[#allocation10_spill] sm:$0xff] %v5353_v19 }
 0x1ab   :  { %1769 = vmatprep.subr.bf16.mxu0 %v5268_v17 }
 0x1ad   :  { %1394 = vmatpush1.bf16.msra.mxu1 %v5332_v62 }
 0x1ae   :  { %1770 = vmatpush1.bf16.msra.mxu0 %v5275_v37  ;;  %1395 = vmatprep.subr.bf16.mxu1 %v5339_v0 }
 0x1af   :  { %1771 = vmatprep.subr.bf16.mxu0 %v5282_v41 }
 0x1b1   :  { %1396 = vmatpush1.bf16.msra.mxu1 %v5346_v49 }
 0x1b2   :  { %1772 = vmatpush1.bf16.msra.mxu0 %v5289_v42  ;;  %1397 = vmatprep.subr.bf16.mxu1 %v5353_v19 }
 0x1b3   :  { %1773 = vmatprep.subr.bf16.mxu0 %v5296_v46 }
 0x1b5   :  { %1398 = vmatpush1.bf16.msra.mxu1 %v5360_v36 }
 0x1b6   :  { %1774 = vmatpush1.bf16.msra.mxu0 %v5303_v53  ;;  %1399 = vmatprep.subr.bf16.mxu1 %v5367_v1 }
 0x1b7   :  { %1786 = vmatprep.subr.bf16.mxu0 %v5310_v56 }
 0x1b9   :  { %1776 = vmatmul.mubr.bf16.vlgmr.msra.gmra.mrb[32].mxu0 %v5075_v18  ;;  %1400 = vmatpush1.bf16.msra.mxu1 %v5374_v34 }
 0x1ba   :  { %1787 = vmatpush1.bf16.msra.mxu0 %v5317_v58  ;;  %1818 = vmatprep.mubr.bf16.mxu0 %v5146_v8 }
 0x1bb   :  { %1401 = vmatprep.subr.bf16.mxu1 %v5382_v32  ;;  %1788 = vmatprep.subr.bf16.mxu0 %v5324_v60 }
 0x1bd   :  { %1402 = vmatpush1.bf16.msra.mxu1 %v5389_v12 }
 0x1be   :  { %1789 = vmatpush1.bf16.msra.mxu0 %v5332_v62  ;;  %1403 = vmatprep.subr.bf16.mxu1 %v5396_v6  ;;  %v5425_v62 = vld [vmem:[%s6351_s3 + $0x284] ss:$8 sps:$4 sm:$0xff]  }
 0x1bf   :  { %1790 = vmatprep.subr.bf16.mxu0 %v5339_v0  ;;  %6437 = vst [vmem:[#allocation20_spill] sm:$0xff] %v5425_v62  ;;  %v5432_v0 = vld [vmem:[%s6351_s3 + $0x280] ss:$8 sps:$4 sm:$0xff]  }
 0x1c0   :  { %6438 = vst [vmem:[#allocation21_spill] sm:$0xff] %v5432_v0 }
 0x1c1   :  { %1404 = vmatpush1.bf16.msra.mxu1 %v5404_v31 }
 0x1c2   :  { %1791 = vmatpush1.bf16.msra.mxu0 %v5346_v49  ;;  %1405 = vmatprep.subr.bf16.mxu1 %v5411_v9  ;;  %v5439_v49 = vld [vmem:[%s6351_s3 + $0x294] ss:$8 sps:$4 sm:$0xff]  }
 0x1c3   :  { %1792 = vmatprep.subr.bf16.mxu0 %v5353_v19  ;;  %6439 = vst [vmem:[#allocation22_spill] sm:$0xff] %v5439_v49  ;;  %v5446_v19 = vld [vmem:[%s6351_s3 + $0x290] ss:$8 sps:$4 sm:$0xff]  }
 0x1c4   :  { %6440 = vst [vmem:[#allocation23_spill] sm:$0xff] %v5446_v19 }
 0x1c5   :  { %1406 = vmatpush1.bf16.msra.mxu1 %v5418_v20 }
 0x1c6   :  { %1793 = vmatpush1.bf16.msra.mxu0 %v5360_v36  ;;  %1407 = vmatprep.subr.bf16.mxu1 %v5425_v62  ;;  %v5453_v36 = vld [vmem:[%s6351_s3 + $0x2a4] ss:$8 sps:$4 sm:$0xff]  }
 0x1c7   :  { %1794 = vmatprep.subr.bf16.mxu0 %v5367_v1  ;;  %6441 = vst [vmem:[#allocation24_spill] sm:$0xff] %v5453_v36  ;;  %v5460_v1 = vld [vmem:[%s6351_s3 + $0x2a0] ss:$8 sps:$4 sm:$0xff]  }
 0x1c8   :  { %6442 = vst [vmem:[#allocation25_spill] sm:$0xff] %v5460_v1 }
 0x1c9   :  { %1408 = vmatpush1.bf16.msra.mxu1 %v5432_v0 }
 0x1ca   :  { %1795 = vmatpush1.bf16.msra.mxu0 %v5374_v34  ;;  %1409 = vmatprep.subr.bf16.mxu1 %v5439_v49  ;;  %v5467_v34 = vld [vmem:[%s6351_s3 + $0x2b4] ss:$8 sps:$4 sm:$0xff]  }
 0x1cb   :  { %1796 = vmatprep.subr.bf16.mxu0 %v5382_v32  ;;  %6443 = vst [vmem:[#allocation26_spill] sm:$0xff] %v5467_v34  ;;  %v5474_v32 = vld [vmem:[%s6351_s3 + $0x2b0] ss:$8 sps:$4 sm:$0xff]  }
 0x1cc   :  { %6444 = vst [vmem:[#allocation27_spill] sm:$0xff] %v5474_v32 }
 0x1cd   :  { %1410 = vmatpush1.bf16.msra.mxu1 %v5446_v19 }
 0x1ce   :  { %1797 = vmatpush1.bf16.msra.mxu0 %v5389_v12  ;;  %1411 = vmatprep.subr.bf16.mxu1 %v5453_v36  ;;  %v5481_v12 = vld [vmem:[%s6351_s3 + $0x2c4] ss:$8 sps:$4 sm:$0xff]  }
 0x1cf   :  { %1798 = vmatprep.subr.bf16.mxu0 %v5396_v6  ;;  %v5488_v6 = vld [vmem:[%s6351_s3 + $0x2c0] ss:$8 sps:$4 sm:$0xff]  }
 0x1d1   :  { %1412 = vmatpush1.bf16.msra.mxu1 %v5460_v1 }
 0x1d2   :  { %1799 = vmatpush1.bf16.msra.mxu0 %v5404_v31  ;;  %1413 = vmatprep.subr.bf16.mxu1 %v5467_v34  ;;  %v5495_v31 = vld [vmem:[%s6351_s3 + $0x2d4] ss:$8 sps:$4 sm:$0xff]  }
 0x1d3   :  { %1800 = vmatprep.subr.bf16.mxu0 %v5411_v9  ;;  %6445 = vst [vmem:[#allocation28_spill] sm:$0xff] %v5495_v31  ;;  %v5502_v9 = vld [vmem:[%s6351_s3 + $0x2d0] ss:$8 sps:$4 sm:$0xff]  }
 0x1d4   :  { %6446 = vst [vmem:[#allocation29_spill] sm:$0xff] %v5502_v9 }
 0x1d5   :  { %1414 = vmatpush1.bf16.msra.mxu1 %v5474_v32 }
 0x1d6   :  { %1801 = vmatpush1.bf16.msra.mxu0 %v5418_v20  ;;  %1415 = vmatprep.subr.bf16.mxu1 %v5481_v12  ;;  %v5509_v20 = vld [vmem:[%s6351_s3 + $0x2e4] ss:$8 sps:$4 sm:$0xff]  }
 0x1d7   :  { %1802 = vmatprep.subr.bf16.mxu0 %v5425_v62  ;;  %6447 = vst [vmem:[#allocation30_spill] sm:$0xff] %v5509_v20  ;;  %v5516_v62 = vld [vmem:[%s6351_s3 + $0x2e0] ss:$8 sps:$4 sm:$0xff]  }
 0x1d8   :  { %6448 = vst [vmem:[#allocation31_spill] sm:$0xff] %v5516_v62 }
 0x1d9   :  { %1416 = vmatpush1.bf16.msra.mxu1 %v5488_v6 }
 0x1da   :  { %1803 = vmatpush1.bf16.msra.mxu0 %v5432_v0  ;;  %1417 = vmatprep.subr.bf16.mxu1 %v5495_v31  ;;  %v5523_v0 = vld [vmem:[%s6351_s3 + $0x2f4] ss:$8 sps:$4 sm:$0xff]  }
 0x1db   :  { %1804 = vmatprep.subr.bf16.mxu0 %v5439_v49  ;;  %6449 = vst [vmem:[#allocation32_spill] sm:$0xff] %v5523_v0  ;;  %v5530_v49 = vld [vmem:[%s6351_s3 + $0x2f0] ss:$8 sps:$4 sm:$0xff]  }
 0x1dc   :  { %6450 = vst [vmem:[#allocation33_spill] sm:$0xff] %v5530_v49 }
 0x1dd   :  { %1418 = vmatpush1.bf16.msra.mxu1 %v5502_v9 }
 0x1de   :  { %1805 = vmatpush1.bf16.msra.mxu0 %v5446_v19  ;;  %1419 = vmatprep.subr.bf16.mxu1 %v5509_v20  ;;  %v5537_v19 = vld [vmem:[%s6351_s3 + $0x304] ss:$8 sps:$4 sm:$0xff]  }
 0x1df   :  { %1806 = vmatprep.subr.bf16.mxu0 %v5453_v36  ;;  %6451 = vst [vmem:[#allocation34_spill] sm:$0xff] %v5537_v19  ;;  %v5544_v36 = vld [vmem:[%s6351_s3 + $0x300] ss:$8 sps:$4 sm:$0xff]  }
 0x1e0   :  { %6452 = vst [vmem:[#allocation35_spill] sm:$0xff] %v5544_v36 }
 0x1e1   :  { %1420 = vmatpush1.bf16.msra.mxu1 %v5516_v62 }
 0x1e2   :  { %1807 = vmatpush1.bf16.msra.mxu0 %v5460_v1  ;;  %1421 = vmatprep.subr.bf16.mxu1 %v5523_v0  ;;  %v5551_v1 = vld [vmem:[%s6351_s3 + $0x314] ss:$8 sps:$4 sm:$0xff]  }
 0x1e3   :  { %1808 = vmatprep.subr.bf16.mxu0 %v5467_v34  ;;  %6453 = vst [vmem:[#allocation36_spill] sm:$0xff] %v5551_v1  ;;  %v5560_v34 = vld [vmem:[%s6351_s3 + $0x310] ss:$8 sps:$4 sm:$0xff]  }
 0x1e4   :  { %6454 = vst [vmem:[#allocation37_spill] sm:$0xff] %v5560_v34 }
 0x1e5   :  { %1422 = vmatpush1.bf16.msra.mxu1 %v5530_v49 }
 0x1e6   :  { %1809 = vmatpush1.bf16.msra.mxu0 %v5474_v32  ;;  %1631 = vmatprep.subr.bf16.mxu1 %v5537_v19  ;;  %v5567_v32 = vld [vmem:[%s6351_s3 + $0x324] ss:$8 sps:$4 sm:$0xff]  }
 0x1e7   :  { %1810 = vmatprep.subr.bf16.mxu0 %v5481_v12  ;;  %6455 = vst [vmem:[#allocation38_spill] sm:$0xff] %v5567_v32 }
 0x1e8   :  { %1424 = vmatmul.mubr.bf16.vlgmr.msra.gmra.mrb[0].mxu1 %v5075_v18  ;;  %v5574_v18 = vld [vmem:[%s6351_s3 + $0x320] ss:$8 sps:$4 sm:$0xff]  }
 0x1e9   :  { %1632 = vmatpush1.bf16.msra.mxu1 %v5544_v36  ;;  %1663 = vmatprep.mubr.bf16.mxu1 %v5109_v52  ;;  %6456 = vst [vmem:[#allocation39_spill] sm:$0xff] %v5574_v18  ;;  %v5581_v52 = vld [vmem:[%s6351_s3 + $0x334] ss:$8 sps:$4 sm:$0xff]  }
 0x1ea   :  { %1811 = vmatpush1.bf16.msra.mxu0 %v5488_v6  ;;  %1633 = vmatprep.subr.bf16.mxu1 %v5551_v1  ;;  %6457 = vst [vmem:[#allocation40_spill] sm:$0xff] %v5581_v52 }
 0x1eb   :  { %1812 = vmatprep.subr.bf16.mxu0 %v5495_v31  ;;  %v5588_v31 = vld [vmem:[%s6351_s3 + $0x330] ss:$8 sps:$4 sm:$0xff]  }
 0x1ec   :  { %6458 = vst [vmem:[#allocation41_spill] sm:$0xff] %v5588_v31 }
 0x1ed   :  { %1634 = vmatpush1.bf16.msra.mxu1 %v5560_v34 }
 0x1ee   :  { %1813 = vmatpush1.bf16.msra.mxu0 %v5502_v9  ;;  %1635 = vmatprep.subr.bf16.mxu1 %v5567_v32  ;;  %v5595_v9 = vld [vmem:[%s6351_s3 + $0x344] ss:$8 sps:$4 sm:$0xff]  }
 0x1ef   :  { %1814 = vmatprep.subr.bf16.mxu0 %v5509_v20  ;;  %6459 = vst [vmem:[#allocation42_spill] sm:$0xff] %v5595_v9  ;;  %v5602_v20 = vld [vmem:[%s6351_s3 + $0x340] ss:$8 sps:$4 sm:$0xff]  }
 0x1f0   :  { %6460 = vst [vmem:[#allocation43_spill] sm:$0xff] %v5602_v20 }
 0x1f1   :  { %1636 = vmatpush1.bf16.msra.mxu1 %v5574_v18 }
 0x1f2   :  { %1815 = vmatpush1.bf16.msra.mxu0 %v5516_v62  ;;  %1637 = vmatprep.subr.bf16.mxu1 %v5581_v52  ;;  %v5610_v62 = vld [vmem:[%s6351_s3 + $0x354] ss:$8 sps:$4 sm:$0xff]  }
 0x1f3   :  { %1816 = vmatprep.subr.bf16.mxu0 %v5523_v0  ;;  %6461 = vst [vmem:[#allocation44_spill] sm:$0xff] %v5610_v62  ;;  %v5617_v0 = vld [vmem:[%s6351_s3 + $0x350] ss:$8 sps:$4 sm:$0xff]  }
 0x1f4   :  { %6462 = vst [vmem:[#allocation45_spill] sm:$0xff] %v5617_v0 }
 0x1f5   :  { %1638 = vmatpush1.bf16.msra.mxu1 %v5588_v31 }
 0x1f6   :  { %1817 = vmatpush1.bf16.msra.mxu0 %v5530_v49  ;;  %1639 = vmatprep.subr.bf16.mxu1 %v5595_v9  ;;  %v5632_v49 = vld [vmem:[%s6351_s3 + $0x360] ss:$8 sps:$4 sm:$0xff]  }
 0x1f7   :  { %1833 = vmatprep.subr.bf16.mxu0 %v5537_v19  ;;  %v5624_v19 = vld [vmem:[%s6351_s3 + $0x364] ss:$8 sps:$4 sm:$0xff]   ;;  %6464 = vst [vmem:[#allocation47_spill] sm:$0xff] %v5632_v49 }
 0x1f8   :  { %6463 = vst [vmem:[#allocation46_spill] sm:$0xff] %v5624_v19 }
 0x1f9   :  { %1819 = vmatmul.mubr.bf16.vlgmr.msra.gmra.mrb[32].mxu0 %v5144_v7  ;;  %1640 = vmatpush1.bf16.msra.mxu1 %v5602_v20 }
 0x1fa   :  { %1834 = vmatpush1.bf16.msra.mxu0 %v5544_v36  ;;  %1865 = vmatprep.mubr.bf16.mxu0 %v5182_v50  ;;  %v5639_v36 = vld [vmem:[%s6351_s3 + $0x374] ss:$8 sps:$4 sm:$0xff]  }
 0x1fb   :  { %1641 = vmatprep.subr.bf16.mxu1 %v5610_v62  ;;  %1835 = vmatprep.subr.bf16.mxu0 %v5551_v1  ;;  %6465 = vst [vmem:[#allocation48_spill] sm:$0xff] %v5639_v36  ;;  %v5646_v1 = vld [vmem:[%s6351_s3 + $0x370] ss:$8 sps:$4 sm:$0xff]  }
 0x1fc   :  { %6466 = vst [vmem:[#allocation49_spill] sm:$0xff] %v5646_v1 }
 0x1fd   :  { %1642 = vmatpush1.bf16.msra.mxu1 %v5617_v0 }
 0x1fe   :  { %1836 = vmatpush1.bf16.msra.mxu0 %v5560_v34  ;;  %1643 = vmatprep.subr.bf16.mxu1 %v5624_v19  ;;  %v5653_v34 = vld [vmem:[%s6351_s3 + $0x384] ss:$8 sps:$4 sm:$0xff]  }
 0x1ff   :  { %1837 = vmatprep.subr.bf16.mxu0 %v5567_v32  ;;  %6467 = vst [vmem:[#allocation50_spill] sm:$0xff] %v5653_v34  ;;  %v5660_v32 = vld [vmem:[%s6351_s3 + $0x380] ss:$8 sps:$4 sm:$0xff]  }
 0x200   :  { %6468 = vst [vmem:[#allocation51_spill] sm:$0xff] %v5660_v32 }
 0x201   :  { %1644 = vmatpush1.bf16.msra.mxu1 %v5632_v49 }
 0x202   :  { %1838 = vmatpush1.bf16.msra.mxu0 %v5574_v18  ;;  %1645 = vmatprep.subr.bf16.mxu1 %v5639_v36  ;;  %v5667_v18 = vld [vmem:[%s6351_s3 + $0x394] ss:$8 sps:$4 sm:$0xff]  }
 0x203   :  { %1839 = vmatprep.subr.bf16.mxu0 %v5581_v52  ;;  %6469 = vst [vmem:[#allocation52_spill] sm:$0xff] %v5667_v18  ;;  %v5674_v52 = vld [vmem:[%s6351_s3 + $0x390] ss:$8 sps:$4 sm:$0xff]  }
 0x205   :  { %1646 = vmatpush1.bf16.msra.mxu1 %v5646_v1 }
 0x206   :  { %1840 = vmatpush1.bf16.msra.mxu0 %v5588_v31  ;;  %1647 = vmatprep.subr.bf16.mxu1 %v5653_v34  ;;  %v5681_v31 = vld [vmem:[%s6351_s3 + $0x3a4] ss:$8 sps:$4 sm:$0xff]  }
 0x207   :  { %1841 = vmatprep.subr.bf16.mxu0 %v5595_v9  ;;  %6470 = vst [vmem:[#allocation53_spill] sm:$0xff] %v5681_v31  ;;  %v5688_v9 = vld [vmem:[%s6351_s3 + $0x3a0] ss:$8 sps:$4 sm:$0xff]  }
 0x208   :  { %6471 = vst [vmem:[#allocation54_spill] sm:$0xff] %v5688_v9 }
 0x209   :  { %1648 = vmatpush1.bf16.msra.mxu1 %v5660_v32 }
 0x20a   :  { %1842 = vmatpush1.bf16.msra.mxu0 %v5602_v20  ;;  %1649 = vmatprep.subr.bf16.mxu1 %v5667_v18  ;;  %v5695_v20 = vld [vmem:[%s6351_s3 + $0x3b4] ss:$8 sps:$4 sm:$0xff]  }
 0x20b   :  { %1843 = vmatprep.subr.bf16.mxu0 %v5610_v62  ;;  %v5702_v62 = vld [vmem:[%s6351_s3 + $0x3b0] ss:$8 sps:$4 sm:$0xff]  }
 0x20c   :  { %6472 = vst [vmem:[#allocation55_spill] sm:$0xff] %v5702_v62 }
 0x20d   :  { %1650 = vmatpush1.bf16.msra.mxu1 %v5674_v52 }
 0x20e   :  { %1844 = vmatpush1.bf16.msra.mxu0 %v5617_v0  ;;  %1651 = vmatprep.subr.bf16.mxu1 %v5681_v31  ;;  %v5709_v0 = vld [vmem:[%s6351_s3 + $0x3c4] ss:$8 sps:$4 sm:$0xff]  }
 0x20f   :  { %1845 = vmatprep.subr.bf16.mxu0 %v5624_v19  ;;  %v5716_v19 = vld [vmem:[%s6351_s3 + $0x3c0] ss:$8 sps:$4 sm:$0xff]  }
 0x211   :  { %1652 = vmatpush1.bf16.msra.mxu1 %v5688_v9 }
 0x212   :  { %1846 = vmatpush1.bf16.msra.mxu0 %v5632_v49  ;;  %1653 = vmatprep.subr.bf16.mxu1 %v5695_v20  ;;  %v5723_v49 = vld [vmem:[%s6351_s3 + $0x3d4] ss:$8 sps:$4 sm:$0xff]  }
 0x213   :  { %1847 = vmatprep.subr.bf16.mxu0 %v5639_v36  ;;  %v5730_v36 = vld [vmem:[%s6351_s3 + $0x3d0] ss:$8 sps:$4 sm:$0xff]  }
 0x215   :  { %1654 = vmatpush1.bf16.msra.mxu1 %v5702_v62 }
 0x216   :  { %1848 = vmatpush1.bf16.msra.mxu0 %v5646_v1  ;;  %1655 = vmatprep.subr.bf16.mxu1 %v5709_v0  ;;  %v5737_v1 = vld [vmem:[%s6351_s3 + $0x3e4] ss:$8 sps:$4 sm:$0xff]  }
 0x217   :  { %1849 = vmatprep.subr.bf16.mxu0 %v5653_v34  ;;  %v5744_v34 = vld [vmem:[%s6351_s3 + $0x3e0] ss:$8 sps:$4 sm:$0xff]  }
 0x219   :  { %1656 = vmatpush1.bf16.msra.mxu1 %v5716_v19 }
 0x21a   :  { %1850 = vmatpush1.bf16.msra.mxu0 %v5660_v32  ;;  %1657 = vmatprep.subr.bf16.mxu1 %v5723_v49  ;;  %v5751_v32 = vld [vmem:[%s6351_s3 + $0x3f4] ss:$8 sps:$4 sm:$0xff]  }
 0x21b   :  { %1851 = vmatprep.subr.bf16.mxu0 %v5667_v18  ;;  %v5758_v18 = vld [vmem:[%s6351_s3 + $0x3f0] ss:$8 sps:$4 sm:$0xff]  }
 0x21c   :  { %6473 = vst [vmem:[#allocation56_spill] sm:$0xff] %v5758_v18 }
 0x21d   :  { %1658 = vmatpush1.bf16.msra.mxu1 %v5730_v36 }
 0x21e   :  { %1852 = vmatpush1.bf16.msra.mxu0 %v5674_v52  ;;  %1659 = vmatprep.subr.bf16.mxu1 %v5737_v1 }
 0x21f   :  { %1853 = vmatprep.subr.bf16.mxu0 %v5681_v31  ;;  %v4517_v31 = vld [vmem:[%s6351_s3 + $0x104] ss:$8 sps:$4 sm:$0xff]  }
 0x221   :  { %1660 = vmatpush1.bf16.msra.mxu1 %v5744_v34 }
 0x222   :  { %1854 = vmatpush1.bf16.msra.mxu0 %v5688_v9  ;;  %1661 = vmatprep.subr.bf16.mxu1 %v5751_v32  ;;  %v4518_v9 = vld [vmem:[%s6351_s3 + $0x100] ss:$8 sps:$4 sm:$0xff]  }
 0x223   :  { %1855 = vmatprep.subr.bf16.mxu0 %v5695_v20 }
 0x225   :  { %1662 = vmatpush1.bf16.msra.mxu1 %v5758_v18 }
 0x226   :  { %1856 = vmatpush1.bf16.msra.mxu0 %v5702_v62  ;;  %1890 = vmatprep.subr.bf16.mxu1 %v4517_v31  ;;  %v4519_v62 = vld [vmem:[%s6351_s3 + $0x114] ss:$8 sps:$4 sm:$0xff]   ;;  %v4520_v31 = vld [vmem:[%s6351_s3 + $0x110] ss:$8 sps:$4 sm:$0xff]  }
 0x227   :  { %1857 = vmatprep.subr.bf16.mxu0 %v5709_v0 }
 0x228   :  { %1664 = vmatmul.mubr.bf16.vlgmr.msra.gmra.mrb[0].mxu1 %v5107_v51  ;;  %v4521_v51 = vld [vmem:[%s6351_s3 + $0x124] ss:$8 sps:$4 sm:$0xff]  }
 0x229   :  { %1891 = vmatpush1.bf16.msra.mxu1 %v4518_v9  ;;  %1922 = vmatprep.mubr.bf16.mxu1 %v5182_v50  ;;  %v4522_v50 = vld [vmem:[%s6351_s3 + $0x120] ss:$8 sps:$4 sm:$0xff]   ;;  %v4523_v9 = vld [vmem:[%s6351_s3 + $0x134] ss:$8 sps:$4 sm:$0xff]  }
 0x22a   :  { %1858 = vmatpush1.bf16.msra.mxu0 %v5716_v19  ;;  %1892 = vmatprep.subr.bf16.mxu1 %v4519_v62  ;;  %v4524_v62 = vld [vmem:[%s6351_s3 + $0x130] ss:$8 sps:$4 sm:$0xff]  }
 0x22b   :  { %1859 = vmatprep.subr.bf16.mxu0 %v5723_v49 }
 0x22d   :  { %1893 = vmatpush1.bf16.msra.mxu1 %v4520_v31  ;;  %v4525_v31 = vld [vmem:[%s6351_s3 + $0x144] ss:$8 sps:$4 sm:$0xff]  }
 0x22e   :  { %1860 = vmatpush1.bf16.msra.mxu0 %v5730_v36  ;;  %1894 = vmatprep.subr.bf16.mxu1 %v4521_v51  ;;  %v6474_v51 = vmov 0  }
 0x22f   :  { %1861 = vmatprep.subr.bf16.mxu0 %v5737_v1 }
 0x231   :  { %1895 = vmatpush1.bf16.msra.mxu1 %v4522_v50  ;;  %v4526_v50 = vld [vmem:[%s6351_s3 + $0x140] ss:$8 sps:$4 sm:$0xff]  }
 0x232   :  { %1862 = vmatpush1.bf16.msra.mxu0 %v5744_v34  ;;  %1896 = vmatprep.subr.bf16.mxu1 %v4523_v9  ;;  %v4527_v9 = vld [vmem:[%s6351_s3 + $0x154] ss:$8 sps:$4 sm:$0xff]  }
 0x233   :  { %1863 = vmatprep.subr.bf16.mxu0 %v5751_v32 }
 0x235   :  { %1897 = vmatpush1.bf16.msra.mxu1 %v4524_v62  ;;  %v4528_v62 = vld [vmem:[%s6351_s3 + $0x150] ss:$8 sps:$4 sm:$0xff]  }
 0x236   :  { %1864 = vmatpush1.bf16.msra.mxu0 %v5758_v18  ;;  %1898 = vmatprep.subr.bf16.mxu1 %v4525_v31  ;;  %v4529_v31 = vld [vmem:[%s6351_s3 + $0x164] ss:$8 sps:$4 sm:$0xff]   ;;  %v4530_v18 = vld [vmem:[%s6351_s3 + $0x160] ss:$8 sps:$4 sm:$0xff]  }
 0x237   :  { %2205 = vmatprep.subr.bf16.mxu0 %v6474_v51 }
 0x239   :  { %1866 = vmatmul.mubr.bf16.vlgmr.msra.gmra.mrb[32].mxu0 %v5180_v48  ;;  %1899 = vmatpush1.bf16.msra.mxu1 %v4526_v50  ;;  %v4531_v50 = vld [vmem:[%s6351_s3 + $0x174] ss:$8 sps:$4 sm:$0xff]  }
 0x23a   :  { %1900 = vmatprep.subr.bf16.mxu1 %v4527_v9  ;;  %v4532_v9 = vld [vmem:[%s6351_s3 + $0x170] ss:$8 sps:$4 sm:$0xff]  }
 0x23d   :  { %1901 = vmatpush1.bf16.msra.mxu1 %v4528_v62  ;;  %v4533_v62 = vld [vmem:[%s6351_s3 + $0x184] ss:$8 sps:$4 sm:$0xff]  }
 0x23e   :  { %1902 = vmatprep.subr.bf16.mxu1 %v4529_v31  ;;  %v4534_v31 = vld [vmem:[%s6351_s3 + $0x180] ss:$8 sps:$4 sm:$0xff]  }
 0x241   :  { %1903 = vmatpush1.bf16.msra.mxu1 %v4530_v18  ;;  %v4535_v18 = vld [vmem:[%s6351_s3 + $0x194] ss:$8 sps:$4 sm:$0xff]  }
 0x242   :  { %1904 = vmatprep.subr.bf16.mxu1 %v4531_v50  ;;  %v4536_v50 = vld [vmem:[%s6351_s3 + $0x190] ss:$8 sps:$4 sm:$0xff]  }
 0x245   :  { %1905 = vmatpush1.bf16.msra.mxu1 %v4532_v9  ;;  %v4537_v9 = vld [vmem:[%s6351_s3 + $0x1a4] ss:$8 sps:$4 sm:$0xff]  }
 0x246   :  { %1906 = vmatprep.subr.bf16.mxu1 %v4533_v62  ;;  %v4538_v62 = vld [vmem:[%s6351_s3 + $0x1a0] ss:$8 sps:$4 sm:$0xff]  }
 0x249   :  { %1907 = vmatpush1.bf16.msra.mxu1 %v4534_v31  ;;  %v4539_v31 = vld [vmem:[%s6351_s3 + $0x1b4] ss:$8 sps:$4 sm:$0xff]  }
 0x24a   :  { %1908 = vmatprep.subr.bf16.mxu1 %v4535_v18  ;;  %v4540_v18 = vld [vmem:[%s6351_s3 + $0x1b0] ss:$8 sps:$4 sm:$0xff]  }
 0x24d   :  { %1909 = vmatpush1.bf16.msra.mxu1 %v4536_v50  ;;  %v4407_v50 = vld [vmem:[%s6353_s5 + $0x60] sm:$0xff]  }
 0x24e   :  { %1910 = vmatprep.subr.bf16.mxu1 %v4537_v9  ;;  %2206 = vmatpush1.bf16.msra.mxu0 %v4407_v50  ;;  %v6512_v9 = vld [vmem:[#allocation42_spill] sm:$0xff]  ;;  %v6515_v50 = vld [vmem:[#allocation43_spill] sm:$0xff] }
 0x24f   :  { %2207 = vmatprep.subr.bf16.mxu0 %v6474_v51 }
 0x251   :  { %1911 = vmatpush1.bf16.msra.mxu1 %v4538_v62  ;;  %v6513_v62 = vld [vmem:[#allocation3_spill] sm:$0xff] }
 0x252   :  { %1912 = vmatprep.subr.bf16.mxu1 %v4539_v31  ;;  %v6514_v31 = vsub.s32 0, %v6513_v62 }
 0x255   :  { %1913 = vmatpush1.bf16.msra.mxu1 %v4540_v18 }
 0x256   :  { %1914 = vmatprep.subr.bf16.mxu1 %v4964_v21  ;;  %v4408_v21 = vld [vmem:[%s6353_s5 + $0x68] sm:$0xff]  }
 0x257   :  { %2208 = vmatpush1.bf16.msra.mxu0 %v4408_v21  ;;  %v6516_v21 = vsub.s32 1, %v6513_v62  ;;  %v4434_v62 = vld [vmem:[%s6353_s5 + $0xd8] sm:$0xff]  }
 0x258   :  { %2209 = vmatprep.subr.bf16.mxu0 %v6474_v51 }
 0x259   :  { %1915 = vmatpush1.bf16.msra.mxu1 %v4969_v22  ;;  %v4409_v22 = vld [vmem:[%s6353_s5 + $0x70] sm:$0xff]  }
 0x25a   :  { %1916 = vmatprep.subr.bf16.mxu1 %v4978_v23  ;;  %v4410_v23 = vld [vmem:[%s6353_s5 + $0x78] sm:$0xff]  }
 0x25b   :  { %2210 = vmatpush1.bf16.msra.mxu0 %v4409_v22 }
 0x25c   :  { %2211 = vmatprep.subr.bf16.mxu0 %v6474_v51 }
 0x25d   :  { %1917 = vmatpush1.bf16.msra.mxu1 %v4983_v24  ;;  %v4411_v24 = vld [vmem:[%s6353_s5 + $0x80] sm:$0xff]  }
 0x25e   :  { %1918 = vmatprep.subr.bf16.mxu1 %v4992_v25  ;;  %v4412_v25 = vld [vmem:[%s6353_s5 + $0x88] sm:$0xff]  }
 0x25f   :  { %2212 = vmatpush1.bf16.msra.mxu0 %v4410_v23  ;;  %v6517_v23 = vld [vmem:[#allocation44_spill] sm:$0xff] }
 0x260   :  { %2213 = vmatprep.subr.bf16.mxu0 %v6474_v51 }
 0x261   :  { %1919 = vmatpush1.bf16.msra.mxu1 %v4997_v26  ;;  %v4413_v26 = vld [vmem:[%s6353_s5 + $0x90] sm:$0xff]  }
 0x262   :  { %1920 = vmatprep.subr.bf16.mxu1 %v5006_v27  ;;  %v4414_v27 = vld [vmem:[%s6353_s5 + $0x98] sm:$0xff]  }
 0x263   :  { %2214 = vmatpush1.bf16.msra.mxu0 %v4411_v24 }
 0x264   :  { %2215 = vmatprep.subr.bf16.mxu0 %v6474_v51 }
 0x265   :  { %1921 = vmatpush1.bf16.msra.mxu1 %v5011_v28  ;;  %v4415_v28 = vld [vmem:[%s6353_s5 + $0xa0] sm:$0xff]  }
 0x266   :  { %1933 = vmatprep.subr.bf16.mxu1 %v5020_v29  ;;  %v4416_v29 = vld [vmem:[%s6353_s5 + $0xa8] sm:$0xff]  }
 0x267   :  { %2216 = vmatpush1.bf16.msra.mxu0 %v4412_v25 }
 0x268   :  { %1923 = vmatmul.mubr.bf16.vlgmr.msra.gmra.mrb[4].mxu1 %v5180_v48  ;;  %2217 = vmatprep.subr.bf16.mxu0 %v6474_v51  ;;  %v6491_v48 = vld [vmem:[#allocation23_spill] sm:$0xff] }
 0x269   :  { %1934 = vmatpush1.bf16.msra.mxu1 %v5052_v2  ;;  %1965 = vmatprep.mubr.bf16.mxu1 %v5146_v8  ;;  %v4417_v2 = vld [vmem:[%s6353_s5 + $0xb0] sm:$0xff]   ;;  %v6486_v8 = vld [vmem:[#allocation18_spill] sm:$0xff] }
 0x26a   :  { %1935 = vmatprep.subr.bf16.mxu1 %v5058_v5  ;;  %v4418_v5 = vld [vmem:[%s6353_s5 + $0xb8] sm:$0xff]  }
 0x26b   :  { %2218 = vmatpush1.bf16.msra.mxu0 %v4413_v26 }
 0x26c   :  { %2219 = vmatprep.subr.bf16.mxu0 %v6474_v51 }
 0x26d   :  { %1936 = vmatpush1.bf16.msra.mxu1 %v5067_v11  ;;  %v6475_v11 = vld [vmem:[#allocation7_spill] sm:$0xff] }
 0x26e   :  { %1937 = vmatprep.subr.bf16.mxu1 %v5073_v15  ;;  %v6476_v15 = vld [vmem:[#allocation8_spill] sm:$0xff] }
 0x26f   :  { %2220 = vmatpush1.bf16.msra.mxu0 %v4414_v27 }
 0x270   :  { %2221 = vmatprep.subr.bf16.mxu0 %v6474_v51 }
 0x271   :  { %1938 = vmatpush1.bf16.msra.mxu1 %v5083_v30  ;;  %v6477_v30 = vld [vmem:[#allocation9_spill] sm:$0xff] }
 0x272   :  { %1939 = vmatprep.subr.bf16.mxu1 %v5090_v38  ;;  %v6478_v38 = vld [vmem:[#allocation10_spill] sm:$0xff] }
 0x273   :  { %2222 = vmatpush1.bf16.msra.mxu0 %v4415_v28 }
 0x274   :  { %2223 = vmatprep.subr.bf16.mxu0 %v6474_v51 }
 0x275   :  { %1940 = vmatpush1.bf16.msra.mxu1 %v5099_v44  ;;  %v6479_v44 = vld [vmem:[#allocation11_spill] sm:$0xff] }
 0x276   :  { %1941 = vmatprep.subr.bf16.mxu1 %v5105_v47  ;;  %v6480_v47 = vld [vmem:[#allocation12_spill] sm:$0xff] }
 0x277   :  { %2224 = vmatpush1.bf16.msra.mxu0 %v4416_v29  ;;  %v6518_v29 = vld [vmem:[#allocation45_spill] sm:$0xff] }
 0x278   :  { %2225 = vmatprep.subr.bf16.mxu0 %v6474_v51 }
 0x279   :  { %1942 = vmatpush1.bf16.msra.mxu1 %v5115_v54  ;;  %v6481_v54 = vld [vmem:[#allocation13_spill] sm:$0xff] }
 0x27a   :  { %1943 = vmatprep.subr.bf16.mxu1 %v5122_v57  ;;  %v6482_v57 = vld [vmem:[#allocation14_spill] sm:$0xff] }
 0x27b   :  { %2226 = vmatpush1.bf16.msra.mxu0 %v4417_v2 }
 0x27c   :  { %2227 = vmatprep.subr.bf16.mxu0 %v6474_v51 }
 0x27d   :  { %1944 = vmatpush1.bf16.msra.mxu1 %v5134_v63  ;;  %v6483_v63 = vld [vmem:[#allocation15_spill] sm:$0xff] }
 0x27e   :  { %1945 = vmatprep.subr.bf16.mxu1 %v5141_v3  ;;  %v6484_v3 = vld [vmem:[#allocation16_spill] sm:$0xff] }
 0x27f   :  { %2228 = vmatpush1.bf16.msra.mxu0 %v4418_v5 }
 0x280   :  { %2321 = vmatprep.subr.bf16.mxu0 %v6474_v51 }
 0x281   :  { %1946 = vmatpush1.bf16.msra.mxu1 %v5153_v10  ;;  %v6487_v10 = vld [vmem:[#allocation19_spill] sm:$0xff] }
 0x282   :  { %1947 = vmatprep.subr.bf16.mxu1 %v5161_v16  ;;  %v6488_v16 = vld [vmem:[#allocation20_spill] sm:$0xff] }
 0x285   :  { %1948 = vmatpush1.bf16.msra.mxu1 %v5171_v40  ;;  %v6489_v40 = vld [vmem:[#allocation21_spill] sm:$0xff] }
 0x286   :  { %1949 = vmatprep.subr.bf16.mxu1 %v5178_v43  ;;  %v6490_v43 = vld [vmem:[#allocation22_spill] sm:$0xff] }
 0x289   :  { %1950 = vmatpush1.bf16.msra.mxu1 %v5189_v55  ;;  %v6492_v55 = vld [vmem:[#allocation24_spill] sm:$0xff] }
 0x28a   :  { %1951 = vmatprep.subr.bf16.mxu1 %v5197_v59  ;;  %v6493_v59 = vld [vmem:[#allocation25_spill] sm:$0xff] }
 0x28d   :  { %1952 = vmatpush1.bf16.msra.mxu1 %v5207_v4  ;;  %v6494_v4 = vld [vmem:[#allocation26_spill] sm:$0xff] }
 0x28e   :  { %1953 = vmatprep.subr.bf16.mxu1 %v5214_v13  ;;  %v6495_v13 = vld [vmem:[#allocation27_spill] sm:$0xff] }
 0x291   :  { %1954 = vmatpush1.bf16.msra.mxu1 %v5225_v39  ;;  %v6497_v39 = vld [vmem:[#allocation29_spill] sm:$0xff] }
 0x292   :  { %1955 = vmatprep.subr.bf16.mxu1 %v5233_v45  ;;  %v6498_v45 = vld [vmem:[#allocation30_spill] sm:$0xff] }
 0x295   :  { %1956 = vmatpush1.bf16.msra.mxu1 %v5243_v61  ;;  %v6499_v61 = vld [vmem:[#allocation31_spill] sm:$0xff] }
 0x296   :  { %1957 = vmatprep.subr.bf16.mxu1 %v5250_v35  ;;  %v6500_v35 = vld [vmem:[#allocation32_spill] sm:$0xff] }
 0x299   :  { %1958 = vmatpush1.bf16.msra.mxu1 %v5261_v14  ;;  %v6501_v14 = vld [vmem:[#allocation33_spill] sm:$0xff] }
 0x29a   :  { %1959 = vmatprep.subr.bf16.mxu1 %v5268_v17  ;;  %v6502_v17 = vld [vmem:[#allocation34_spill] sm:$0xff] }
 0x29d   :  { %1960 = vmatpush1.bf16.msra.mxu1 %v5275_v37  ;;  %v6503_v37 = vld [vmem:[#allocation4_spill] sm:$0xff] }
 0x29e   :  { %1961 = vmatprep.subr.bf16.mxu1 %v5282_v41  ;;  %v6504_v41 = vld [vmem:[#allocation35_spill] sm:$0xff] }
 0x2a1   :  { %1962 = vmatpush1.bf16.msra.mxu1 %v5289_v42  ;;  %v6507_v42 = vld [vmem:[#allocation37_spill] sm:$0xff] }
 0x2a2   :  { %1963 = vmatprep.subr.bf16.mxu1 %v5296_v46  ;;  %v6508_v46 = vld [vmem:[#allocation38_spill] sm:$0xff] }
 0x2a5   :  { %1964 = vmatpush1.bf16.msra.mxu1 %v5303_v53  ;;  %v6509_v53 = vld [vmem:[#allocation39_spill] sm:$0xff] }
 0x2a6   :  { %1976 = vmatprep.subr.bf16.mxu1 %v5310_v56  ;;  %v6510_v56 = vld [vmem:[#allocation40_spill] sm:$0xff] }
 0x2a8   :  { %1966 = vmatmul.mubr.bf16.vlgmr.msra.gmra.mrb[4].mxu1 %v5144_v7  ;;  %v6485_v7 = vld [vmem:[#allocation17_spill] sm:$0xff] }
 0x2a9   :  { %1977 = vmatpush1.bf16.msra.mxu1 %v5317_v58  ;;  %2008 = vmatprep.mubr.bf16.mxu1 %v5218_v33  ;;  %v6496_v33 = vld [vmem:[#allocation28_spill] sm:$0xff]  ;;  %v6511_v58 = vld [vmem:[#allocation41_spill] sm:$0xff] }
 0x2aa   :  { %1978 = vmatprep.subr.bf16.mxu1 %v5324_v60  ;;  %v1678_v60 = vld [vmem:[%s6354_s4] sm:$0x3] }
 0x2ab   :  { %v5989_v18 = vrot.slane %v1678_v60, %v6514_v31  ;;  %v5994_v22 = vrot.slane %v1678_v60, %v6516_v21  ;;  %v4432_v60 = vld [vmem:[%s6353_s5 + $0xc8] sm:$0xff]   ;;  %v4435_v31 = vld [vmem:[%s6353_s5 + $0xe0] sm:$0xff]   ;;  %v4437_v21 = vld [vmem:[%s6353_s5 + $0xf0] sm:$0xff]  }
 0x2ad   :  { %1979 = vmatpush1.bf16.msra.mxu1 %v6475_v11  ;;  %v6519_v11 = vld [vmem:[#allocation46_spill] sm:$0xff] }
 0x2ae   :  { %1980 = vmatprep.subr.bf16.mxu1 %v6476_v15 }
 0x2b1   :  { %1981 = vmatpush1.bf16.msra.mxu1 %v6477_v30 }
 0x2b2   :  { %1982 = vmatprep.subr.bf16.mxu1 %v6478_v38 }
 0x2b5   :  { %1983 = vmatpush1.bf16.msra.mxu1 %v6479_v44 }
 0x2b6   :  { %1984 = vmatprep.subr.bf16.mxu1 %v6480_v47 }
 0x2b9   :  { %1985 = vmatpush1.bf16.msra.mxu1 %v6481_v54  ;;  %v6520_v54 = vld [vmem:[#allocation47_spill] sm:$0xff] }
 0x2ba   :  { %1986 = vmatprep.subr.bf16.mxu1 %v6482_v57 }
 0x2bd   :  { %1987 = vmatpush1.bf16.msra.mxu1 %v6483_v63  ;;  %v6521_v63 = vld [vmem:[#allocation48_spill] sm:$0xff] }
 0x2be   :  { %1988 = vmatprep.subr.bf16.mxu1 %v6484_v3 }
 0x2c1   :  { %1989 = vmatpush1.bf16.msra.mxu1 %v6485_v7  ;;  %v6522_v7 = vld [vmem:[#allocation49_spill] sm:$0xff] }
 0x2c2   :  { %1990 = vmatprep.subr.bf16.mxu1 %v6486_v8  ;;  %v6523_v8 = vld [vmem:[#allocation50_spill] sm:$0xff] }
 0x2c5   :  { %1991 = vmatpush1.bf16.msra.mxu1 %v6487_v10  ;;  %v6524_v10 = vld [vmem:[#allocation51_spill] sm:$0xff] }
 0x2c6   :  { %1992 = vmatprep.subr.bf16.mxu1 %v6488_v16  ;;  %v6525_v16 = vld [vmem:[#allocation52_spill] sm:$0xff] }
 0x2c9   :  { %1993 = vmatpush1.bf16.msra.mxu1 %v6489_v40 }
 0x2ca   :  { %1994 = vmatprep.subr.bf16.mxu1 %v6490_v43 }
 0x2cd   :  { %1995 = vmatpush1.bf16.msra.mxu1 %v6491_v48 }
 0x2ce   :  { %1996 = vmatprep.subr.bf16.mxu1 %v6492_v55 }
 0x2d1   :  { %1997 = vmatpush1.bf16.msra.mxu1 %v6493_v59 }
 0x2d2   :  { %1998 = vmatprep.subr.bf16.mxu1 %v6494_v4  ;;  %v6526_v4 = vld [vmem:[#allocation53_spill] sm:$0xff] }
 0x2d5   :  { %1999 = vmatpush1.bf16.msra.mxu1 %v6495_v13 }
 0x2d6   :  { %2000 = vmatprep.subr.bf16.mxu1 %v5481_v12  ;;  %v6505_v12 = vld [vmem:[#allocation6_spill] sm:$0xff] }
 0x2d9   :  { %2001 = vmatpush1.bf16.msra.mxu1 %v5488_v6  ;;  %v6506_v6 = vld [vmem:[#allocation36_spill] sm:$0xff] }
 0x2da   :  { %2002 = vmatprep.subr.bf16.mxu1 %v6496_v33 }
 0x2dd   :  { %2003 = vmatpush1.bf16.msra.mxu1 %v6497_v39 }
 0x2de   :  { %2004 = vmatprep.subr.bf16.mxu1 %v6498_v45 }
 0x2e1   :  { %2005 = vmatpush1.bf16.msra.mxu1 %v6499_v61 }
 0x2e2   :  { %2006 = vmatprep.subr.bf16.mxu1 %v6500_v35  ;;  %v6527_v35 = vld [vmem:[#allocation54_spill] sm:$0xff] }
 0x2e5   :  { %2007 = vmatpush1.bf16.msra.mxu1 %v6501_v14 }
 0x2e6   :  { %2023 = vmatprep.subr.bf16.mxu1 %v6502_v17 }
 0x2e8   :  { %2009 = vmatmul.mubr.bf16.vlgmr.msra.gmra.mrb[4].mxu1 %v6503_v37 }
 0x2e9   :  { %2024 = vmatpush1.bf16.msra.mxu1 %v6504_v41  ;;  %2055 = vmatprep.mubr.bf16.mxu1 %v6505_v12  ;;  %v4419_v41 = vld [vmem:[%s6353_s5] sm:$0xff]   ;;  %v6528_v12 = vld [vmem:[#allocation55_spill] sm:$0xff] }
 0x2ea   :  { %2025 = vmatprep.subr.bf16.mxu1 %v6506_v6  ;;  %v4421_v6 = vld [vmem:[%s6353_s5 + $0x10] sm:$0xff]  }
 0x2ed   :  { %2026 = vmatpush1.bf16.msra.mxu1 %v6507_v42  ;;  %v4427_v42 = vld [vmem:[%s6353_s5 + $0x40] sm:$0xff]  }
 0x2ee   :  { %2027 = vmatprep.subr.bf16.mxu1 %v6508_v46  ;;  %v4428_v46 = vld [vmem:[%s6353_s5 + $0x48] sm:$0xff]  }
 0x2f1   :  { %2028 = vmatpush1.bf16.msra.mxu1 %v6509_v53  ;;  %v4429_v53 = vld [vmem:[%s6353_s5 + $0x50] sm:$0xff]  }
 0x2f2   :  { %2029 = vmatprep.subr.bf16.mxu1 %v6510_v56  ;;  %v4430_v56 = vld [vmem:[%s6353_s5 + $0x58] sm:$0xff]  }
 0x2f5   :  { %2030 = vmatpush1.bf16.msra.mxu1 %v6511_v58  ;;  %v4431_v58 = vld [vmem:[%s6353_s5 + $0xc0] sm:$0xff]  }
 0x2f6   :  { %2031 = vmatprep.subr.bf16.mxu1 %v6512_v9  ;;  %v4433_v9 = vld [vmem:[%s6353_s5 + $0xd0] sm:$0xff]  }
 0x2f9   :  { %2032 = vmatpush1.bf16.msra.mxu1 %v6515_v50  ;;  %v4436_v50 = vld [vmem:[%s6353_s5 + $0xe8] sm:$0xff]  }
 0x2fa   :  { %2033 = vmatprep.subr.bf16.mxu1 %v6517_v23  ;;  %v4438_v23 = vld [vmem:[%s6353_s5 + $0xf8] sm:$0xff]  }
 0x2fb   :  { %v1665_v24 = vpop.f32.mrb[0].mxu1 }
 0x2fc   :  { %v1690_v25 = vadd.f32 %v5989_v18, %v1665_v24  ;;  %v1667_v26 = vpop.f32.mrb[1].mxu1  ;;  %v4439_v24 = vld [vmem:[%s6353_s5 + $0x100] sm:$0xff]  }
 0x2fd   :  { %v1691_v27 = vadd.f32 %v5994_v22, %v1667_v26  ;;  %v1669_v28 = vpop.f32.mrb[2].mxu1  ;;  %2034 = vmatpush1.bf16.msra.mxu1 %v6518_v29  ;;  %v4441_v26 = vld [vmem:[%s6353_s5 + $0x110] sm:$0xff]   ;;  %v4443_v29 = vld [vmem:[%s6355_s7] sm:$0xff]  }
 0x2fe   :  { %v1692_v2 = vadd.f32 %v5989_v18, %v1669_v28  ;;  %v1671_v5 = vpop.f32.mrb[3].mxu1  ;;  %2035 = vmatprep.subr.bf16.mxu1 %v6519_v11  ;;  %v1694_v30 = vmax.f32 %v1690_v25, 0.0  ;;  %v4440_v25 = vld [vmem:[%s6353_s5 + $0x108] sm:$0xff]   ;;  %v4542_v28 = vmov 0.0  }
 0x2ff   :  { %v1693_v15 = vadd.f32 %v5994_v22, %v1671_v5  ;;  %v1695_v44 = vmax.f32 %v1691_v27, 0.0  ;;  %v4442_v27 = vld [vmem:[%s6353_s5 + $0x118] sm:$0xff]  }
 0x300   :  { %v1696_v38 = vmax.f32 %v1692_v2, 0.0 }
 0x301   :  { %v1697_v47 = vmax.f32 %v1693_v15, 0.0  ;;  %2036 = vmatpush1.bf16.msra.mxu1 %v6520_v54 }
 0x302   :  { %v6004_v57 = vpack.c.bf16 %v1696_v38, %v1694_v30  ;;  %2037 = vmatprep.subr.bf16.mxu1 %v6521_v63 }
 0x303   :  { %v1699_v3 = vpack.c.bf16 %v1697_v47, %v1695_v44 }
 0x305   :  { %2038 = vmatpush1.bf16.msra.mxu1 %v6522_v7 }
 0x306   :  { %2039 = vmatprep.subr.bf16.mxu1 %v6523_v8 }
 0x309   :  { %2040 = vmatpush1.bf16.msra.mxu1 %v6524_v10 }
 0x30a   :  { %2041 = vmatprep.subr.bf16.mxu1 %v6525_v16 }
 0x30c   :  { %v1867_v40 = vpop.f32.mrb[32].mxu0 }
 0x30d   :  { %v1880_v43 = vadd.f32 %v1867_v40, %v5989_v18  ;;  %v1869_v48 = vpop.f32.mrb[33].mxu0  ;;  %2042 = vmatpush1.bf16.msra.mxu1 %v5674_v52 }
 0x30e   :  { %v1881_v55 = vadd.f32 %v1869_v48, %v5994_v22  ;;  %v1871_v59 = vpop.f32.mrb[34].mxu0  ;;  %2043 = vmatprep.subr.bf16.mxu1 %v6526_v4 }
 0x30f   :  { %v1882_v13 = vadd.f32 %v1871_v59, %v5989_v18  ;;  %v1873_v33 = vpop.f32.mrb[35].mxu0  ;;  %v1884_v45 = vmax.f32 %v1880_v43, 0.0 }
 0x310   :  { %v1883_v39 = vadd.f32 %v1873_v33, %v5994_v22  ;;  %v1885_v14 = vmax.f32 %v1881_v55, 0.0 }
 0x311   :  { %v1886_v61 = vmax.f32 %v1882_v13, 0.0  ;;  %2044 = vmatpush1.bf16.msra.mxu1 %v6527_v35 }
 0x312   :  { %v1887_v17 = vmax.f32 %v1883_v39, 0.0  ;;  %2045 = vmatprep.subr.bf16.mxu1 %v5695_v20  ;;  %v4420_v20 = vld [vmem:[%s6353_s5 + $0x8] sm:$0xff]   ;;  %v4446_v39 = vld [vmem:[%s6355_s7 + $0x18] sm:$0xff]  }
 0x313   :  { %v1888_v37 = vpack.c.bf16 %v1886_v61, %v1884_v45  ;;  %v4447_v45 = vld [vmem:[%s6356_s9] sm:$0xff]   ;;  %v4448_v61 = vld [vmem:[%s6356_s9 + $0x8] sm:$0xff]  }
 0x314   :  { %v1889_v52 = vpack.c.bf16 %v1887_v17, %v1885_v14  ;;  %v3844_v14 = vld [vmem:[%s6357_s6] ss:$0 sm:$0xff] }
 0x315   :  { %2046 = vmatpush1.bf16.msra.mxu1 %v6528_v12 }
 0x316   :  { %3793 = vmatprep.mubr.msk.bf16.mxu0 %vm2201_vm1, %v1889_v52  ;;  %2047 = vmatprep.subr.bf16.mxu1 %v5709_v0  ;;  %v4422_v0 = vld [vmem:[%s6353_s5 + $0x18] sm:$0xff]  }
 0x317   :  { %2238 = vmatmul.mubr.bf16.vlgmr.msra.gmra.mrb[36].mxu0 %v1888_v37 }
 0x318   :  { %2322 = vmatpush1.bf16.msra.mxu0 %v4419_v41  ;;  %3806 = vmatprep.mubr.msk.bf16.mxu0 %vm2201_vm1, %v1699_v3 }
 0x319   :  { %2048 = vmatpush1.bf16.msra.mxu1 %v5716_v19  ;;  %2323 = vmatprep.subr.bf16.mxu0 %v6474_v51  ;;  %v6529_v19 = vld [vmem:[#allocation56_spill] sm:$0xff] }
 0x31a   :  { %2049 = vmatprep.subr.bf16.mxu1 %v5723_v49  ;;  %v4423_v49 = vld [vmem:[%s6353_s5 + $0x20] sm:$0xff]  }
 0x31c   :  { %2324 = vmatpush1.bf16.msra.mxu0 %v4420_v20 }
 0x31d   :  { %2050 = vmatpush1.bf16.msra.mxu1 %v5730_v36  ;;  %2325 = vmatprep.subr.bf16.mxu0 %v6474_v51  ;;  %v6530_v36 = vld [vmem:[#allocation5_spill] sm:$0xff] }
 0x31e   :  { %2051 = vmatprep.subr.bf16.mxu1 %v5737_v1  ;;  %v4426_v1 = vld [vmem:[%s6353_s5 + $0x38] sm:$0xff]  }
 0x320   :  { %2326 = vmatpush1.bf16.msra.mxu0 %v4421_v6 }
 0x321   :  { %2052 = vmatpush1.bf16.msra.mxu1 %v5744_v34  ;;  %2327 = vmatprep.subr.bf16.mxu0 %v6474_v51  ;;  %v4424_v34 = vld [vmem:[%s6353_s5 + $0x28] sm:$0xff]  }
 0x322   :  { %2053 = vmatprep.subr.bf16.mxu1 %v5751_v32  ;;  %v4425_v32 = vld [vmem:[%s6353_s5 + $0x30] sm:$0xff]  }
 0x324   :  { %2328 = vmatpush1.bf16.msra.mxu0 %v4422_v0 }
 0x325   :  { %2054 = vmatpush1.bf16.msra.mxu1 %v6529_v19  ;;  %2329 = vmatprep.subr.bf16.mxu0 %v6474_v51 }
 0x326   :  { %3917 = vmatprep.subr.bf16.mxu1 %v4542_v28 }
 0x328   :  { %2330 = vmatpush1.bf16.msra.mxu0 %v4423_v49  ;;  %2056 = vmatmul.mubr.bf16.vlgmr.msra.gmra.mrb[4].mxu1 %v6530_v36  ;;  %v6171_v36 = vld [vmem:[%s6358_s11] sm:$0xff]  }
 0x329   :  { %2331 = vmatprep.subr.bf16.mxu0 %v6474_v51  ;;  %3918 = vmatpush3.bf16.msra.mxu1 %v4443_v29 }
 0x32a   :  { %3919 = vmatprep.subr.bf16.mxu1 %v4542_v28  ;;  %3925 = vmatprep.mubr.msk.bf16.mxu1 %vm4543_vm2, %v4542_v28 }
 0x32c   :  { %2332 = vmatpush1.bf16.msra.mxu0 %v4424_v34  ;;  %v4449_v34 = vld [vmem:[%s6356_s9 + $0x10] sm:$0xff]  }
 0x32d   :  { %2333 = vmatprep.subr.bf16.mxu0 %v6474_v51 }
 0x330   :  { %2334 = vmatpush1.bf16.msra.mxu0 %v4425_v32  ;;  %v6182_v32 = vld [vmem:[%s6358_s11 + $0x8] sm:$0xff]  }
 0x331   :  { %2335 = vmatprep.subr.bf16.mxu0 %v6474_v51 }
 0x334   :  { %2336 = vmatpush1.bf16.msra.mxu0 %v4426_v1  ;;  %v4451_v1 = vld [vmem:[%s6356_s9 + $0x18] sm:$0xff]  }
 0x335   :  { %2337 = vmatprep.subr.bf16.mxu0 %v6474_v51 }
 0x338   :  { %2338 = vmatpush1.bf16.msra.mxu0 %v4427_v42  ;;  %v3845_v42 = vld [vmem:[%s6359_s8] ss:$0 sm:$0xff] }
 0x339   :  { %2339 = vmatprep.subr.bf16.mxu0 %v6474_v51 }
 0x33c   :  { %2340 = vmatpush1.bf16.msra.mxu0 %v4428_v46 }
 0x33d   :  { %2341 = vmatprep.subr.bf16.mxu0 %v6474_v51 }
 0x340   :  { %2342 = vmatpush1.bf16.msra.mxu0 %v4429_v53 }
 0x341   :  { %2343 = vmatprep.subr.bf16.mxu0 %v6474_v51 }
 0x344   :  { %2344 = vmatpush1.bf16.msra.mxu0 %v4430_v56 }
 0x345   :  { %2462 = vmatprep.subr.bf16.mxu0 %v6474_v51 }
 0x347   :  { %2354 = vmatmul.mubr.bf16.vlgmr.msra.gmra.mrb[40].mxu0 %v6004_v57 }
 0x348   :  { %2463 = vmatpush1.bf16.msra.mxu0 %v4431_v58 }
 0x349   :  { %2464 = vmatprep.subr.bf16.mxu0 %v6474_v51 }
 0x34c   :  { %2465 = vmatpush1.bf16.msra.mxu0 %v4432_v60 }
 0x34d   :  { %2466 = vmatprep.subr.bf16.mxu0 %v6474_v51 }
 0x350   :  { %2467 = vmatpush1.bf16.msra.mxu0 %v4433_v9 }
 0x351   :  { %2468 = vmatprep.subr.bf16.mxu0 %v6474_v51 }
 0x354   :  { %2469 = vmatpush1.bf16.msra.mxu0 %v4434_v62 }
 0x355   :  { %2470 = vmatprep.subr.bf16.mxu0 %v6474_v51 }
 0x358   :  { %2471 = vmatpush1.bf16.msra.mxu0 %v4435_v31 }
 0x359   :  { %2472 = vmatprep.subr.bf16.mxu0 %v6474_v51 }
 0x35c   :  { %2473 = vmatpush1.bf16.msra.mxu0 %v4436_v50 }
 0x35d   :  { %2474 = vmatprep.subr.bf16.mxu0 %v6474_v51 }
 0x360   :  { %2475 = vmatpush1.bf16.msra.mxu0 %v4437_v21 }
 0x361   :  { %2476 = vmatprep.subr.bf16.mxu0 %v6474_v51 }
 0x364   :  { %2477 = vmatpush1.bf16.msra.mxu0 %v4438_v23 }
 0x365   :  { %2478 = vmatprep.subr.bf16.mxu0 %v6474_v51 }
 0x368   :  { %2479 = vmatpush1.bf16.msra.mxu0 %v4439_v24 }
 0x369   :  { %2480 = vmatprep.subr.bf16.mxu0 %v6474_v51 }
 0x36c   :  { %2481 = vmatpush1.bf16.msra.mxu0 %v4440_v25  ;;  %v3851_v25 = vld [vmem:[%s6360_s10] ss:$0 sm:$0xff]  ;;  %s4545_s10 = smov 32  }
 0x36d   :  { %2482 = vmatprep.subr.bf16.mxu0 %v6474_v51 }
 0x370   :  { %2483 = vmatpush1.bf16.msra.mxu0 %v4441_v26 }
 0x371   :  { %2484 = vmatprep.subr.bf16.mxu0 %v6474_v51 }
 0x374   :  { %2485 = vmatpush1.bf16.msra.mxu0 %v4442_v27 }
 0x375   :  { %3929 = vmatprep.subr.bf16.mxu0 %v4542_v28 }
 0x3ea   :  { %v2239_v2 = vpop.f32.mrb[36].mxu0 }
 0x3eb   :  { %v2241_v5 = vpop.f32.mrb[37].mxu0 }
 0x3ec   :  { %v2242_v11 = vpop.f32.mrb[38].mxu0 }
 0x3ed   :  { %v2244_v15 = vpop.f32.mrb[39].mxu0 }
 0x3fb   :  { %v2057_v30 = vpop.f32.mrb[4].mxu1 }
 0x3fc   :  { %v2070_v38 = vadd.f32 %v2057_v30, %v5989_v18  ;;  %v2059_v44 = vpop.f32.mrb[5].mxu1 }
 0x3fd   :  { %v2071_v47 = vadd.f32 %v2059_v44, %v5994_v22  ;;  %v2061_v54 = vpop.f32.mrb[6].mxu1 }
 0x3fe   :  { %v2072_v57 = vadd.f32 %v2061_v54, %v5989_v18  ;;  %v2063_v63 = vpop.f32.mrb[7].mxu1  ;;  %v2074_v7 = vmax.f32 %v2070_v38, 0.0  ;;  %v4444_v18 = vld [vmem:[%s6355_s7 + $0x8] sm:$0xff]  }
 0x3ff   :  { %v2073_v3 = vadd.f32 %v2063_v63, %v5994_v22  ;;  %v2075_v10 = vmax.f32 %v2071_v47, 0.0  ;;  %3920 = vmatpush3.bf16.msra.mxu1 %v4444_v18  ;;  %v4445_v22 = vld [vmem:[%s6355_s7 + $0x10] sm:$0xff]  }
 0x400   :  { %v2076_v8 = vmax.f32 %v2072_v57, 0.0  ;;  %3921 = vmatprep.subr.bf16.mxu1 %v4542_v28 }
 0x401   :  { %v2077_v16 = vmax.f32 %v2073_v3, 0.0 }
 0x402   :  { %v2078_v40 = vpack.c.bf16 %v2076_v8, %v2074_v7 }
 0x403   :  { %v2079_v43 = vpack.c.bf16 %v2077_v16, %v2075_v10  ;;  %3922 = vmatpush3.bf16.msra.mxu1 %v4445_v22 }
 0x404   :  { %3923 = vmatprep.subr.bf16.mxu1 %v4542_v28 }
 0x405   :  { %3843 = vmatprep.mubr.msk.bf16.mxu0 %vm2201_vm1, %v2079_v43 }
 0x406   :  { %2495 = vmatmul.mubr.bf16.vlgmr.msra.gmra.mrb[44].mxu0 %v2078_v40 }
 0x407   :  { %3924 = vmatpush3.bf16.msra.mxu1 %v4446_v39  ;;  %3937 = vmatprep.mubr.msk.bf16.mxu0 %vm4543_vm2, %v4542_v28 }
 0x408   :  { %3941 = vmatprep.subr.bf16.mxu1 %v4542_v28  ;;  %3930 = vmatpush3.bf16.msra.mxu0 %v4447_v45 }
 0x409   :  { %3931 = vmatprep.subr.bf16.mxu0 %v4542_v28 }
 0x40c   :  { %3932 = vmatpush3.bf16.msra.mxu0 %v4448_v61 }
 0x40d   :  { %3933 = vmatprep.subr.bf16.mxu0 %v4542_v28 }
 0x410   :  { %3934 = vmatpush3.bf16.msra.mxu0 %v4449_v34 }
 0x411   :  { %3935 = vmatprep.subr.bf16.mxu0 %v4542_v28 }
 0x414   :  { %3936 = vmatpush3.bf16.msra.mxu0 %v4451_v1 }
 0x415   :  { %3957 = vmatprep.subr.bf16.mxu0 %v4542_v28 }
 0x41a   :  { %v2355_v48 = vpop.f32.mrb[40].mxu0 }
 0x41b   :  { %v2356_v55 = vadd.f32 %v2355_v48, %v2239_v2  ;;  %v2357_v59 = vpop.f32.mrb[41].mxu0 }
 0x41c   :  { %v2358_v4 = vpop.f32.mrb[42].mxu0 }
 0x41d   :  { %v2359_v13 = vadd.f32 %v2358_v4, %v2242_v11  ;;  %v2360_v33 = vpop.f32.mrb[43].mxu0 }
 0x4d9   :  { %v2496_v35 = vpop.f32.mrb[44].mxu0 }
 0x4da   :  { %v2503_v17 = vadd.f32 %v2496_v35, %v2356_v55  ;;  %v2498_v37 = vpop.f32.mrb[45].mxu0 }
 0x4db   :  { %v2499_v52 = vpop.f32.mrb[46].mxu0 }
 0x4dc   :  { %v2512_v41 = vadd.f32 %v3844_v14, %v2503_v17  ;;  %v2504_v12 = vadd.f32 %v2499_v52, %v2359_v13  ;;  %v2501_v20 = vpop.f32.mrb[47].mxu0 }
 0x4de   :  { %v2513_v6 = vadd.f32 %v3844_v14, %v2504_v12  ;;  %v2514_v0 = vmax.f32 %v2512_v41, 0.0 }
 0x4e0   :  { %v2515_v49 = vmax.f32 %v2513_v6, 0.0 }
 0x4e2   :  { %v2516_v19 = vpack.c.bf16 %v2515_v49, %v2514_v0 }
 0x4e4   :  { %3926 = vmatmul.mubr.msk.bf16.vlgmr.msra.gmra.mrb[8].mxu1 %vm2201_vm1, %v2516_v19 }
 0x4e5   :  { %3945 = vmatprep.mubr.msk.bf16.mxu1 %vm4543_vm2, %v4542_v28  ;;  %3942 = vmatpush3.bf16.msra.mxu1 %v6171_v36 }
 0x4e6   :  { %3943 = vmatprep.subr.bf16.mxu1 %v4542_v28 }
 0x4e9   :  { %3944 = vmatpush3.bf16.msra.mxu1 %v6182_v32 }
 0x4ea   :  { %3949 = vmatprep.subr.bf16.mxu1 %v4542_v28 }
 0x4ec   :  { %3946 = vmatmul.mubr.bf16.vlgmr.msra.gmra.mrb[12].mxu1 %v6474_v51 }
 0x4ed   :  { %3950 = vmatpush3.bf16.msra.mxu1 %v6171_v36  ;;  %3953 = vmatprep.mubr.msk.bf16.mxu1 %vm4543_vm2, %v4542_v28 }
 0x4ee   :  { %3951 = vmatprep.subr.bf16.mxu1 %v4542_v28 }
 0x4f1   :  { %3952 = vmatpush3.bf16.msra.mxu1 %v6182_v32 }
 0x4f2   :  { %3965 = vmatprep.subr.bf16.mxu1 %v4542_v28 }
 0x5b7   :  { %v2593_v46 = vpop.f32.mrb[8].mxu1 }
 0x5b8   :  { %v2594_v53 = vadd.f32 %v3845_v42, %v2593_v46  ;;  %v3927_v56 = vpop.f32.mrb[9].mxu1 }
 0x5b9   :  { %v2596_v58 = vpop.f32.mrb[10].mxu1 }
 0x5ba   :  { %v2597_v51 = vadd.f32 %v3845_v42, %v2596_v58  ;;  %v3928_v60 = vpop.f32.mrb[11].mxu1  ;;  %v2600_v9 = vmax.f32 %v2594_v53, 0.0 }
 0x5bc   :  { %v2601_v62 = vmax.f32 %v2597_v51, 0.0 }
 0x5be   :  { %v2602_v31 = vpack.c.bf16 %v2601_v62, %v2600_v9 }
 0x5bf   :  { %v2739_v50 = vpop.f32.mrb[12].mxu1 }
 0x5c0   :  { %3938 = vmatmul.mubr.msk.bf16.vlgmr.msra.gmra.mrb[48].mxu0 %vm2201_vm1, %v2602_v31  ;;  %v3947_v21 = vpop.f32.mrb[13].mxu1 }
 0x5c1   :  { %3958 = vmatpush3.bf16.msra.mxu0 %v6171_v36  ;;  %3961 = vmatprep.mubr.msk.bf16.mxu0 %vm4543_vm2, %v4542_v28  ;;  %v2742_v23 = vpop.f32.mrb[14].mxu1 }
 0x5c2   :  { %3959 = vmatprep.subr.bf16.mxu0 %v4542_v28  ;;  %v3948_v24 = vpop.f32.mrb[15].mxu1 }
 0x5c5   :  { %3960 = vmatpush3.bf16.msra.mxu0 %v6182_v32 }
 0x5c6   :  { %3973 = vmatprep.subr.bf16.mxu0 %v4542_v28 }
 0x693   :  { %v2679_v26 = vpop.f32.mrb[48].mxu0 }
 0x694   :  { %v6210_v27 = vadd.f32 %v3851_v25, %v2679_v26  ;;  %v3939_v29 = vpop.f32.mrb[49].mxu0 }
 0x695   :  { %v2682_v2 = vpop.f32.mrb[50].mxu0 }
 0x696   :  { %v2745_v5 = vadd.f32 %v2739_v50, %v6210_v27  ;;  %v6213_v11 = vadd.f32 %v3851_v25, %v2682_v2  ;;  %v3940_v15 = vpop.f32.mrb[51].mxu0 }
 0x698   :  { %4453 = vtanh.f32 %v2745_v5  ;;  %v3859_v38 = vmul.f32 -1.442695, %v2745_v5 }
 0x69a   :  { %4455 = vpow2.f32 %v3859_v38 }
 0x6a2   :  { %v4454_v30 = vpop.eup %4453 }
 0x6a3   :  { %2755 = vrot.lane.b32.xlu0 %v4454_v30, %s4544_s2 }
 0x6a4   :  { %v4456_v44 = vpop.eup %4455 }
 0x6a5   :  { %v2749_v47 = vadd.f32 1.0, %v4456_v44 }
 0x6a7   :  { %4457 = vrcp.f32 %v2749_v47 }
 0x6b1   :  { %v4458_v54 = vpop.eup %4457 }
 0x6b2   :  { %v2753_v3 = vmul.f32 0.0, %v4458_v54 }
 0x715   :  { %v2756_v57 = vpop.permute.xlu0 %2755 }
 0x716   :  { %v2758_v63 = vmul.f32 %v4458_v54, %v2756_v57 }
 0x718   :  { %2760 = vrot.lane.b32.xlu0 %v2758_v63, %s4545_s10 }
 0x78a   :  { %v2761_v7 = vpop.permute.xlu0 %2760 }
 0x78b   :  { %v2763_v8 = vadd.f32 %v2761_v7, %v2753_v3 }
 0x78d   :  { %4459 = vtanh.f32 %v2763_v8  ;;  %v2835_v37 = vrot.slane %v2763_v8, 6 }
 0x797   :  { %v4460_v10 = vpop.eup %4459 }
 0x798   :  { %2766 = vrot.lane.b32.xlu1 %v4460_v10, %s4544_s2 }
 0x80a   :  { %v2767_v16 = vpop.permute.xlu1 %2766 }
 0x80b   :  { %v6218_v40 = vmul.f32 %v4458_v54, %v2767_v16 }
 0x80d   :  { %v2776_v43 = vpack.c.bf16 %v6218_v40, %v6218_v40 }
 0x80f   :  { %2778 = vrot.lane.b32.xlu1 %v2776_v43, %s4545_s10 }
 0x881   :  { %v2779_v48 = vpop.permute.xlu1 %2778 }
 0x882   :  { %3954 = vmatmul.mubr.msk.bf16.vlgmr.msra.gmra.mrb[16].mxu1 %vm428_vm0, %v2779_v48 }
 0x883   :  { %3966 = vmatpush3.bf16.msra.mxu1 %v6171_v36  ;;  %3969 = vmatprep.mubr.msk.bf16.mxu1 %vm4543_vm2, %v4542_v28 }
 0x884   :  { %3967 = vmatprep.subr.bf16.mxu1 %v4542_v28 }
 0x887   :  { %3968 = vmatpush3.bf16.msra.mxu1 %v6182_v32 }
 0x888   :  { %3981 = vmatprep.subr.bf16.mxu1 %v4542_v28 }
 0x955   :  { %v2817_v55 = vpop.f32.mrb[16].mxu1 }
 0x956   :  { %v2824_v59 = vrot.slane %v2817_v55, 6  ;;  %v3955_v4 = vpop.f32.mrb[17].mxu1 }
 0x957   :  { %v2820_v13 = vpop.f32.mrb[18].mxu1 }
 0x958   :  { %v2826_v33 = vadd.f32 %v2824_v59, %v6210_v27  ;;  %v3956_v18 = vpop.f32.mrb[19].mxu1 }
 0x95a   :  { %4461 = vtanh.f32 %v2826_v33  ;;  %v3861_v39 = vmul.f32 -1.442695, %v2826_v33 }
 0x95c   :  { %4463 = vpow2.f32 %v3861_v39 }
 0x964   :  { %v4462_v22 = vpop.eup %4461 }
 0x965   :  { %2839 = vrot.lane.b32.xlu0 %v4462_v22, %s4544_s2 }
 0x966   :  { %v4464_v45 = vpop.eup %4463 }
 0x967   :  { %v2830_v61 = vadd.f32 1.0, %v4464_v45 }
 0x969   :  { %4465 = vrcp.f32 %v2830_v61 }
 0x973   :  { %v4466_v35 = vpop.eup %4465 }
 0x974   :  { %v2837_v52 = vmul.f32 %v4466_v35, %v2835_v37 }
 0x9d7   :  { %v2840_v14 = vpop.permute.xlu0 %2839 }
 0x9d8   :  { %v2842_v17 = vmul.f32 %v4466_v35, %v2840_v14 }
 0x9da   :  { %2844 = vrot.lane.b32.xlu1 %v2842_v17, %s4545_s10 }
 0xa4c   :  { %v2845_v41 = vpop.permute.xlu1 %2844 }
 0xa4d   :  { %v2847_v12 = vadd.f32 %v2845_v41, %v2837_v52 }
 0xa4f   :  { %4467 = vtanh.f32 %v2847_v12  ;;  %v2920_v23 = vrot.slane %v2847_v12, 6 }
 0xa59   :  { %v4468_v20 = vpop.eup %4467 }
 0xa5a   :  { %2850 = vrot.lane.b32.xlu0 %v4468_v20, %s4544_s2 }
 0xacc   :  { %v2851_v6 = vpop.permute.xlu0 %2850 }
 0xacd   :  { %v6234_v0 = vmul.f32 %v4466_v35, %v2851_v6 }
 0xacf   :  { %v2860_v49 = vpack.c.bf16 %v6234_v0, %v6234_v0 }
 0xad1   :  { %v2862_v19 = vrot.slane %v2860_v49, 1 }
 0xad3   :  { %2863 = vrot.lane.b32.xlu1 %v2862_v19, %s4545_s10 }
 0xb45   :  { %v2864_v34 = vpop.permute.xlu1 %2863 }
 0xb46   :  { %3962 = vmatmul.mubr.msk.bf16.vlgmr.msra.gmra.mrb[52].mxu0 %vm428_vm0, %v2864_v34 }
 0xb47   :  { %3974 = vmatpush3.bf16.msra.mxu0 %v6171_v36  ;;  %3977 = vmatprep.mubr.msk.bf16.mxu0 %vm4543_vm2, %v4542_v28 }
 0xb48   :  { %3975 = vmatprep.subr.bf16.mxu0 %v4542_v28 }
 0xb4b   :  { %3976 = vmatpush3.bf16.msra.mxu0 %v6182_v32 }
 0xb4c   :  { %3989 = vmatprep.subr.bf16.mxu0 %v4542_v28 }
 0xc19   :  { %v2902_v1 = vpop.f32.mrb[52].mxu0 }
 0xc1a   :  { %v2909_v42 = vrot.slane %v2902_v1, 4  ;;  %v3963_v46 = vpop.f32.mrb[53].mxu0 }
 0xc1b   :  { %v2905_v53 = vpop.f32.mrb[54].mxu0 }
 0xc1c   :  { %v2911_v56 = vadd.f32 %v2909_v42, %v6210_v27  ;;  %v3964_v58 = vpop.f32.mrb[55].mxu0 }
 0xc1e   :  { %4469 = vtanh.f32 %v2911_v56  ;;  %v3863_v60 = vmul.f32 -1.442695, %v2911_v56 }
 0xc20   :  { %4471 = vpow2.f32 %v3863_v60 }
 0xc28   :  { %v4470_v51 = vpop.eup %4469 }
 0xc29   :  { %2924 = vrot.lane.b32.xlu0 %v4470_v51, %s4544_s2 }
 0xc2a   :  { %v4472_v9 = vpop.eup %4471 }
 0xc2b   :  { %v2915_v62 = vadd.f32 1.0, %v4472_v9 }
 0xc2d   :  { %4473 = vrcp.f32 %v2915_v62 }
 0xc37   :  { %v4474_v31 = vpop.eup %4473 }
 0xc38   :  { %v2922_v24 = vmul.f32 %v4474_v31, %v2920_v23 }
 0xc9b   :  { %v2925_v50 = vpop.permute.xlu0 %2924 }
 0xc9c   :  { %v2927_v21 = vmul.f32 %v4474_v31, %v2925_v50 }
 0xc9e   :  { %2929 = vrot.lane.b32.xlu1 %v2927_v21, %s4545_s10 }
 0xd10   :  { %v2930_v25 = vpop.permute.xlu1 %2929 }
 0xd11   :  { %v2932_v26 = vadd.f32 %v2930_v25, %v2922_v24 }
 0xd13   :  { %4475 = vtanh.f32 %v2932_v26  ;;  %v3005_v59 = vrot.slane %v2932_v26, 6 }
 0xd1d   :  { %v4476_v29 = vpop.eup %4475 }
 0xd1e   :  { %2935 = vrot.lane.b32.xlu0 %v4476_v29, %s4544_s2 }
 0xd90   :  { %v2936_v2 = vpop.permute.xlu0 %2935 }
 0xd91   :  { %v6250_v5 = vmul.f32 %v4474_v31, %v2936_v2 }
 0xd93   :  { %v2945_v15 = vpack.c.bf16 %v6250_v5, %v6250_v5 }
 0xd95   :  { %v2947_v30 = vrot.slane %v2945_v15, 2 }
 0xd97   :  { %2948 = vrot.lane.b32.xlu1 %v2947_v30, %s4545_s10 }
 0xe09   :  { %v2949_v38 = vpop.permute.xlu1 %2948 }
 0xe0a   :  { %3970 = vmatmul.mubr.msk.bf16.vlgmr.msra.gmra.mrb[20].mxu1 %vm428_vm0, %v2949_v38 }
 0xe0b   :  { %3982 = vmatpush3.bf16.msra.mxu1 %v6171_v36  ;;  %3985 = vmatprep.mubr.msk.bf16.mxu1 %vm4543_vm2, %v4542_v28 }
 0xe0c   :  { %3983 = vmatprep.subr.bf16.mxu1 %v4542_v28 }
 0xe0f   :  { %3984 = vmatpush3.bf16.msra.mxu1 %v6182_v32 }
 0xe10   :  { %3997 = vmatprep.subr.bf16.mxu1 %v4542_v28 }
 0xedd   :  { %v2987_v44 = vpop.f32.mrb[20].mxu1 }
 0xede   :  { %v2994_v47 = vrot.slane %v2987_v44, 2  ;;  %v3971_v54 = vpop.f32.mrb[21].mxu1 }
 0xedf   :  { %v2990_v57 = vpop.f32.mrb[22].mxu1 }
 0xee0   :  { %v2996_v63 = vadd.f32 %v2994_v47, %v6210_v27  ;;  %v3972_v3 = vpop.f32.mrb[23].mxu1 }
 0xee2   :  { %4477 = vtanh.f32 %v2996_v63  ;;  %v3865_v8 = vmul.f32 -1.442695, %v2996_v63 }
 0xee4   :  { %4479 = vpow2.f32 %v3865_v8 }
 0xeec   :  { %v4478_v7 = vpop.eup %4477 }
 0xeed   :  { %3009 = vrot.lane.b32.xlu0 %v4478_v7, %s4544_s2 }
 0xeee   :  { %v4480_v10 = vpop.eup %4479 }
 0xeef   :  { %v3000_v16 = vadd.f32 1.0, %v4480_v10 }
 0xef1   :  { %4481 = vrcp.f32 %v3000_v16 }
 0xefb   :  { %v4482_v43 = vpop.eup %4481 }
 0xefc   :  { %v3007_v4 = vmul.f32 %v4482_v43, %v3005_v59 }
 0xf5f   :  { %v3010_v48 = vpop.permute.xlu0 %3009 }
 0xf60   :  { %v3012_v55 = vmul.f32 %v4482_v43, %v3010_v48 }
 0xf62   :  { %3014 = vrot.lane.b32.xlu1 %v3012_v55, %s4545_s10 }
 0xfd4   :  { %v3015_v13 = vpop.permute.xlu1 %3014 }
 0xfd5   :  { %v3017_v33 = vadd.f32 %v3015_v13, %v3007_v4 }
 0xfd7   :  { %4483 = vtanh.f32 %v3017_v33  ;;  %v3087_v1 = vrot.slane %v3017_v33, 6 }
 0xfe1   :  { %v4484_v27 = vpop.eup %4483 }
 0xfe2   :  { %3020 = vrot.lane.b32.xlu0 %v4484_v27, %s4544_s2 }
0x1054   :  { %v3021_v18 = vpop.permute.xlu0 %3020 }
0x1055   :  { %v6266_v22 = vmul.f32 %v4482_v43, %v3021_v18 }
0x1057   :  { %v3030_v39 = vpack.c.bf16 %v6266_v22, %v6266_v22 }
0x1059   :  { %v3032_v45 = vrot.slane %v3030_v39, 3 }
0x105b   :  { %3033 = vrot.lane.b32.xlu1 %v3032_v45, %s4545_s10 }
0x10cd   :  { %v3034_v61 = vpop.permute.xlu1 %3033 }
0x10ce   :  { %3978 = vmatmul.mubr.msk.bf16.vlgmr.msra.gmra.mrb[56].mxu0 %vm428_vm0, %v3034_v61 }
0x10cf   :  { %3990 = vmatpush3.bf16.msra.mxu0 %v6171_v36  ;;  %3993 = vmatprep.mubr.msk.bf16.mxu0 %vm4543_vm2, %v4542_v28 }
0x10d0   :  { %3991 = vmatprep.subr.bf16.mxu0 %v4542_v28 }
0x10d3   :  { %3992 = vmatpush3.bf16.msra.mxu0 %v6182_v32 }
0x11a1   :  { %v3072_v35 = vpop.f32.mrb[56].mxu0 }
0x11a2   :  { %v3078_v14 = vadd.f32 %v3072_v35, %v6213_v11  ;;  %v3979_v17 = vpop.f32.mrb[57].mxu0 }
0x11a3   :  { %v3075_v37 = vpop.f32.mrb[58].mxu0 }
0x11a4   :  { %4485 = vtanh.f32 %v3078_v14  ;;  %v3980_v52 = vpop.f32.mrb[59].mxu0  ;;  %v3867_v12 = vmul.f32 -1.442695, %v3078_v14 }
0x11a6   :  { %4487 = vpow2.f32 %v3867_v12 }
0x11ae   :  { %v4486_v41 = vpop.eup %4485 }
0x11af   :  { %3091 = vrot.lane.b32.xlu0 %v4486_v41, %s4544_s2 }
0x11b0   :  { %v4488_v20 = vpop.eup %4487 }
0x11b1   :  { %v3082_v6 = vadd.f32 1.0, %v4488_v20 }
0x11b3   :  { %4489 = vrcp.f32 %v3082_v6 }
0x11bd   :  { %v4490_v49 = vpop.eup %4489 }
0x11be   :  { %v3089_v42 = vmul.f32 %v4490_v49, %v3087_v1 }
0x1221   :  { %v3092_v19 = vpop.permute.xlu0 %3091 }
0x1222   :  { %v3094_v34 = vmul.f32 %v4490_v49, %v3092_v19 }
0x1224   :  { %3096 = vrot.lane.b32.xlu1 %v3094_v34, %s4545_s10 }
0x1296   :  { %v3097_v46 = vpop.permute.xlu1 %3096 }
0x1297   :  { %v3099_v53 = vadd.f32 %v3097_v46, %v3089_v42 }
0x1299   :  { %4491 = vtanh.f32 %v3099_v53 }
0x12a3   :  { %v4492_v56 = vpop.eup %4491 }
0x12a4   :  { %3102 = vrot.lane.b32.xlu0 %v4492_v56, %s4544_s2 }
0x1316   :  { %v3103_v58 = vpop.permute.xlu0 %3102 }
0x1317   :  { %v6281_v51 = vmul.f32 %v4490_v49, %v3103_v58 }
0x1319   :  { %v3111_v60 = vpack.c.bf16 %v6281_v51, %v6281_v51 }
0x131b   :  { %3113 = vrot.lane.b32.xlu1 %v3111_v60, %s4545_s10 }
0x138d   :  { %v3114_v9 = vpop.permute.xlu1 %3113 }
0x138e   :  { %3986 = vmatmul.mubr.msk.bf16.vlgmr.msra.gmra.mrb[24].mxu1 %vm428_vm0, %v3114_v9 }
0x138f   :  { %3998 = vmatpush3.bf16.msra.mxu1 %v6171_v36  ;;  %4001 = vmatprep.mubr.msk.bf16.mxu1 %vm4543_vm2, %v4542_v28 }
0x1390   :  { %3999 = vmatprep.subr.bf16.mxu1 %v4542_v28 }
0x1393   :  { %4000 = vmatpush3.bf16.msra.mxu1 %v6182_v32  ;;  %v3170_v32 = vrot.slane %v3099_v53, 6 }
0x1461   :  { %v3152_v62 = vpop.f32.mrb[24].mxu1 }
0x1462   :  { %v3159_v31 = vrot.slane %v3152_v62, 6  ;;  %v3987_v50 = vpop.f32.mrb[25].mxu1 }
0x1463   :  { %v3155_v21 = vpop.f32.mrb[26].mxu1 }
0x1464   :  { %v3161_v23 = vadd.f32 %v3159_v31, %v6213_v11  ;;  %v3988_v24 = vpop.f32.mrb[27].mxu1 }
0x1466   :  { %4493 = vtanh.f32 %v3161_v23  ;;  %v3869_v26 = vmul.f32 -1.442695, %v3161_v23 }
0x1468   :  { %4495 = vpow2.f32 %v3869_v26  ;;  %v3367_v26 = vld [vmem:[%s6361_s12 + $0x8] sm:$0xff] }
0x1470   :  { %v4494_v25 = vpop.eup %4493 }
0x1471   :  { %3174 = vrot.lane.b32.xlu0 %v4494_v25, %s4544_s2 }
0x1472   :  { %v4496_v36 = vpop.eup %4495 }
0x1473   :  { %v3165_v29 = vadd.f32 1.0, %v4496_v36  ;;  %v3368_v36 = vld [vmem:[%s6361_s12 + $0x10] sm:$0xff] }
0x1475   :  { %4497 = vrcp.f32 %v3165_v29 }
0x147f   :  { %v4498_v2 = vpop.eup %4497 }
0x1480   :  { %v3172_v30 = vmul.f32 %v4498_v2, %v3170_v32 }
0x14e3   :  { %v3175_v28 = vpop.permute.xlu0 %3174 }
0x14e4   :  { %v3177_v15 = vmul.f32 %v4498_v2, %v3175_v28 }
0x14e6   :  { %3179 = vrot.lane.b32.xlu1 %v3177_v15, %s4545_s10 }
0x1558   :  { %v3180_v38 = vpop.permute.xlu1 %3179 }
0x1559   :  { %v3182_v44 = vadd.f32 %v3180_v38, %v3172_v30 }
0x155b   :  { %4499 = vtanh.f32 %v3182_v44  ;;  %v3254_v45 = vrot.slane %v3182_v44, 6 }
0x1565   :  { %v4500_v47 = vpop.eup %4499 }
0x1566   :  { %3185 = vrot.lane.b32.xlu0 %v4500_v47, %s4544_s2 }
0x15d8   :  { %v3186_v54 = vpop.permute.xlu0 %3185 }
0x15d9   :  { %v6296_v57 = vmul.f32 %v4498_v2, %v3186_v54 }
0x15db   :  { %v3194_v63 = vpack.c.bf16 %v6296_v57, %v6296_v57 }
0x15dd   :  { %v3196_v3 = vrot.slane %v3194_v63, 1  ;;  %v3874_v63 = vld [vmem:[%s6362_s13] ss:$0 sm:$0xff] }
0x15df   :  { %3197 = vrot.lane.b32.xlu1 %v3196_v3, %s4545_s10 }
0x1651   :  { %v3198_v7 = vpop.permute.xlu1 %3197 }
0x1652   :  { %3994 = vmatmul.mubr.msk.bf16.vlgmr.msra.gmra.mrb[60].mxu0 %vm428_vm0, %v3198_v7 }
0x1725   :  { %v3236_v8 = vpop.f32.mrb[60].mxu0 }
0x1726   :  { %v3243_v10 = vrot.slane %v3236_v8, 4  ;;  %v3995_v16 = vpop.f32.mrb[61].mxu0 }
0x1727   :  { %v3239_v43 = vpop.f32.mrb[62].mxu0 }
0x1728   :  { %v3245_v48 = vadd.f32 %v3243_v10, %v6213_v11  ;;  %v3996_v55 = vpop.f32.mrb[63].mxu0 }
0x172a   :  { %4501 = vtanh.f32 %v3245_v48  ;;  %v3871_v4 = vmul.f32 -1.442695, %v3245_v48 }
0x172c   :  { %4503 = vpow2.f32 %v3871_v4 }
0x1734   :  { %v4502_v59 = vpop.eup %4501 }
0x1735   :  { %3258 = vrot.lane.b32.xlu0 %v4502_v59, %s4544_s2 }
0x1736   :  { %v4504_v13 = vpop.eup %4503 }
0x1737   :  { %v3249_v33 = vadd.f32 1.0, %v4504_v13 }
0x1739   :  { %4505 = vrcp.f32 %v3249_v33 }
0x1743   :  { %v4506_v27 = vpop.eup %4505 }
0x1744   :  { %v3256_v61 = vmul.f32 %v4506_v27, %v3254_v45 }
0x17a7   :  { %v3259_v18 = vpop.permute.xlu0 %3258 }
0x17a8   :  { %v3261_v39 = vmul.f32 %v4506_v27, %v3259_v18 }
0x17aa   :  { %3263 = vrot.lane.b32.xlu1 %v3261_v39, %s4545_s10 }
0x181c   :  { %v3264_v35 = vpop.permute.xlu1 %3263 }
0x181d   :  { %v3266_v14 = vadd.f32 %v3264_v35, %v3256_v61 }
0x181f   :  { %4507 = vtanh.f32 %v3266_v14 }
0x1829   :  { %v4508_v17 = vpop.eup %4507 }
0x182a   :  { %3269 = vrot.lane.b32.xlu0 %v4508_v17, %s4544_s2 }
0x189c   :  { %v3270_v37 = vpop.permute.xlu0 %3269 }
0x189d   :  { %v3272_v52 = vmul.f32 %v4506_v27, %v3270_v37 }
0x189f   :  { %v3278_v41 = vpack.c.bf16 %v3272_v52, %v3272_v52 }
0x18a1   :  { %v3280_v12 = vrot.slane %v3278_v41, 2 }
0x18a3   :  { %3281 = vrot.lane.b32.xlu1 %v3280_v12, %s4545_s10 }
0x1915   :  { %v3282_v20 = vpop.permute.xlu1 %3281 }
0x1916   :  { %4002 = vmatmul.mubr.msk.bf16.vlgmr.msra.gmra.mrb[28].mxu1 %vm428_vm0, %v3282_v20 }
0x19e9   :  { %v3320_v6 = vpop.f32.mrb[28].mxu1 }
0x19ea   :  { %v3327_v49 = vrot.slane %v3320_v6, 2  ;;  %v4003_v19 = vpop.f32.mrb[29].mxu1 }
0x19eb   :  { %v3323_v34 = vpop.f32.mrb[30].mxu1 }
0x19ec   :  { %v3329_v1 = vadd.f32 %v3327_v49, %v6213_v11  ;;  %v4004_v42 = vpop.f32.mrb[31].mxu1  ;;  %v3338_v11 = vrot.slane %v3266_v14, 6 }
0x19ee   :  { %4509 = vtanh.f32 %v3329_v1  ;;  %v3873_v53 = vmul.f32 -1.442695, %v3329_v1 }
0x19f0   :  { %4511 = vpow2.f32 %v3873_v53 }
0x19f8   :  { %v4510_v46 = vpop.eup %4509 }
0x19f9   :  { %3342 = vrot.lane.b32.xlu0 %v4510_v46, %s4544_s2 }
0x19fa   :  { %v4512_v56 = vpop.eup %4511 }
0x19fb   :  { %v3333_v58 = vadd.f32 1.0, %v4512_v56 }
0x19fd   :  { %4513 = vrcp.f32 %v3333_v58 }
0x1a07   :  { %v4514_v60 = vpop.eup %4513 }
0x1a08   :  { %v3340_v31 = vmul.f32 %v4514_v60, %v3338_v11 }
0x1a6b   :  { %v3343_v9 = vpop.permute.xlu0 %3342 }
0x1a6c   :  { %v3345_v62 = vmul.f32 %v4514_v60, %v3343_v9 }
0x1a6e   :  { %3347 = vrot.lane.b32.xlu1 %v3345_v62, %s4545_s10 }
0x1a72   :  { %2771 = vrot.lane.b32.xlu1 %v6218_v40, %s4545_s10 }
0x1a76   :  { %2940 = vrot.lane.b32.xlu1 %v6250_v5, %s4545_s10 }
0x1a7a   :  { %3107 = vrot.lane.b32.xlu1 %v6281_v51, %s4545_s10  ;;  %v3366_v51 = vld [vmem:[%s6361_s12] sm:$0xff] }
0x1a7b   :  { %v4016_v29 = vpack.c.bf16 %v3367_v26, %v3366_v51 }
0x1a7d   :  { %4017 = vmatprep.subr.bf16.mxu0 %v4016_v29 }
0x1a7e   :  { %3274 = vrot.lane.b32.xlu1 %v3272_v52, %s4545_s10  ;;  %4019 = vmatpush3.bf16.msra.mxu0 %v4016_v29 }
0x1ae0   :  { %v3348_v50 = vpop.permute.xlu1 %3347 }
0x1ae1   :  { %v3350_v21 = vadd.f32 %v3348_v50, %v3340_v31 }
0x1ae3   :  { %4515 = vtanh.f32 %v3350_v21 }
0x1ae4   :  { %v2772_v23 = vpop.permute.xlu1 %2771 }
0x1ae5   :  { %2775 = vst.msk [vmem:[#allocation2] sm:$0x3] %vm2774_vm3, %v2772_v23 }
0x1ae8   :  { %v2941_v24 = vpop.permute.xlu1 %2940 }
0x1ae9   :  { %2944 = vst.msk [vmem:[#allocation2] sm:$0x30] %vm2943_vm4, %v2941_v24 }
0x1aec   :  { %v3108_v40 = vpop.permute.xlu1 %3107 }
0x1aed   :  { %v4516_v25 = vpop.eup %4515  ;;  %3110 = vst.msk [vmem:[#allocation2 + $0x8] sm:$0x3] %vm2774_vm3, %v3108_v40 }
0x1aee   :  { %3353 = vrot.lane.b32.xlu0 %v4516_v25, %s4544_s2 }
0x1af0   :  { %v3275_v5 = vpop.permute.xlu1 %3274 }
0x1af1   :  { %3277 = vst.msk [vmem:[#allocation2 + $0x8] sm:$0x30] %vm2943_vm4, %v3275_v5 }
0x1af2   :  { %2855 = vrot.lane.b32.xlu0 %v6234_v0, %s4545_s10  ;;  %v3369_v0 = vld [vmem:[%s6361_s12 + $0x18] sm:$0xff] }
0x1af6   :  { %3025 = vrot.lane.b32.xlu0 %v6266_v22, %s4545_s10  ;;  %v4020_v22 = vpack.c.bf16 %v3369_v0, %v3368_v36 }
0x1af8   :  { %4021 = vmatprep.subr.bf16.mxu0 %v4020_v22 }
0x1af9   :  { %4023 = vmatpush3.bf16.msra.mxu0 %v4020_v22 }
0x1afa   :  { %3190 = vrot.lane.b32.xlu0 %v6296_v57, %s4545_s10 }
0x1b60   :  { %v3354_v2 = vpop.permute.xlu0 %3353 }
0x1b61   :  { %v3356_v28 = vmul.f32 %v4514_v60, %v3354_v2 }
0x1b63   :  { %3358 = vrot.lane.b32.xlu0 %v3356_v28, %s4545_s10 }
0x1b64   :  { %v2856_v15 = vpop.permute.xlu0 %2855 }
0x1b65   :  { %2859 = vst.msk [vmem:[#allocation2] sm:$0xc] %vm2858_vm5, %v2856_v15 }
0x1b68   :  { %v3026_v32 = vpop.permute.xlu0 %3025 }
0x1b69   :  { %3029 = vst.msk [vmem:[#allocation2] sm:$0xc0] %vm3028_vm6, %v3026_v32 }
0x1b6c   :  { %v3191_v30 = vpop.permute.xlu0 %3190 }
0x1b6d   :  { %3193 = vst.msk [vmem:[#allocation2 + $0x8] sm:$0xc] %vm2858_vm5, %v3191_v30 }
0x1b70   :  { %v3362_v38 = vld [vmem:[#allocation2] sm:$0xff] }
0x1b71   :  { %v3364_v44 = vmax.f32 %v3362_v38, 0.0 }
0x1b73   :  { %4013 = vmatprep.mubr.msk.f32.mxu0 %vm428_vm0, %v3364_v44 }
0x1bd5   :  { %v3359_v47 = vpop.permute.xlu0 %3358 }
0x1bd6   :  { %3361 = vst.msk [vmem:[#allocation2 + $0x8] sm:$0xc0] %vm3028_vm6, %v3359_v47 }
0x1bdd   :  { %v3363_v54 = vld [vmem:[#allocation2 + $0x8] sm:$0xff] }
0x1bde   :  { %v3365_v57 = vmax.f32 %v3363_v54, 0.0 }
0x1be0   :  { %4014 = vmatmul.mubr.msk.f32.vlgmr.msra.gmra.mrb[64].mxu0 %vm428_vm0, %v3365_v57 }
0x1cb3   :  { %v4015_v3 = vpop.f32.mrb[64].mxu0 }
0x1cb4   :  { %v3455_v7 = vadd.f32 %v4015_v3, %v3874_v63  ;;  %v3449_v8 = vpop.f32.mrb[65].mxu0 }
0x1cb5   :  { %v3450_v10 = vadd.f32 %v3874_v63, %v3449_v8 }
0x1cb6   :  { %3460 = vst.msk [vmem:[%s6363_s14 + $0x8] sm:$0xff] %vm3458_vm7, %v3455_v7 }
0x1cb7   :  { %3459 = vst.msk [vmem:[%s6363_s14] sm:$0xff] %vm3458_vm7, %v3450_v10 }

</bundles_post_ra>
